<compile_context>
chip_gen: v6e
topology: v6e:2x2x1
jax: 0.10.0
libtpu: 0.0.40
codegen_flags: <defaults>
</compile_context>

<pallas_src>
import jax
import jax.numpy as jnp
from jax import lax
from jax.experimental import pallas as pl
from jax.experimental.pallas import tpu as pltpu

C_IN = 3          # input_channel
C_MID = 64        # conv_middle_channel
C_OUT = 3         # output_channel
K = 3             # kernel_size
NEG_SLOPE = 0.05  # LeakyReLU negative_slope
BN_EPS = 1e-5


def _leaky(v):
    return jnp.where(v >= 0, v, v * NEG_SLOPE)


def _round_up(v, m):
    return -(-v // m) * m


def _make_kernel(W, NB, S1, L2P):
    """BasicBlock kernel for NB images whose rows keep stride W when flattened."""
    res_off = (K - 1) * W + (K - 1)   # flat offset of inputs[:, :, 2:, 2:]

    def kernel(x_ref, w1_ref, w2_ref, b1_ref, b2_ref, o_ref, mid_ref, stk2_ref):
        # x_ref  : (NB, C_IN, XP) f32   images, channel-major, rows flattened on lanes
        # w1_ref : (C_MID, K*K*C_IN)    bf16 conv1 weights (tap-major, BN1 scale folded)
        # w2_ref : (C_OUT, K*K*C_MID)   bf16 conv2 weights (tap-major, BN2 scale folded)
        # b1_ref : (C_MID, 1) f32       folded BN1 bias
        # b2_ref : (C_OUT, 1) f32       folded BN2 bias
        # o_ref  : (C_OUT, NB*L2P) f32  wide-stride conv2 output (wrapper crops)
        # mid_ref: (C_MID, NB*S1) bf16  conv1 -> bn1 -> leaky, wide-stride flat grid
        # stk2_ref: (K*K*C_MID, NB*L2P) bf16   im2col stack for conv2

        # ---- conv1: im2col in registers, one MXU pass over all NB images ----
        segs = []
        for nb in range(NB):
            rows = [x_ref[nb, :, dy * W + dx: dy * W + dx + S1]
                    for dy in range(K) for dx in range(K)]          # 9 x (C_IN, S1)
            segs.append(jnp.concatenate(rows, axis=0))              # (K*K*C_IN, S1)
        stk1 = segs[0] if NB == 1 else jnp.concatenate(segs, axis=-1)
        mid = jnp.dot(w1_ref[...], stk1.astype(jnp.bfloat16),
                      preferred_element_type=jnp.float32)           # (C_MID, NB*S1) f32
        mid_ref[...] = _leaky(mid + b1_ref[...]).astype(mid_ref.dtype)

        # ---- conv2: im2col stack in VMEM (64-row blocks => sublane-aligned stores) ----
        for nb in range(NB):
            for dy in range(K):
                for dx in range(K):
                    tap = dy * K + dx
                    src = nb * S1 + dy * W + dx
                    stk2_ref[tap * C_MID:(tap + 1) * C_MID,
                             nb * L2P:(nb + 1) * L2P] = mid_ref[:, src:src + L2P]

        acc2 = jnp.dot(w2_ref[...], stk2_ref[...],
                       preferred_element_type=jnp.float32)          # (C_OUT, NB*L2P) f32

        if NB == 1:
            res = x_ref[0, :, res_off:res_off + L2P]
        else:
            res = jnp.concatenate(
                [x_ref[nb, :, res_off:res_off + L2P] for nb in range(NB)], axis=-1)
        o_ref[...] = _leaky(acc2 + b2_ref[...] + res).astype(o_ref.dtype)

    return kernel


def _fold_conv_bn(w_hwio, scale, bias):
    """(K,K,Cin,Cout) conv weight + BN scale/bias -> dense 2D (Cout, K*K*Cin) bf16 + f32 bias."""
    w = w_hwio * scale[None, None, None, :]                   # fold BN scale into weights
    cout = w.shape[3]
    w2d = jnp.transpose(w, (3, 0, 1, 2)).reshape(cout, -1)    # row = cout, col = tap*Cin + cin
    return w2d.astype(jnp.bfloat16), bias.reshape(cout, 1).astype(jnp.float32)


def basic_block_forward(x_nchw, w1_hwio, w2_hwio, s1, b1, s2, b2, *, nb_max=4):
    x = x_nchw.astype(jnp.float32)
    N, C, H, W = x.shape
    assert C == C_IN
    H2, W2 = H - 2 * (K - 1), W - 2 * (K - 1)
    assert H2 > 0 and W2 > 0

    L2 = H2 * W                          # wide output length (rows keep stride W)
    res_off = (K - 1) * W + (K - 1)      # flat offset of inputs[:, :, 2:, 2:]
    L2P = _round_up(L2, 128)             # lane-dense output width
    S1 = _round_up(res_off + L2P, 128)   # mid width / conv1 free dim (covers all conv2 shifts)
    XP = _round_up(res_off + S1, 128)    # padded flat image width (covers all conv1 shifts)

    # Batch NB images per grid step, but keep grid length >= 2 (v7x: two TensorCores).
    NB = min(nb_max, max(1, N // 2))
    G = pl.cdiv(N, NB)
    N_pad = G * NB

    w1t, b1c = _fold_conv_bn(w1_hwio, s1, b1)
    w2t, b2c = _fold_conv_bn(w2_hwio, s2, b2)

    x_flat = x.reshape(N, C_IN, H * W)
    x_flat = jnp.pad(x_flat, ((0, N_pad - N), (0, 0), (0, XP - H * W)))

    kernel = _make_kernel(W, NB, S1, L2P)

    flops = 2 * N_pad * (C_MID * (K * K * C_IN) * S1 + C_OUT * (K * K * C_MID) * L2P)
    bytes_accessed = (x_flat.size * 4 + N_pad * C_OUT * L2P * 4
                      + w1t.size * 2 + w2t.size * 2 + b1c.size * 4 + b2c.size * 4)

    out_wide = pl.pallas_call(
        kernel,
        out_shape=jax.ShapeDtypeStruct((G, C_OUT, NB * L2P), jnp.float32),
        grid_spec=pltpu.PrefetchScalarGridSpec(
            num_scalar_prefetch=0,
            grid=(G,),
            in_specs=[
                pl.BlockSpec((NB, C_IN, XP), lambda g: (g, 0, 0)),
                pl.BlockSpec((C_MID, K * K * C_IN), lambda g: (0, 0)),
                pl.BlockSpec((C_OUT, K * K * C_MID), lambda g: (0, 0)),
                pl.BlockSpec((C_MID, 1), lambda g: (0, 0)),
                pl.BlockSpec((C_OUT, 1), lambda g: (0, 0)),
            ],
            out_specs=pl.BlockSpec((None, C_OUT, NB * L2P), lambda g: (g, 0, 0)),
            scratch_shapes=[
                pltpu.VMEM((C_MID, NB * S1), jnp.bfloat16),          # mid activations
                pltpu.VMEM((K * K * C_MID, NB * L2P), jnp.bfloat16), # conv2 im2col stack
            ],
        ),
        compiler_params=pltpu.CompilerParams(
            dimension_semantics=("parallel",),
            vmem_limit_bytes=32 * 1024 * 1024,
        ),
        cost_estimate=pl.CostEstimate(flops=flops, transcendentals=0,
                                      bytes_accessed=bytes_accessed),
    )(x_flat, w1t, w2t, b1c, b2c)

    # Un-concatenate the NB lane segments, drop batch padding, then crop the wide rows.
    out = out_wide.reshape(G, C_OUT, NB, L2P)
    out = jnp.transpose(out, (0, 2, 1, 3)).reshape(N_pad, C_OUT, L2P)[:N]
    return out[:, :, :L2].reshape(N, C_OUT, H2, W)[:, :, :, :W2]


def reference_forward(x_nchw, w1_hwio, w2_hwio, s1, b1, s2, b2):
    """Pure-JAX reference mirroring the PyTorch forward (eval-mode BN)."""
    x = jnp.transpose(x_nchw, (0, 2, 3, 1)).astype(jnp.float32)
    dn = ("NHWC", "HWIO", "NHWC")
    y = lax.conv_general_dilated(x, w1_hwio, (1, 1), "VALID",
                                 dimension_numbers=dn,
                                 precision=lax.Precision.HIGHEST)
    y = _leaky(y * s1 + b1)
    y = lax.conv_general_dilated(y, w2_hwio, (1, 1), "VALID",
                                 dimension_numbers=dn,
                                 precision=lax.Precision.HIGHEST)
    y = y * s2 + b2
    H2, W2 = y.shape[1], y.shape[2]
    y = y + x[:, K - 1:H2 + K - 1, K - 1:W2 + K - 1, :]
    y = _leaky(y)
    return jnp.transpose(y, (0, 3, 1, 2))


def make_params(key):
    ks = jax.random.split(key, 10)
    # PyTorch Conv2d weights are OIHW; build them, then convert to HWIO.
    w1_oihw = 0.1 * jax.random.normal(ks[0], (C_MID, C_IN, K, K), jnp.float32)
    w2_oihw = 0.1 * jax.random.normal(ks[1], (C_OUT, C_MID, K, K), jnp.float32)
    w1_hwio = jnp.transpose(w1_oihw, (2, 3, 1, 0))
    w2_hwio = jnp.transpose(w2_oihw, (2, 3, 1, 0))

    def bn_params(kg, kb, km, kv, c):
        gamma = 1.0 + 0.1 * jax.random.normal(kg, (c,), jnp.float32)
        beta = 0.1 * jax.random.normal(kb, (c,), jnp.float32)
        mean = 0.1 * jax.random.normal(km, (c,), jnp.float32)
        var = jnp.abs(jax.random.normal(kv, (c,), jnp.float32)) + 0.5
        scale = gamma / jnp.sqrt(var + BN_EPS)
        bias = beta - mean * scale
        return scale, bias

    s1, b1 = bn_params(ks[2], ks[3], ks[4], ks[5], C_MID)
    s2, b2 = bn_params(ks[6], ks[7], ks[8], ks[9], C_OUT)
    return w1_hwio, w2_hwio, s1, b1, s2, b2


if __name__ == "__main__":
    key = jax.random.PRNGKey(0)
    kx, kp = jax.random.split(key)
    # N=4 exercises the NB=2 batched path with grid length 2; C=3, H=W=16 (NCHW).
    x = jax.random.normal(kx, (4, C_IN, 16, 16), jnp.float32)
    params = make_params(kp)

    out = jax.block_until_ready(basic_block_forward(x, *params))
    ref = jax.block_until_ready(reference_forward(x, *params))

    assert out.shape == (4, C_OUT, 12, 12), out.shape
    max_err = float(jnp.max(jnp.abs(out - ref)))
    # MXU operands are bf16 (reference uses Precision.HIGHEST f32), so allow bf16-level error.
    assert max_err < 3e-2, f"mismatch vs reference, max_err={max_err}"

    print("KERNEL_OK")
</pallas_src>

<mosaic_0001>
module attributes {stable_mosaic.version = 11 : i64} {
  func.func @kernel(%arg0: i32, %arg1: memref<2x3x512xf32, #tpu.memory_space<vmem>>, %arg2: memref<64x27xbf16, #tpu.memory_space<vmem>>, %arg3: memref<3x576xbf16, #tpu.memory_space<vmem>>, %arg4: memref<64x1xf32, #tpu.memory_space<vmem>>, %arg5: memref<3x1xf32, #tpu.memory_space<vmem>>, %arg6: memref<1x3x512xf32, #tpu.memory_space<vmem>>, %arg7: memref<64x768xbf16, #tpu.memory_space<vmem>>, %arg8: memref<576x512xbf16, #tpu.memory_space<vmem>>) attributes {dimension_semantics = [#tpu.dimension_semantics<parallel>], iteration_bounds = array<i64: 2>, scalar_prefetch = 0 : i64, scratch_operands = 2 : i64, tpu.core_type = #tpu.core_type<tc>, window_params = [{transform_indices = @transform_0, window_bounds = array<i64: 2, 3, 512>}, {pipeline_mode = #tpu.pipeline_mode<synchronous>, transform_indices = @transform_1, window_bounds = array<i64: 64, 27>}, {pipeline_mode = #tpu.pipeline_mode<synchronous>, transform_indices = @transform_2, window_bounds = array<i64: 3, 576>}, {pipeline_mode = #tpu.pipeline_mode<synchronous>, transform_indices = @transform_3, window_bounds = array<i64: 64, 1>}, {pipeline_mode = #tpu.pipeline_mode<synchronous>, transform_indices = @transform_4, window_bounds = array<i64: 3, 1>}, {transform_indices = @transform_5, window_bounds = array<i64: 1, 3, 512>}]} {
    %c0 = arith.constant 0 : index
    %c0_0 = arith.constant 0 : index
    %c0_1 = arith.constant 0 : index
    %0 = vector.load %arg1[%c0, %c0_0, %c0_1] : memref<2x3x512xf32, #tpu.memory_space<vmem>>, vector<1x3x384xf32>
    %1 = vector.shape_cast %0 : vector<1x3x384xf32> to vector<3x384xf32>
    %c0_2 = arith.constant 0 : index
    %c0_3 = arith.constant 0 : index
    %c1 = arith.constant 1 : index
    %2 = vector.load %arg1[%c0_2, %c0_3, %c1] : memref<2x3x512xf32, #tpu.memory_space<vmem>>, vector<1x3x384xf32>
    %3 = vector.shape_cast %2 : vector<1x3x384xf32> to vector<3x384xf32>
    %c0_4 = arith.constant 0 : index
    %c0_5 = arith.constant 0 : index
    %c2 = arith.constant 2 : index
    %4 = vector.load %arg1[%c0_4, %c0_5, %c2] : memref<2x3x512xf32, #tpu.memory_space<vmem>>, vector<1x3x384xf32>
    %5 = vector.shape_cast %4 : vector<1x3x384xf32> to vector<3x384xf32>
    %c0_6 = arith.constant 0 : index
    %c0_7 = arith.constant 0 : index
    %c16 = arith.constant 16 : index
    %6 = vector.load %arg1[%c0_6, %c0_7, %c16] : memref<2x3x512xf32, #tpu.memory_space<vmem>>, vector<1x3x384xf32>
    %7 = vector.shape_cast %6 : vector<1x3x384xf32> to vector<3x384xf32>
    %c0_8 = arith.constant 0 : index
    %c0_9 = arith.constant 0 : index
    %c17 = arith.constant 17 : index
    %8 = vector.load %arg1[%c0_8, %c0_9, %c17] : memref<2x3x512xf32, #tpu.memory_space<vmem>>, vector<1x3x384xf32>
    %9 = vector.shape_cast %8 : vector<1x3x384xf32> to vector<3x384xf32>
    %c0_10 = arith.constant 0 : index
    %c0_11 = arith.constant 0 : index
    %c18 = arith.constant 18 : index
    %10 = vector.load %arg1[%c0_10, %c0_11, %c18] : memref<2x3x512xf32, #tpu.memory_space<vmem>>, vector<1x3x384xf32>
    %11 = vector.shape_cast %10 : vector<1x3x384xf32> to vector<3x384xf32>
    %c0_12 = arith.constant 0 : index
    %c0_13 = arith.constant 0 : index
    %c32 = arith.constant 32 : index
    %12 = vector.load %arg1[%c0_12, %c0_13, %c32] : memref<2x3x512xf32, #tpu.memory_space<vmem>>, vector<1x3x384xf32>
    %13 = vector.shape_cast %12 : vector<1x3x384xf32> to vector<3x384xf32>
    %c0_14 = arith.constant 0 : index
    %c0_15 = arith.constant 0 : index
    %c33 = arith.constant 33 : index
    %14 = vector.load %arg1[%c0_14, %c0_15, %c33] : memref<2x3x512xf32, #tpu.memory_space<vmem>>, vector<1x3x384xf32>
    %15 = vector.shape_cast %14 : vector<1x3x384xf32> to vector<3x384xf32>
    %c0_16 = arith.constant 0 : index
    %c0_17 = arith.constant 0 : index
    %c34 = arith.constant 34 : index
    %16 = vector.load %arg1[%c0_16, %c0_17, %c34] : memref<2x3x512xf32, #tpu.memory_space<vmem>>, vector<1x3x384xf32>
    %17 = vector.shape_cast %16 : vector<1x3x384xf32> to vector<3x384xf32>
    %18 = tpu.concatenate %1, %3, %5, %7, %9, %11, %13, %15, %17 in 0 : vector<3x384xf32>, vector<3x384xf32>, vector<3x384xf32>, vector<3x384xf32>, vector<3x384xf32>, vector<3x384xf32>, vector<3x384xf32>, vector<3x384xf32>, vector<3x384xf32> -> vector<27x384xf32>
    %c1_18 = arith.constant 1 : index
    %c0_19 = arith.constant 0 : index
    %c0_20 = arith.constant 0 : index
    %19 = vector.load %arg1[%c1_18, %c0_19, %c0_20] : memref<2x3x512xf32, #tpu.memory_space<vmem>>, vector<1x3x384xf32>
    %20 = vector.shape_cast %19 : vector<1x3x384xf32> to vector<3x384xf32>
    %c1_21 = arith.constant 1 : index
    %c0_22 = arith.constant 0 : index
    %c1_23 = arith.constant 1 : index
    %21 = vector.load %arg1[%c1_21, %c0_22, %c1_23] : memref<2x3x512xf32, #tpu.memory_space<vmem>>, vector<1x3x384xf32>
    %22 = vector.shape_cast %21 : vector<1x3x384xf32> to vector<3x384xf32>
    %c1_24 = arith.constant 1 : index
    %c0_25 = arith.constant 0 : index
    %c2_26 = arith.constant 2 : index
    %23 = vector.load %arg1[%c1_24, %c0_25, %c2_26] : memref<2x3x512xf32, #tpu.memory_space<vmem>>, vector<1x3x384xf32>
    %24 = vector.shape_cast %23 : vector<1x3x384xf32> to vector<3x384xf32>
    %c1_27 = arith.constant 1 : index
    %c0_28 = arith.constant 0 : index
    %c16_29 = arith.constant 16 : index
    %25 = vector.load %arg1[%c1_27, %c0_28, %c16_29] : memref<2x3x512xf32, #tpu.memory_space<vmem>>, vector<1x3x384xf32>
    %26 = vector.shape_cast %25 : vector<1x3x384xf32> to vector<3x384xf32>
    %c1_30 = arith.constant 1 : index
    %c0_31 = arith.constant 0 : index
    %c17_32 = arith.constant 17 : index
    %27 = vector.load %arg1[%c1_30, %c0_31, %c17_32] : memref<2x3x512xf32, #tpu.memory_space<vmem>>, vector<1x3x384xf32>
    %28 = vector.shape_cast %27 : vector<1x3x384xf32> to vector<3x384xf32>
    %c1_33 = arith.constant 1 : index
    %c0_34 = arith.constant 0 : index
    %c18_35 = arith.constant 18 : index
    %29 = vector.load %arg1[%c1_33, %c0_34, %c18_35] : memref<2x3x512xf32, #tpu.memory_space<vmem>>, vector<1x3x384xf32>
    %30 = vector.shape_cast %29 : vector<1x3x384xf32> to vector<3x384xf32>
    %c1_36 = arith.constant 1 : index
    %c0_37 = arith.constant 0 : index
    %c32_38 = arith.constant 32 : index
    %31 = vector.load %arg1[%c1_36, %c0_37, %c32_38] : memref<2x3x512xf32, #tpu.memory_space<vmem>>, vector<1x3x384xf32>
    %32 = vector.shape_cast %31 : vector<1x3x384xf32> to vector<3x384xf32>
    %c1_39 = arith.constant 1 : index
    %c0_40 = arith.constant 0 : index
    %c33_41 = arith.constant 33 : index
    %33 = vector.load %arg1[%c1_39, %c0_40, %c33_41] : memref<2x3x512xf32, #tpu.memory_space<vmem>>, vector<1x3x384xf32>
    %34 = vector.shape_cast %33 : vector<1x3x384xf32> to vector<3x384xf32>
    %c1_42 = arith.constant 1 : index
    %c0_43 = arith.constant 0 : index
    %c34_44 = arith.constant 34 : index
    %35 = vector.load %arg1[%c1_42, %c0_43, %c34_44] : memref<2x3x512xf32, #tpu.memory_space<vmem>>, vector<1x3x384xf32>
    %36 = vector.shape_cast %35 : vector<1x3x384xf32> to vector<3x384xf32>
    %37 = tpu.concatenate %20, %22, %24, %26, %28, %30, %32, %34, %36 in 0 : vector<3x384xf32>, vector<3x384xf32>, vector<3x384xf32>, vector<3x384xf32>, vector<3x384xf32>, vector<3x384xf32>, vector<3x384xf32>, vector<3x384xf32>, vector<3x384xf32> -> vector<27x384xf32>
    %38 = tpu.concatenate %18, %37 in 1 : vector<27x384xf32>, vector<27x384xf32> -> vector<27x768xf32>
    %c0_45 = arith.constant 0 : index
    %c0_46 = arith.constant 0 : index
    %39 = vector.load %arg2[%c0_45, %c0_46] : memref<64x27xbf16, #tpu.memory_space<vmem>>, vector<64x27xbf16>
    %40 = arith.truncf %38 : vector<27x768xf32> to vector<27x768xbf16>
    %cst = arith.constant dense<0.000000e+00> : vector<64x768xf32>
    %41 = tpu.matmul %39, %40, %cst {dimension_numbers = #tpu.dot_dimension_numbers<[1], [0], [0], [1], [0, 0, 1, 1], [], []>} : vector<64x27xbf16>, vector<27x768xbf16>, vector<64x768xf32> -> vector<64x768xf32>
    %c0_47 = arith.constant 0 : index
    %c0_48 = arith.constant 0 : index
    %42 = vector.load %arg4[%c0_47, %c0_48] : memref<64x1xf32, #tpu.memory_space<vmem>>, vector<64x1xf32>
    %43 = vector.broadcast %42 : vector<64x1xf32> to vector<64x768xf32>
    %44 = arith.addf %41, %43 : vector<64x768xf32>
    %cst_49 = arith.constant 0.000000e+00 : f32
    %45 = vector.broadcast %cst_49 : f32 to vector<64x768xf32>
    %46 = arith.cmpf oge, %44, %45 : vector<64x768xf32>
    %cst_50 = arith.constant 5.000000e-02 : f32
    %47 = vector.broadcast %cst_50 : f32 to vector<64x768xf32>
    %48 = arith.mulf %44, %47 : vector<64x768xf32>
    %49 = arith.select %46, %44, %48 : vector<64x768xi1>, vector<64x768xf32>
    %50 = arith.truncf %49 : vector<64x768xf32> to vector<64x768xbf16>
    %c0_51 = arith.constant 0 : index
    %c0_52 = arith.constant 0 : index
    %51 = vector.load %arg7[%c0_51, %c0_52] : memref<64x768xbf16, #tpu.memory_space<vmem>>, vector<64x768xbf16>
    tpu.vector_store %arg7[%c0_51, %c0_52], %50 {strides = array<i32>} : memref<64x768xbf16, #tpu.memory_space<vmem>>, vector<64x768xbf16>,
    %c0_53 = arith.constant 0 : index
    %c0_54 = arith.constant 0 : index
    %52 = vector.load %arg7[%c0_53, %c0_54] : memref<64x768xbf16, #tpu.memory_space<vmem>>, vector<64x256xbf16>
    %c0_55 = arith.constant 0 : index
    %c0_56 = arith.constant 0 : index
    %53 = vector.load %arg8[%c0_55, %c0_56] : memref<576x512xbf16, #tpu.memory_space<vmem>>, vector<64x256xbf16>
    tpu.vector_store %arg8[%c0_55, %c0_56], %52 {strides = array<i32>} : memref<576x512xbf16, #tpu.memory_space<vmem>>, vector<64x256xbf16>,
    %c0_57 = arith.constant 0 : index
    %c1_58 = arith.constant 1 : index
    %54 = vector.load %arg7[%c0_57, %c1_58] : memref<64x768xbf16, #tpu.memory_space<vmem>>, vector<64x256xbf16>
    %c64 = arith.constant 64 : index
    %c0_59 = arith.constant 0 : index
    %55 = vector.load %arg8[%c64, %c0_59] : memref<576x512xbf16, #tpu.memory_space<vmem>>, vector<64x256xbf16>
    tpu.vector_store %arg8[%c64, %c0_59], %54 {strides = array<i32>} : memref<576x512xbf16, #tpu.memory_space<vmem>>, vector<64x256xbf16>,
    %c0_60 = arith.constant 0 : index
    %c2_61 = arith.constant 2 : index
    %56 = vector.load %arg7[%c0_60, %c2_61] : memref<64x768xbf16, #tpu.memory_space<vmem>>, vector<64x256xbf16>
    %c128 = arith.constant 128 : index
    %c0_62 = arith.constant 0 : index
    %57 = vector.load %arg8[%c128, %c0_62] : memref<576x512xbf16, #tpu.memory_space<vmem>>, vector<64x256xbf16>
    tpu.vector_store %arg8[%c128, %c0_62], %56 {strides = array<i32>} : memref<576x512xbf16, #tpu.memory_space<vmem>>, vector<64x256xbf16>,
    %c0_63 = arith.constant 0 : index
    %c16_64 = arith.constant 16 : index
    %58 = vector.load %arg7[%c0_63, %c16_64] : memref<64x768xbf16, #tpu.memory_space<vmem>>, vector<64x256xbf16>
    %c192 = arith.constant 192 : index
    %c0_65 = arith.constant 0 : index
    %59 = vector.load %arg8[%c192, %c0_65] : memref<576x512xbf16, #tpu.memory_space<vmem>>, vector<64x256xbf16>
    tpu.vector_store %arg8[%c192, %c0_65], %58 {strides = array<i32>} : memref<576x512xbf16, #tpu.memory_space<vmem>>, vector<64x256xbf16>,
    %c0_66 = arith.constant 0 : index
    %c17_67 = arith.constant 17 : index
    %60 = vector.load %arg7[%c0_66, %c17_67] : memref<64x768xbf16, #tpu.memory_space<vmem>>, vector<64x256xbf16>
    %c256 = arith.constant 256 : index
    %c0_68 = arith.constant 0 : index
    %61 = vector.load %arg8[%c256, %c0_68] : memref<576x512xbf16, #tpu.memory_space<vmem>>, vector<64x256xbf16>
    tpu.vector_store %arg8[%c256, %c0_68], %60 {strides = array<i32>} : memref<576x512xbf16, #tpu.memory_space<vmem>>, vector<64x256xbf16>,
    %c0_69 = arith.constant 0 : index
    %c18_70 = arith.constant 18 : index
    %62 = vector.load %arg7[%c0_69, %c18_70] : memref<64x768xbf16, #tpu.memory_space<vmem>>, vector<64x256xbf16>
    %c320 = arith.constant 320 : index
    %c0_71 = arith.constant 0 : index
    %63 = vector.load %arg8[%c320, %c0_71] : memref<576x512xbf16, #tpu.memory_space<vmem>>, vector<64x256xbf16>
    tpu.vector_store %arg8[%c320, %c0_71], %62 {strides = array<i32>} : memref<576x512xbf16, #tpu.memory_space<vmem>>, vector<64x256xbf16>,
    %c0_72 = arith.constant 0 : index
    %c32_73 = arith.constant 32 : index
    %64 = vector.load %arg7[%c0_72, %c32_73] : memref<64x768xbf16, #tpu.memory_space<vmem>>, vector<64x256xbf16>
    %c384 = arith.constant 384 : index
    %c0_74 = arith.constant 0 : index
    %65 = vector.load %arg8[%c384, %c0_74] : memref<576x512xbf16, #tpu.memory_space<vmem>>, vector<64x256xbf16>
    tpu.vector_store %arg8[%c384, %c0_74], %64 {strides = array<i32>} : memref<576x512xbf16, #tpu.memory_space<vmem>>, vector<64x256xbf16>,
    %c0_75 = arith.constant 0 : index
    %c33_76 = arith.constant 33 : index
    %66 = vector.load %arg7[%c0_75, %c33_76] : memref<64x768xbf16, #tpu.memory_space<vmem>>, vector<64x256xbf16>
    %c448 = arith.constant 448 : index
    %c0_77 = arith.constant 0 : index
    %67 = vector.load %arg8[%c448, %c0_77] : memref<576x512xbf16, #tpu.memory_space<vmem>>, vector<64x256xbf16>
    tpu.vector_store %arg8[%c448, %c0_77], %66 {strides = array<i32>} : memref<576x512xbf16, #tpu.memory_space<vmem>>, vector<64x256xbf16>,
    %c0_78 = arith.constant 0 : index
    %c34_79 = arith.constant 34 : index
    %68 = vector.load %arg7[%c0_78, %c34_79] : memref<64x768xbf16, #tpu.memory_space<vmem>>, vector<64x256xbf16>
    %c512 = arith.constant 512 : index
    %c0_80 = arith.constant 0 : index
    %69 = vector.load %arg8[%c512, %c0_80] : memref<576x512xbf16, #tpu.memory_space<vmem>>, vector<64x256xbf16>
    tpu.vector_store %arg8[%c512, %c0_80], %68 {strides = array<i32>} : memref<576x512xbf16, #tpu.memory_space<vmem>>, vector<64x256xbf16>,
    %c0_81 = arith.constant 0 : index
    %c384_82 = arith.constant 384 : index
    %70 = vector.load %arg7[%c0_81, %c384_82] : memref<64x768xbf16, #tpu.memory_space<vmem>>, vector<64x256xbf16>
    %c0_83 = arith.constant 0 : index
    %c256_84 = arith.constant 256 : index
    %71 = vector.load %arg8[%c0_83, %c256_84] : memref<576x512xbf16, #tpu.memory_space<vmem>>, vector<64x256xbf16>
    tpu.vector_store %arg8[%c0_83, %c256_84], %70 {strides = array<i32>} : memref<576x512xbf16, #tpu.memory_space<vmem>>, vector<64x256xbf16>,
    %c0_85 = arith.constant 0 : index
    %c385 = arith.constant 385 : index
    %72 = vector.load %arg7[%c0_85, %c385] : memref<64x768xbf16, #tpu.memory_space<vmem>>, vector<64x256xbf16>
    %c64_86 = arith.constant 64 : index
    %c256_87 = arith.constant 256 : index
    %73 = vector.load %arg8[%c64_86, %c256_87] : memref<576x512xbf16, #tpu.memory_space<vmem>>, vector<64x256xbf16>
    tpu.vector_store %arg8[%c64_86, %c256_87], %72 {strides = array<i32>} : memref<576x512xbf16, #tpu.memory_space<vmem>>, vector<64x256xbf16>,
    %c0_88 = arith.constant 0 : index
    %c386 = arith.constant 386 : index
    %74 = vector.load %arg7[%c0_88, %c386] : memref<64x768xbf16, #tpu.memory_space<vmem>>, vector<64x256xbf16>
    %c128_89 = arith.constant 128 : index
    %c256_90 = arith.constant 256 : index
    %75 = vector.load %arg8[%c128_89, %c256_90] : memref<576x512xbf16, #tpu.memory_space<vmem>>, vector<64x256xbf16>
    tpu.vector_store %arg8[%c128_89, %c256_90], %74 {strides = array<i32>} : memref<576x512xbf16, #tpu.memory_space<vmem>>, vector<64x256xbf16>,
    %c0_91 = arith.constant 0 : index
    %c400 = arith.constant 400 : index
    %76 = vector.load %arg7[%c0_91, %c400] : memref<64x768xbf16, #tpu.memory_space<vmem>>, vector<64x256xbf16>
    %c192_92 = arith.constant 192 : index
    %c256_93 = arith.constant 256 : index
    %77 = vector.load %arg8[%c192_92, %c256_93] : memref<576x512xbf16, #tpu.memory_space<vmem>>, vector<64x256xbf16>
    tpu.vector_store %arg8[%c192_92, %c256_93], %76 {strides = array<i32>} : memref<576x512xbf16, #tpu.memory_space<vmem>>, vector<64x256xbf16>,
    %c0_94 = arith.constant 0 : index
    %c401 = arith.constant 401 : index
    %78 = vector.load %arg7[%c0_94, %c401] : memref<64x768xbf16, #tpu.memory_space<vmem>>, vector<64x256xbf16>
    %c256_95 = arith.constant 256 : index
    %c256_96 = arith.constant 256 : index
    %79 = vector.load %arg8[%c256_95, %c256_96] : memref<576x512xbf16, #tpu.memory_space<vmem>>, vector<64x256xbf16>
    tpu.vector_store %arg8[%c256_95, %c256_96], %78 {strides = array<i32>} : memref<576x512xbf16, #tpu.memory_space<vmem>>, vector<64x256xbf16>,
    %c0_97 = arith.constant 0 : index
    %c402 = arith.constant 402 : index
    %80 = vector.load %arg7[%c0_97, %c402] : memref<64x768xbf16, #tpu.memory_space<vmem>>, vector<64x256xbf16>
    %c320_98 = arith.constant 320 : index
    %c256_99 = arith.constant 256 : index
    %81 = vector.load %arg8[%c320_98, %c256_99] : memref<576x512xbf16, #tpu.memory_space<vmem>>, vector<64x256xbf16>
    tpu.vector_store %arg8[%c320_98, %c256_99], %80 {strides = array<i32>} : memref<576x512xbf16, #tpu.memory_space<vmem>>, vector<64x256xbf16>,
    %c0_100 = arith.constant 0 : index
    %c416 = arith.constant 416 : index
    %82 = vector.load %arg7[%c0_100, %c416] : memref<64x768xbf16, #tpu.memory_space<vmem>>, vector<64x256xbf16>
    %c384_101 = arith.constant 384 : index
    %c256_102 = arith.constant 256 : index
    %83 = vector.load %arg8[%c384_101, %c256_102] : memref<576x512xbf16, #tpu.memory_space<vmem>>, vector<64x256xbf16>
    tpu.vector_store %arg8[%c384_101, %c256_102], %82 {strides = array<i32>} : memref<576x512xbf16, #tpu.memory_space<vmem>>, vector<64x256xbf16>,
    %c0_103 = arith.constant 0 : index
    %c417 = arith.constant 417 : index
    %84 = vector.load %arg7[%c0_103, %c417] : memref<64x768xbf16, #tpu.memory_space<vmem>>, vector<64x256xbf16>
    %c448_104 = arith.constant 448 : index
    %c256_105 = arith.constant 256 : index
    %85 = vector.load %arg8[%c448_104, %c256_105] : memref<576x512xbf16, #tpu.memory_space<vmem>>, vector<64x256xbf16>
    tpu.vector_store %arg8[%c448_104, %c256_105], %84 {strides = array<i32>} : memref<576x512xbf16, #tpu.memory_space<vmem>>, vector<64x256xbf16>,
    %c0_106 = arith.constant 0 : index
    %c418 = arith.constant 418 : index
    %86 = vector.load %arg7[%c0_106, %c418] : memref<64x768xbf16, #tpu.memory_space<vmem>>, vector<64x256xbf16>
    %c512_107 = arith.constant 512 : index
    %c256_108 = arith.constant 256 : index
    %87 = vector.load %arg8[%c512_107, %c256_108] : memref<576x512xbf16, #tpu.memory_space<vmem>>, vector<64x256xbf16>
    tpu.vector_store %arg8[%c512_107, %c256_108], %86 {strides = array<i32>} : memref<576x512xbf16, #tpu.memory_space<vmem>>, vector<64x256xbf16>,
    %c0_109 = arith.constant 0 : index
    %c0_110 = arith.constant 0 : index
    %88 = vector.load %arg3[%c0_109, %c0_110] : memref<3x576xbf16, #tpu.memory_space<vmem>>, vector<3x576xbf16>
    %c0_111 = arith.constant 0 : index
    %c0_112 = arith.constant 0 : index
    %89 = vector.load %arg8[%c0_111, %c0_112] : memref<576x512xbf16, #tpu.memory_space<vmem>>, vector<576x512xbf16>
    %cst_113 = arith.constant dense<0.000000e+00> : vector<3x512xf32>
    %90 = tpu.matmul %88, %89, %cst_113 {dimension_numbers = #tpu.dot_dimension_numbers<[1], [0], [0], [1], [0, 0, 1, 1], [], []>} : vector<3x576xbf16>, vector<576x512xbf16>, vector<3x512xf32> -> vector<3x512xf32>
    %c0_114 = arith.constant 0 : index
    %c0_115 = arith.constant 0 : index
    %c34_116 = arith.constant 34 : index
    %91 = vector.load %arg1[%c0_114, %c0_115, %c34_116] : memref<2x3x512xf32, #tpu.memory_space<vmem>>, vector<1x3x256xf32>
    %92 = vector.shape_cast %91 : vector<1x3x256xf32> to vector<3x256xf32>
    %c1_117 = arith.constant 1 : index
    %c0_118 = arith.constant 0 : index
    %c34_119 = arith.constant 34 : index
    %93 = vector.load %arg1[%c1_117, %c0_118, %c34_119] : memref<2x3x512xf32, #tpu.memory_space<vmem>>, vector<1x3x256xf32>
    %94 = vector.shape_cast %93 : vector<1x3x256xf32> to vector<3x256xf32>
    %95 = tpu.concatenate %92, %94 in 1 : vector<3x256xf32>, vector<3x256xf32> -> vector<3x512xf32>
    %c0_120 = arith.constant 0 : index
    %c0_121 = arith.constant 0 : index
    %96 = vector.load %arg5[%c0_120, %c0_121] : memref<3x1xf32, #tpu.memory_space<vmem>>, vector<3x1xf32>
    %97 = vector.broadcast %96 : vector<3x1xf32> to vector<3x512xf32>
    %98 = arith.addf %90, %97 : vector<3x512xf32>
    %99 = arith.addf %98, %95 : vector<3x512xf32>
    %cst_122 = arith.constant 0.000000e+00 : f32
    %100 = vector.broadcast %cst_122 : f32 to vector<3x512xf32>
    %101 = arith.cmpf oge, %99, %100 : vector<3x512xf32>
    %cst_123 = arith.constant 5.000000e-02 : f32
    %102 = vector.broadcast %cst_123 : f32 to vector<3x512xf32>
    %103 = arith.mulf %99, %102 : vector<3x512xf32>
    %104 = arith.select %101, %99, %103 : vector<3x512xi1>, vector<3x512xf32>
    %c0_124 = arith.constant 0 : index
    %c0_125 = arith.constant 0 : index
    %c0_126 = arith.constant 0 : index
    %105 = vector.load %arg6[%c0_124, %c0_125, %c0_126] : memref<1x3x512xf32, #tpu.memory_space<vmem>>, vector<1x3x512xf32>
    %106 = vector.shape_cast %105 : vector<1x3x512xf32> to vector<3x512xf32>
    %107 = vector.shape_cast %104 : vector<3x512xf32> to vector<1x3x512xf32>
    tpu.vector_store %arg6[%c0_124, %c0_125, %c0_126], %107 {strides = array<i32>} : memref<1x3x512xf32, #tpu.memory_space<vmem>>, vector<1x3x512xf32>,
    return
  }
  func.func @transform_0(%arg0: i32) -> (i32, i32, i32) {
    %c0_i32 = arith.constant 0 : i32
    %c0_i32_0 = arith.constant 0 : i32
    %c0_i32_1 = arith.constant 0 : i32
    return %arg0, %c0_i32, %c0_i32_0 : i32, i32, i32
  }
  func.func @transform_1(%arg0: i32) -> (i32, i32) {
    %c0_i32 = arith.constant 0 : i32
    %c0_i32_0 = arith.constant 0 : i32
    %c0_i32_1 = arith.constant 0 : i32
    return %c0_i32, %c0_i32_0 : i32, i32
  }
  func.func @transform_2(%arg0: i32) -> (i32, i32) {
    %c0_i32 = arith.constant 0 : i32
    %c0_i32_0 = arith.constant 0 : i32
    %c0_i32_1 = arith.constant 0 : i32
    return %c0_i32, %c0_i32_0 : i32, i32
  }
  func.func @transform_3(%arg0: i32) -> (i32, i32) {
    %c0_i32 = arith.constant 0 : i32
    %c0_i32_0 = arith.constant 0 : i32
    %c0_i32_1 = arith.constant 0 : i32
    return %c0_i32, %c0_i32_0 : i32, i32
  }
  func.func @transform_4(%arg0: i32) -> (i32, i32) {
    %c0_i32 = arith.constant 0 : i32
    %c0_i32_0 = arith.constant 0 : i32
    %c0_i32_1 = arith.constant 0 : i32
    return %c0_i32, %c0_i32_0 : i32, i32
  }
  func.func @transform_5(%arg0: i32) -> (i32, i32, i32) {
    %c0_i32 = arith.constant 0 : i32
    %c0_i32_0 = arith.constant 0 : i32
    %c0_i32_1 = arith.constant 0 : i32
    return %arg0, %c0_i32, %c0_i32_0 : i32, i32, i32
  }
}

</mosaic_0001>

<bundles_post_ra>
// kernel: tpu_custom_call.1
= control target key start
LH: loop header
LB: loop body
LE: loop exit
PB: predicated region body
PF: predicated region fallthrough
CT: control target
= control target key end

     0   :  { %s4824_s18 = smov 0   ;;  %s6770_s0 = inlined_call_operand.vmem [shape: f32[4,3,512], index: 0, kind: input, shape index: {}]   ;;  %s6771_s1 = inlined_call_operand.vmem [shape: bf16[64,27], index: 1, kind: input, shape index: {}]   ;;  %s6772_s2 = inlined_call_operand.vmem [shape: bf16[3,576], index: 2, kind: input, shape index: {}]   ;;  %s6773_s3 = inlined_call_operand.vmem [shape: f32[64,1], index: 3, kind: input, shape index: {}]   ;;  %s6774_s4 = inlined_call_operand.vmem [shape: f32[3,1], index: 4, kind: input, shape index: {}]   ;;  %s6775_s5 = inlined_call_operand.vmem [shape: f32[2,3,512], index: 5, kind: output, shape index: {}]  }
   0x1 LB: > { %s4830_s19 = sadd.s32 4294967295, %s4781_s18   ;;  %p4333_p0 = scmp.ge.s32.totalorder %s4781_s18, 1  ;;  %s4781_s18 = sphi %s4824_s18, %s15_s18  }
   0x2   : > { %p189_p1 = scmp.lt.s32.totalorder %s4781_s18, 3 }
   0x4   : > { %p190_p2 = pnand %p4333_p0, %p189_p1 }
   0x6   : > { %193 = sbr.rel (%p190_p2) target bundleno = 1247 (0x4df), region = 40 }
   0xb   : > { %s4334_s20 = sshll.u32 %s4830_s19, 1  ;;  %s4783_s25 = smov 110   ;;  %vm344_vm0 = vcmask 785408   ;;  %vm325_vm1 = vcmask 900096   ;;  %vm409_vm2 = vcmask 1044480   ;;  %vm363_vm3 = vcmask 777216  }
   0xc   : > { %p219_p3 = scmp.lt.s32.totalorder %s4334_s20, 3  ;;  %s4784_s26 = smov 96   ;;  %vm378_vm4 = vcmask 769024   ;;  %vm389_vm5 = vcmask 1045504   ;;  %vm405_vm6 = vcmask 1041408   ;;  %vm289_vm7 = vcmask 916480  }
   0xd   : > { %s4785_s27 = smov 95   ;;  %s4786_s28 = smov 94   ;;  %vm270_vm8 = vcmask 1031168   ;;  %vm251_vm9 = vcmask 1039360   ;;  %vm393_vm10 = vcmask 1040384   ;;  %vm306_vm11 = vcmask 908288  }
   0xe   : > { %s7027_s20 = smov (!%p219_p3, %s4334_s20), 3  ;;  %s4787_s29 = smov 112   ;;  %vm385_vm12 = vcmask 1042432   ;;  %vm397_vm13 = vcmask 1043456   ;;  %vm401_vm14 = vcmask 1046528   ;;  %vm669_vm15 = vcmask 220160  }
   0xf   : > { %s4533_s21 = sshll.u32 %s7027_s20, 4  ;;  %s4788_s30 = smov 126  }
  0x10   : > { %s4838_s24 = scalar_lea.vmem %s6770_s0, %s4533_s21  ;;  %s4789_s6 = smov 127  }
  0x11   : > { %v4841_v0 = vld [vmem:[%s4838_s24 + $0x10] sm:$0x77]  ;;  %v4844_v1 = vld [vmem:[%s4838_s24] sm:$0x77]  ;;  %v4847_v2 = vld [vmem:[%s4838_s24 + $0x8] sm:$0x77] }
  0x12   : > { %v4851_v3 = vcombine.high %v4841_v0, %v4841_v0  ;;  %v492_v4 = vrot.slane %v4841_v0, 1  ;;  %v4856_v5 = vcombine.high %v4844_v1, %v4844_v1  ;;  %v315_v6 = vrot.slane %v4847_v2, 1  ;;  %v4341_v62 = vld [vmem:[%s4838_s24 + $0x18] sm:$0x77]  ;;  %s4790_s7 = smov 111   ;;  %p225_p4 = scmp.lt.s32.totalorder %s4830_s19, 1 }
  0x13   : > { %v510_v7 = vrot.slane %v4841_v0, 6  ;;  %v334_v8 = vrot.slane %v4847_v2, 6  ;;  %v4863_v9 = vcombine.high %v4847_v2, %v4847_v2  ;;  %v332_v16 = vrot.slane %v4844_v1, 6 }
  0x14   : > { %v493_v10 = vrot.slane %v4851_v3, 1  ;;  %v314_v11 = vrot.slane %v4856_v5, 1  ;;  %v511_v12 = vrot.slane %v4851_v3, 6  ;;  %v333_v13 = vrot.slane %v4856_v5, 6  ;;  %s7029_s19 = smov (!%p225_p4, %s4830_s19), 1 }
  0x15   : > { %v335_v17 = vrot.slane %v4863_v9, 6  ;;  %v313_v20 = vrot.slane %v4844_v1, 1  ;;  %v316_v21 = vrot.slane %v4863_v9, 1  ;;  %v528_v23 = vrot.slane %v4841_v0, 3 }
  0x16   : > { %v4588_v14 = vpack.i.bf16 %v493_v10, %v492_v4  ;;  %v4578_v15 = vpack.i.bf16 %v315_v6, %v314_v11  ;;  %v4593_v18 = vpack.i.bf16 %v511_v12, %v510_v7  ;;  %v4583_v19 = vpack.i.bf16 %v334_v8, %v333_v13 }
  0x17   : > { %v4603_v22 = vpack.i.bf16 %v335_v17, %v332_v16  ;;  %v4598_v24 = vpack.i.bf16 %v316_v21, %v313_v20  ;;  %v529_v25 = vrot.slane %v4851_v3, 3  ;;  %v352_v26 = vrot.slane %v4856_v5, 3 }
  0x18   : > { %4589 = vrot.lane.b32.xlu1 %v4588_v14, %s4783_s25  ;;  %4579 = vrot.lane.b32.xlu0 %v4578_v15, %s4783_s25  ;;  %v353_v27 = vrot.slane %v4847_v2, 3  ;;  %v351_v30 = vrot.slane %v4844_v1, 3  ;;  %v354_v31 = vrot.slane %v4863_v9, 3  ;;  %v4623_v32 = vpack.i.bf16 %v4847_v2, %v4856_v5 }
  0x19   : > { %v4613_v28 = vpack.i.bf16 %v529_v25, %v528_v23  ;;  %v4633_v34 = vpack.i.bf16 %v4863_v9, %v4844_v1  ;;  %v4628_v35 = vpack.i.bf16 %v4851_v3, %v4841_v0  ;;  %v278_v36 = vrot.slane %v4856_v5, 7 }
  0x1a   : > { %v4608_v29 = vpack.i.bf16 %v353_v27, %v352_v26  ;;  %v4618_v33 = vpack.i.bf16 %v354_v31, %v351_v30  ;;  %v279_v37 = vrot.slane %v4847_v2, 7  ;;  %v259_v38 = vrot.slane %v4856_v5, 2 }
  0x1b   : > { %v260_v39 = vrot.slane %v4847_v2, 2  ;;  %v458_v40 = vrot.slane %v4841_v0, 7  ;;  %v459_v41 = vrot.slane %v4851_v3, 7  ;;  %v440_v44 = vrot.slane %v4841_v0, 2 }
  0x1c   : > { %4594 = vrot.lane.b32.xlu1 %v4593_v18, %s4784_s26  ;;  %4584 = vrot.lane.b32.xlu0 %v4583_v19, %s4784_s26  ;;  %v4643_v42 = vpack.i.bf16 %v279_v37, %v278_v36  ;;  %v441_v45 = vrot.slane %v4851_v3, 2  ;;  %v258_v46 = vrot.slane %v4844_v1, 2  ;;  %v261_v47 = vrot.slane %v4863_v9, 2  ;;  %v603_v36 = vld [vmem:[%s6773_s3 + $0x10] sm:$0xff]  ;;  %v606_v37 = vld [vmem:[%s6773_s3 + $0x28] sm:$0xff] }
  0x1d   : > { %v4638_v43 = vpack.i.bf16 %v260_v39, %v259_v38  ;;  %v4653_v48 = vpack.i.bf16 %v459_v41, %v458_v40  ;;  %v240_v50 = vrot.slane %v4856_v5, 5  ;;  %v241_v51 = vrot.slane %v4847_v2, 5  ;;  %v605_v38 = vld [vmem:[%s6773_s3 + $0x20] sm:$0xff]  ;;  %v608_v39 = vld [vmem:[%s6773_s3 + $0x38] sm:$0xff]  ;;  %v607_v40 = vld [vmem:[%s6773_s3 + $0x30] sm:$0xff] }
  0x1e   : > { %v4648_v49 = vpack.i.bf16 %v441_v45, %v440_v44  ;;  %v4663_v52 = vpack.i.bf16 %v261_v47, %v258_v46  ;;  %v297_v54 = vcombine.low %v4847_v2, %v4847_v2  ;;  %v277_v55 = vrot.slane %v4844_v1, 7 }
  0x1f   : > { %v4658_v53 = vpack.i.bf16 %v241_v51, %v240_v50  ;;  %v280_v56 = vrot.slane %v4863_v9, 7  ;;  %v476_v57 = vcombine.low %v4841_v0, %v4841_v0  ;;  %v422_v60 = vrot.slane %v4841_v0, 5 }
  0x20   : > { %4604 = vrot.lane.b32.xlu1 %v4603_v22, %s4784_s26  ;;  %4599 = vrot.lane.b32.xlu0 %v4598_v24, %s4783_s25  ;;  %v4673_v58 = vpack.i.bf16 %v297_v54, %v4844_v1  ;;  %v423_v61 = vrot.slane %v4851_v3, 5  ;;  %v296_v63 = vcombine.low %v4844_v1, %v4844_v1  ;;  %v239_v4 = vrot.slane %v4844_v1, 5 }
  0x21   : > { %v4668_v59 = vpack.i.bf16 %v280_v56, %v277_v55  ;;  %v4683_v6 = vpack.i.bf16 %v4841_v0, %v476_v57  ;;  %v242_v8 = vrot.slane %v4863_v9, 5  ;;  %v421_v10 = vcombine.high %v4341_v62, %v4341_v62 }
  0x22   : > { %v4678_v7 = vpack.i.bf16 %v423_v61, %v422_v60  ;;  %v4693_v11 = vpack.i.bf16 %v4847_v2, %v296_v63  ;;  %v512_v12 = vrot.slane %v4341_v62, 6  ;;  %v494_v15 = vrot.slane %v4341_v62, 1 }
  0x23   : > { %v4688_v13 = vpack.i.bf16 %v242_v8, %v239_v4  ;;  %v513_v14 = vrot.slane %v421_v10, 6  ;;  %v495_v16 = vrot.slane %v421_v10, 1  ;;  %v6776_v17 = vmov 0  }
  0x24   : > { %4614 = vrot.lane.b32.xlu1 %v4613_v28, %s4785_s27  ;;  %4609 = vrot.lane.b32.xlu0 %v4608_v29, %s4785_s27  ;;  %v530_v18 = vrot.slane %v4341_v62, 3  ;;  %v531_v19 = vrot.slane %v421_v10, 3  ;;  %v460_v20 = vrot.slane %v4341_v62, 7  ;;  %v461_v21 = vrot.slane %v421_v10, 7 }
  0x25   : > { %734 = vmatprep.mubr.bf16.mxu0 %v6776_v17  ;;  %807 = vmatprep.mubr.bf16.mxu1 %v6776_v17  ;;  %v4703_v9 = vpack.i.bf16 %v513_v14, %v512_v12  ;;  %v4698_v2 = vpack.i.bf16 %v495_v16, %v494_v15  ;;  %v4713_v22 = vpack.i.bf16 %v421_v10, %v4341_v62  ;;  %v442_v24 = vrot.slane %v4341_v62, 2 }
  0x26   : > { %4738 = vset.pattern.permute.xlu0 %v6776_v17  ;;  %4739 = vset.pattern.permute.xlu1 %v6776_v17  ;;  %v4708_v23 = vpack.i.bf16 %v531_v19, %v530_v18  ;;  %v443_v25 = vrot.slane %v421_v10, 2  ;;  %v4723_v26 = vpack.i.bf16 %v461_v21, %v460_v20  ;;  %v477_v28 = vcombine.low %v4341_v62, %v4341_v62 }
  0x27   : > { %v424_v29 = vrot.slane %v4341_v62, 5  ;;  %v425_v30 = vrot.slane %v421_v10, 5  ;;  %v4792_v47 = vmov 65535  }
  0x28   : > { %4624 = vrot.lane.b32.xlu1 %v4623_v32, %s4786_s28  ;;  %4619 = vrot.lane.b32.xlu0 %v4618_v33, %s4785_s27  ;;  %v4718_v27 = vpack.i.bf16 %v443_v25, %v442_v24  ;;  %v4733_v31 = vpack.i.bf16 %v4341_v62, %v477_v28  ;;  %v601_v33 = vld [vmem:[%s6773_s3] sm:$0xff] }
  0x29   : > { %v4728_v32 = vpack.i.bf16 %v425_v30, %v424_v29 }
  0x2c   : > { %4634 = vrot.lane.b32.xlu1 %v4633_v34, %s4786_s28  ;;  %4629 = vrot.lane.b32.xlu0 %v4628_v35, %s4786_s28  ;;  %v602_v34 = vld [vmem:[%s6773_s3 + $0x8] sm:$0xff]  ;;  %v604_v35 = vld [vmem:[%s6773_s3 + $0x18] sm:$0xff] }
  0x30   : > { %4644 = vrot.lane.b32.xlu1 %v4643_v42, %s4787_s29  ;;  %4639 = vrot.lane.b32.xlu0 %v4638_v43, %s4788_s30 }
  0x34   : > { %4654 = vrot.lane.b32.xlu1 %v4653_v48, %s4787_s29  ;;  %4649 = vrot.lane.b32.xlu0 %v4648_v49, %s4788_s30  ;;  %v682_v48 = vsel %vm409_vm2, 4294967295, %v4792_v47 }
  0x35   : > { %v4983_v61 = vsel %vm389_vm5, %v682_v48, 0 }
  0x38   : > { %4664 = vrot.lane.b32.xlu1 %v4663_v52, %s4788_s30  ;;  %4659 = vrot.lane.b32.xlu0 %v4658_v53, %s4789_s6 }
  0x3c   : > { %4674 = vrot.lane.b32.xlu1 %v4673_v58, %s4790_s7  ;;  %4669 = vrot.lane.b32.xlu0 %v4668_v59, %s4787_s29 }
  0x40   : > { %4684 = vrot.lane.b32.xlu1 %v4683_v6, %s4790_s7  ;;  %4679 = vrot.lane.b32.xlu0 %v4678_v7, %s4789_s6 }
  0x44   : > { %4694 = vrot.lane.b32.xlu1 %v4693_v11, %s4790_s7  ;;  %4689 = vrot.lane.b32.xlu0 %v4688_v13, %s4789_s6 }
  0x48   : > { %4704 = vrot.lane.b32.xlu1 %v4703_v9, %s4784_s26  ;;  %4699 = vrot.lane.b32.xlu0 %v4698_v2, %s4783_s25 }
  0x4c   : > { %4714 = vrot.lane.b32.xlu1 %v4713_v22, %s4786_s28  ;;  %4709 = vrot.lane.b32.xlu0 %v4708_v23, %s4785_s27 }
  0x50   : > { %4724 = vrot.lane.b32.xlu1 %v4723_v26, %s4787_s29  ;;  %4719 = vrot.lane.b32.xlu0 %v4718_v27, %s4788_s30 }
  0x54   : > { %4734 = vrot.lane.b32.xlu1 %v4733_v31, %s4790_s7  ;;  %4729 = vrot.lane.b32.xlu0 %v4728_v32, %s4789_s6 }
  0x58   : > { %611 = vperm.xlu0 %4738, %v601_v33   ;;  %616 = vperm.xlu1 %4739, %v602_v34  }
  0x5c   : > { %626 = vperm.xlu0 %4738, %v604_v35   ;;  %621 = vperm.xlu1 %4739, %v603_v36  }
  0x60   : > { %636 = vperm.xlu0 %4738, %v606_v37   ;;  %631 = vperm.xlu1 %4739, %v605_v38  }
  0x64   : > { %646 = vperm.xlu0 %4738, %v608_v39   ;;  %641 = vperm.xlu1 %4739, %v607_v40  }
  0x8a   : > { %v4973_v41 = vpop.permute.xlu1 %4589  ;;  %v4580_v42 = vpop.permute.xlu0 %4579 }
  0x8b   : > { %v4582_v49 = vunpack.i.h.bf16 %v4580_v42  ;;  %v4581_v50 = vunpack.i.l.bf16 %v4580_v42  ;;  %v4592_v62 = vunpack.i.h.bf16 %v4973_v41  ;;  %v4591_v63 = vunpack.i.l.bf16 %v4973_v41  ;;  %v5134_v41 = vld [vmem:[%s6771_s1] sm:$0xff]  }
  0x8d   : > { %v4990_v10 = vsel %vm325_vm1, %v4581_v50, %v4582_v49  ;;  %v5010_v24 = vsel %vm325_vm1, %v4591_v63, %v4592_v62 }
  0x8e   : > { %v4975_v43 = vpop.permute.xlu1 %4594  ;;  %v4585_v44 = vpop.permute.xlu0 %4584 }
  0x8f   : > { %v4587_v51 = vunpack.i.h.bf16 %v4585_v44  ;;  %v4586_v52 = vunpack.i.l.bf16 %v4585_v44  ;;  %v4597_v53 = vunpack.i.h.bf16 %v4975_v43  ;;  %v4596_v54 = vunpack.i.l.bf16 %v4975_v43 }
  0x91   : > { %v346_v11 = vsel %vm344_vm0, %v4586_v52, %v4587_v51  ;;  %v522_v9 = vsel %vm344_vm0, %v4596_v54, %v4597_v53 }
  0x92   : > { %v4605_v45 = vpop.permute.xlu1 %4604  ;;  %v4600_v46 = vpop.permute.xlu0 %4599  ;;  %v407_v23 = vsel %vm405_vm6, %v4990_v10, %v346_v11  ;;  %v575_v33 = vsel %vm405_vm6, %v5010_v24, %v522_v9 }
  0x93   : > { %v4606_v55 = vunpack.i.l.bf16 %v4605_v45  ;;  %v4601_v56 = vunpack.i.l.bf16 %v4600_v46  ;;  %v4607_v4 = vunpack.i.h.bf16 %v4605_v45  ;;  %v4602_v6 = vunpack.i.h.bf16 %v4600_v46 }
  0x95   : > { %v345_v12 = vsel %vm344_vm0, %v4606_v55, %v4586_v52  ;;  %v4995_v13 = vsel %vm325_vm1, %v4601_v56, %v4581_v50  ;;  %v347_v21 = vsel %vm344_vm0, %v4587_v51, %v4607_v4  ;;  %v5003_v22 = vsel %vm325_vm1, %v4582_v49, %v4602_v6 }
  0x96   : > { %v4980_v57 = vpop.permute.xlu1 %4614  ;;  %v4610_v58 = vpop.permute.xlu0 %4609  ;;  %v406_v32 = vsel %vm405_vm6, %v4995_v13, %v345_v12  ;;  %v408_v44 = vsel %vm405_vm6, %v5003_v22, %v347_v21 }
  0x97   : > { %v4612_v59 = vunpack.i.h.bf16 %v4610_v58  ;;  %v4611_v60 = vunpack.i.l.bf16 %v4610_v58  ;;  %v4617_v7 = vunpack.i.h.bf16 %v4980_v57  ;;  %v4616_v8 = vunpack.i.l.bf16 %v4980_v57 }
  0x99   : > { %v365_v16 = vsel %vm363_vm3, %v4611_v60, %v4612_v59  ;;  %v540_v28 = vsel %vm363_vm3, %v4616_v8, %v4617_v7 }
  0x9a   : > { %v4625_v14 = vpop.permute.xlu1 %4624  ;;  %v4620_v15 = vpop.permute.xlu0 %4619  ;;  %v411_v26 = vsel %vm409_vm2, %v407_v23, %v365_v16  ;;  %v578_v42 = vsel %vm409_vm2, %v575_v33, %v540_v28 }
  0x9b   : > { %v4627_v2 = vunpack.i.h.bf16 %v4625_v14  ;;  %v4626_v18 = vunpack.i.l.bf16 %v4625_v14  ;;  %v4622_v19 = vunpack.i.h.bf16 %v4620_v15  ;;  %v4621_v20 = vunpack.i.l.bf16 %v4620_v15 }
  0x9d   : > { %v380_v25 = vsel %vm378_vm4, %v4626_v18, %v4627_v2  ;;  %v364_v27 = vsel %vm363_vm3, %v4621_v20, %v4611_v60  ;;  %v366_v34 = vsel %vm363_vm3, %v4612_v59, %v4622_v19 }
  0x9e   : > { %v4635_v29 = vpop.permute.xlu1 %4634  ;;  %v5018_v30 = vpop.permute.xlu0 %4629  ;;  %v596_v31 = vpack.c.bf16 %v380_v25, %v411_v26  ;;  %v410_v40 = vsel %vm409_vm2, %v406_v32, %v364_v27  ;;  %v412_v48 = vsel %vm409_vm2, %v408_v44, %v366_v34 }
  0x9f   : > { %v4637_v35 = vunpack.i.h.bf16 %v4635_v29  ;;  %v4636_v36 = vunpack.i.l.bf16 %v4635_v29  ;;  %v4632_v37 = vunpack.i.h.bf16 %v5018_v30  ;;  %v4631_v38 = vunpack.i.l.bf16 %v5018_v30 }
  0xa0   : > { %v688_v39 = vand.u32 %v4983_v61, %v596_v31 }
  0xa1   : > { %v379_v45 = vsel %vm378_vm4, %v4636_v36, %v4626_v18  ;;  %v554_v46 = vsel %vm378_vm4, %v4631_v38, %v4632_v37  ;;  %v381_v47 = vsel %vm378_vm4, %v4627_v2, %v4637_v35 }
  0xa2   : > { %714 = vmatprep.subr.bf16.mxu0 %v688_v39  ;;  %v4645_v49 = vpop.permute.xlu1 %4644  ;;  %v5038_v50 = vpop.permute.xlu0 %4639  ;;  %v595_v51 = vpack.c.bf16 %v379_v45, %v410_v40  ;;  %v598_v52 = vpack.c.bf16 %v554_v46, %v578_v42  ;;  %v597_v54 = vpack.c.bf16 %v381_v47, %v412_v48 }
  0xa3   : > { %v4647_v63 = vunpack.i.h.bf16 %v4645_v49  ;;  %v4646_v4 = vunpack.i.l.bf16 %v4645_v49  ;;  %v4642_v6 = vunpack.i.h.bf16 %v5038_v50  ;;  %v4641_v8 = vunpack.i.l.bf16 %v5038_v50 }
  0xa4   : > { %v685_v55 = vand.u32 %v4983_v61, %v595_v51  ;;  %v694_v56 = vand.u32 %v4983_v61, %v598_v52  ;;  %v691_v58 = vand.u32 %v4983_v61, %v597_v54 }
  0xa5   : > { %v291_v2 = vsel %vm289_vm7, %v4646_v4, %v4647_v63  ;;  %v272_v20 = vsel %vm270_vm8, %v4641_v8, %v4642_v6 }
  0xa6   : > { %715 = vmatpush1.bf16.msra.mxu0 %v685_v55  ;;  %787 = vmatprep.subr.bf16.mxu1 %v694_v56  ;;  %v5043_v59 = vpop.permute.xlu1 %4654  ;;  %v5045_v60 = vpop.permute.xlu0 %4649  ;;  %v395_v31 = vsel %vm393_vm10, %v272_v20, %v291_v2 }
  0xa7   : > { %788 = vmatpush1.bf16.msra.mxu1 %v691_v58  ;;  %v4657_v16 = vunpack.i.h.bf16 %v5043_v59  ;;  %v4656_v9 = vunpack.i.l.bf16 %v5043_v59  ;;  %v4652_v18 = vunpack.i.h.bf16 %v5045_v60  ;;  %v4651_v19 = vunpack.i.l.bf16 %v5045_v60  ;;  %v4749_v60 = vld [vmem:[%s6771_s1 + $0x8] sm:$0xff]  }
  0xa9   : > { %v470_v28 = vsel %vm289_vm7, %v4656_v9, %v4657_v16  ;;  %v452_v35 = vsel %vm270_vm8, %v4651_v19, %v4652_v18 }
  0xaa   : > { %v4665_v11 = vpop.permute.xlu1 %4664  ;;  %v5049_v12 = vpop.permute.xlu0 %4659  ;;  %v566_v50 = vsel %vm393_vm10, %v452_v35, %v470_v28 }
  0xab   : > { %v4662_v14 = vunpack.i.h.bf16 %v5049_v12  ;;  %v4661_v15 = vunpack.i.l.bf16 %v5049_v12  ;;  %v4667_v36 = vunpack.i.h.bf16 %v4665_v11  ;;  %v4666_v38 = vunpack.i.l.bf16 %v4665_v11 }
  0xad   : > { %v253_v21 = vsel %vm251_vm9, %v4661_v15, %v4662_v14  ;;  %v271_v11 = vsel %vm270_vm8, %v4666_v38, %v4641_v8 }
  0xae   : > { %v4675_v23 = vpop.permute.xlu1 %4674  ;;  %v4670_v25 = vpop.permute.xlu0 %4669  ;;  %v387_v34 = vsel %vm385_vm12, %v4856_v5, %v253_v21 }
  0xaf   : > { %v4677_v26 = vunpack.i.h.bf16 %v4675_v23  ;;  %v4676_v27 = vunpack.i.l.bf16 %v4675_v23  ;;  %v4672_v29 = vunpack.i.h.bf16 %v4670_v25  ;;  %v4671_v33 = vunpack.i.l.bf16 %v4670_v25 }
  0xb0   : > { %v391_v48 = vsel %vm389_vm5, %v387_v34, %v272_v20  ;;  %v232_v20 = vld [vmem:[%s4838_s24 + $0x8] sm:$0x7] }
  0xb1   : > { %v308_v32 = vsel %vm306_vm11, %v4676_v27, %v4677_v26  ;;  %v292_v47 = vsel %vm289_vm7, %v4647_v63, %v4672_v29  ;;  %v290_v51 = vsel %vm289_vm7, %v4671_v33, %v4646_v4  ;;  %v273_v4 = vsel %vm270_vm8, %v4642_v6, %v4667_v36 }
  0xb2   : > { %v5070_v39 = vpop.permute.xlu1 %4684  ;;  %v5072_v40 = vpop.permute.xlu0 %4679  ;;  %v399_v42 = vsel %vm397_vm13, %v395_v31, %v308_v32  ;;  %v394_v25 = vsel %vm393_vm10, %v271_v11, %v290_v51 }
  0xb3   : > { %v4687_v44 = vunpack.i.h.bf16 %v5070_v39  ;;  %v4686_v45 = vunpack.i.l.bf16 %v5070_v39  ;;  %v4682_v46 = vunpack.i.h.bf16 %v5072_v40  ;;  %v4681_v5 = vunpack.i.l.bf16 %v5072_v40 }
  0xb4   : > { %v403_v49 = vsel %vm401_vm14, %v399_v42, %v4990_v10 }
  0xb5   : > { %v486_v52 = vsel %vm306_vm11, %v4686_v45, %v4687_v44  ;;  %v434_v54 = vsel %vm251_vm9, %v4681_v5, %v4682_v46  ;;  %v590_v55 = vpack.c.bf16 %v403_v49, %v391_v48 }
  0xb6   : > { %v4695_v56 = vpop.permute.xlu1 %4694  ;;  %v4690_v58 = vpop.permute.xlu0 %4689  ;;  %v560_v63 = vsel %vm385_vm12, %v4841_v0, %v434_v54  ;;  %v569_v10 = vsel %vm397_vm13, %v566_v50, %v486_v52  ;;  %v396_v0 = vsel %vm393_vm10, %v273_v4, %v292_v47 }
  0xb7   : > { %v4697_v12 = vunpack.i.h.bf16 %v4695_v56  ;;  %v4696_v9 = vunpack.i.l.bf16 %v4695_v56  ;;  %v4692_v2 = vunpack.i.h.bf16 %v4690_v58  ;;  %v4691_v19 = vunpack.i.l.bf16 %v4690_v58  ;;  %716 = vmatprep.subr.bf16.mxu0 %v590_v55 }
  0xb8   : > { %v563_v21 = vsel %vm389_vm5, %v560_v63, %v452_v35  ;;  %v572_v23 = vsel %vm401_vm14, %v569_v10, %v5010_v24 }
  0xb9   : > { %v307_v28 = vsel %vm306_vm11, %v4696_v9, %v4676_v27  ;;  %v309_v8 = vsel %vm306_vm11, %v4677_v26, %v4697_v12  ;;  %v252_v6 = vsel %vm251_vm9, %v4691_v19, %v4661_v15  ;;  %v254_v29 = vsel %vm251_vm9, %v4662_v14, %v4692_v2 }
  0xba   : > { %v4705_v31 = vpop.permute.xlu1 %4704  ;;  %v4700_v32 = vpop.permute.xlu0 %4699  ;;  %v592_v33 = vpack.c.bf16 %v572_v23, %v563_v21  ;;  %v386_v34 = vsel %vm385_vm12, %v4844_v1, %v252_v6  ;;  %v398_v24 = vsel %vm397_vm13, %v394_v25, %v307_v28  ;;  %v388_v35 = vsel %vm385_vm12, %v232_v20, %v254_v29 }
  0xbb   : > { %v4707_v36 = vunpack.i.h.bf16 %v4705_v31  ;;  %v4706_v38 = vunpack.i.l.bf16 %v4705_v31  ;;  %v4702_v42 = vunpack.i.h.bf16 %v4700_v32  ;;  %v4701_v27 = vunpack.i.l.bf16 %v4700_v32 }
  0xbc   : > { %789 = vmatprep.subr.bf16.mxu1 %v592_v33  ;;  %v390_v26 = vsel %vm389_vm5, %v386_v34, %v271_v11  ;;  %v402_v14 = vsel %vm401_vm14, %v398_v24, %v4995_v13  ;;  %v392_v15 = vsel %vm389_vm5, %v388_v35, %v273_v4  ;;  %v400_v45 = vsel %vm397_vm13, %v396_v0, %v309_v8 }
  0xbd   : > { %v523_v1 = vsel %vm344_vm0, %v4597_v53, %v4706_v38  ;;  %v524_v5 = vsel %vm344_vm0, %v4706_v38, %v4707_v36  ;;  %v5122_v47 = vsel %vm325_vm1, %v4592_v62, %v4701_v27  ;;  %v5125_v48 = vsel %vm325_vm1, %v4701_v27, %v4702_v42 }
  0xbe   : > { %v4715_v49 = vpop.permute.xlu1 %4714  ;;  %v4710_v13 = vpop.permute.xlu0 %4709  ;;  %v589_v50 = vpack.c.bf16 %v402_v14, %v390_v26  ;;  %v404_v51 = vsel %vm401_vm14, %v400_v45, %v5003_v22  ;;  %v577_v43 = vsel %vm405_vm6, %v5125_v48, %v524_v5  ;;  %v576_v62 = vsel %vm405_vm6, %v5122_v47, %v523_v1 }
  0xbf   : > { %v4717_v53 = vunpack.i.h.bf16 %v4715_v49  ;;  %v4716_v52 = vunpack.i.l.bf16 %v4715_v49  ;;  %v4712_v54 = vunpack.i.h.bf16 %v4710_v13  ;;  %v4711_v55 = vunpack.i.l.bf16 %v4710_v13 }
  0xc0   : > { %717 = vmatpush1.bf16.msra.mxu0 %v589_v50  ;;  %v591_v56 = vpack.c.bf16 %v404_v51, %v392_v15  ;;  %v4751_v15 = vld [vmem:[%s6771_s1 + $0x18] sm:$0xff]  }
  0xc1   : > { %v555_v22 = vsel %vm378_vm4, %v4632_v37, %v4716_v52  ;;  %v541_v58 = vsel %vm363_vm3, %v4617_v7, %v4711_v55  ;;  %v542_v63 = vsel %vm363_vm3, %v4711_v55, %v4712_v54  ;;  %v556_v10 = vsel %vm378_vm4, %v4716_v52, %v4717_v53 }
  0xc2   : > { %v579_v11 = vsel %vm409_vm2, %v576_v62, %v541_v58  ;;  %790 = vmatpush1.bf16.msra.mxu1 %v591_v56  ;;  %v4725_v4 = vpop.permute.xlu1 %4724  ;;  %v4720_v12 = vpop.permute.xlu0 %4719  ;;  %v580_v9 = vsel %vm409_vm2, %v577_v43, %v542_v63 }
  0xc3   : > { %4346 = vmatmul.mubr.msk.bf16.vlgmr.msra.gmra.mxu0 %vm669_vm15, %v5134_v41  ;;  %v4727_v30 = vunpack.i.h.bf16 %v4725_v4  ;;  %v4726_v37 = vunpack.i.l.bf16 %v4725_v4  ;;  %v4722_v2 = vunpack.i.h.bf16 %v4720_v12  ;;  %v4721_v57 = vunpack.i.l.bf16 %v4720_v12 }
  0xc4   : > { %v600_v19 = vpack.c.bf16 %v556_v10, %v580_v9  ;;  %744 = vmatprep.mubr.bf16.mxu0 %v6776_v17  ;;  %v599_v7 = vpack.c.bf16 %v555_v22, %v579_v11 }
  0xc5   : > { %4350 = vmatmul.mubr.msk.bf16.vlgmr.msra.gmra.mxu1 %vm669_vm15, %v5134_v41  ;;  %v471_v20 = vsel %vm289_vm7, %v4657_v16, %v4726_v37  ;;  %v472_v21 = vsel %vm289_vm7, %v4726_v37, %v4727_v30  ;;  %v453_v23 = vsel %vm270_vm8, %v4652_v18, %v4721_v57  ;;  %v454_v25 = vsel %vm270_vm8, %v4721_v57, %v4722_v2  ;;  %v4340_v18 = vld [vmem:[%s4838_s24 + $0x18] sm:$0x7] }
  0xc6   : > { %v4735_v0 = vpop.permute.xlu1 %4734  ;;  %v4730_v28 = vpop.permute.xlu0 %4729  ;;  %v700_v8 = vand.u32 %v4983_v61, %v600_v19  ;;  %817 = vmatprep.mubr.bf16.mxu1 %v6776_v17  ;;  %v697_v6 = vand.u32 %v4983_v61, %v599_v7  ;;  %v568_v59 = vsel %vm393_vm10, %v454_v25, %v472_v21  ;;  %v567_v33 = vsel %vm393_vm10, %v453_v23, %v471_v20 }
  0xc7   : > { %v4737_v29 = vunpack.i.h.bf16 %v4735_v0  ;;  %v4736_v16 = vunpack.i.l.bf16 %v4735_v0  ;;  %v4732_v31 = vunpack.i.h.bf16 %v4730_v28  ;;  %v4731_v32 = vunpack.i.l.bf16 %v4730_v28 }
  0xc8   : > { %860 = vmatprep.subr.bf16.mxu0 %v700_v8 }
  0xc9   : > { %v487_v34 = vsel %vm306_vm11, %v4687_v44, %v4736_v16  ;;  %v488_v61 = vsel %vm306_vm11, %v4736_v16, %v4737_v29  ;;  %v435_v24 = vsel %vm251_vm9, %v4682_v46, %v4731_v32  ;;  %v436_v35 = vsel %vm251_vm9, %v4731_v32, %v4732_v31  ;;  %861 = vmatpush1.bf16.msra.mxu0 %v697_v6 }
  0xca   : > { %v570_v36 = vsel %vm397_vm13, %v567_v33, %v487_v34  ;;  %v561_v38 = vsel %vm385_vm12, %v4851_v3, %v435_v24  ;;  %v562_v42 = vsel %vm385_vm12, %v4340_v18, %v436_v35  ;;  %v571_v39 = vsel %vm397_vm13, %v568_v59, %v488_v61  ;;  %v4750_v3 = vld [vmem:[%s6771_s1 + $0x10] sm:$0xff]  }
  0xcb   : > { %4347 = vmatmul.mubr.msk.bf16.gmra.mxu0 %vm669_vm15, %v4749_v60  ;;  %v565_v44 = vsel %vm389_vm5, %v562_v42, %v454_v25  ;;  %v574_v40 = vsel %vm401_vm14, %v571_v39, %v5125_v48  ;;  %v564_v46 = vsel %vm389_vm5, %v561_v38, %v453_v23  ;;  %v573_v27 = vsel %vm401_vm14, %v570_v36, %v5122_v47 }
  0xcc   : > { %v594_v26 = vpack.c.bf16 %v574_v40, %v565_v44  ;;  %v593_v14 = vpack.c.bf16 %v573_v27, %v564_v46  ;;  %754 = vmatprep.mubr.bf16.mxu0 %v6776_v17 }
  0xcd   : > { %4351 = vmatmul.mubr.msk.bf16.gmra.mxu1 %vm669_vm15, %v4749_v60 }
  0xce   : > { %862 = vmatprep.subr.bf16.mxu0 %v594_v26  ;;  %827 = vmatprep.mubr.bf16.mxu1 %v6776_v17 }
  0xcf   : > { %863 = vmatpush1.bf16.msra.mxu0 %v593_v14 }
  0xd3   : > { %4348 = vmatmul.mubr.msk.bf16.gmra.mxu0 %vm669_vm15, %v4750_v3  ;;  %v5214_v45 = vpop.permute.xlu0 %611  ;;  %v5219_v51 = vpop.permute.xlu1 %616 }
  0xd4   : > { %764 = vmatprep.mubr.bf16.mxu0 %v6776_v17 }
  0xd5   : > { %4352 = vmatmul.mubr.msk.bf16.gmra.mxu1 %vm669_vm15, %v4750_v3 }
  0xd6   : > { %837 = vmatprep.mubr.bf16.mxu1 %v6776_v17 }
  0xd7   : > { %v5225_v11 = vpop.permute.xlu1 %621  ;;  %v5230_v25 = vpop.permute.xlu0 %626 }
  0xdb   : > { %4349 = vmatmul.mubr.msk.bf16.gmra.mxu0 %vm669_vm15, %v4751_v15 }
  0xdc   : > { %880 = vmatprep.mubr.bf16.mxu0 %v6776_v17 }
  0xdd   : > { %4353 = vmatmul.mubr.msk.bf16.gmra.mxu1 %vm669_vm15, %v4751_v15 }
  0xe3   : > { %4354 = vmatmul.mubr.msk.bf16.vlgmr.msra.gmra.mxu0 %vm669_vm15, %v5134_v41 }
  0xe4   : > { %890 = vmatprep.mubr.bf16.mxu0 %v6776_v17 }
  0xeb   : > { %4355 = vmatmul.mubr.msk.bf16.gmra.mxu0 %vm669_vm15, %v4749_v60 }
  0xec   : > { %900 = vmatprep.mubr.bf16.mxu0 %v6776_v17 }
  0xf3   : > { %4356 = vmatmul.mubr.msk.bf16.gmra.mxu0 %vm669_vm15, %v4750_v3 }
  0xf4   : > { %910 = vmatprep.mubr.bf16.mxu0 %v6776_v17 }
  0xfb   : > { %4357 = vmatmul.mubr.msk.bf16.gmra.mxu0 %vm669_vm15, %v4751_v15  ;;  %v5247_v15 = vpop.permute.xlu1 %631 }
 0x183   : > { %v736_v1 = vpop.f32.mrf.mxu0 }
 0x184   : > { %v737_v5 = vadd.f32 %v736_v1, %v5214_v45 }
 0x185   : > { %v809_v47 = vpop.f32.mrf.mxu1  ;;  %v738_v48 = vpop.f32.mrf.mxu0 }
 0x186   : > { %v969_v49 = vmul.f32 0.05, %v737_v5  ;;  %v810_v13 = vadd.f32 %v809_v47, %v5214_v45  ;;  %v739_v50 = vadd.f32 %v738_v48, %v5214_v45  ;;  %vm921_vm2 = vcmp.ge.f32.partialorder %v737_v5, 0.0 }
 0x187   : > { %v811_v43 = vpop.f32.mrf.mxu1  ;;  %v740_v53 = vpop.f32.mrf.mxu0 }
 0x188   : > { %vm923_vm5 = vcmp.ge.f32.partialorder %v810_v13, 0.0  ;;  %v971_v52 = vmul.f32 0.05, %v810_v13  ;;  %vm922_vm6 = vcmp.ge.f32.partialorder %v739_v50, 0.0  ;;  %v970_v54 = vmul.f32 0.05, %v739_v50 }
 0x189   : > { %v812_v55 = vadd.f32 %v811_v43, %v5214_v45  ;;  %v741_v41 = vadd.f32 %v740_v53, %v5219_v51  ;;  %v813_v62 = vpop.f32.mrf.mxu1  ;;  %v742_v56 = vpop.f32.mrf.mxu0  ;;  %v1017_v22 = vsel %vm921_vm2, %v737_v5, %v969_v49 }
 0x18a   : > { %v1019_v58 = vsel %vm923_vm5, %v810_v13, %v971_v52  ;;  %v814_v63 = vadd.f32 %v813_v62, %v5219_v51  ;;  %v743_v10 = vadd.f32 %v742_v56, %v5219_v51  ;;  %v1018_v4 = vsel %vm922_vm6, %v739_v50, %v970_v54  ;;  %v5252_v50 = vpop.permute.xlu0 %636 }
 0x18b   : > { %vm924_vm10 = vcmp.ge.f32.partialorder %v812_v55, 0.0  ;;  %v972_v12 = vmul.f32 0.05, %v812_v55  ;;  %vm927_vm12 = vcmp.ge.f32.partialorder %v741_v41, 0.0  ;;  %v815_v9 = vpop.f32.mrf.mxu1  ;;  %v746_v30 = vpop.f32.mrf.mxu0  ;;  %v5227_v37 = vpack.c.bf16 %v1018_v4, %v1017_v22 }
 0x18c   : > { %v975_v2 = vmul.f32 0.05, %v741_v41  ;;  %vm929_vm14 = vcmp.ge.f32.partialorder %v814_v63, 0.0  ;;  %v977_v57 = vmul.f32 0.05, %v814_v63  ;;  %vm928_vm15 = vcmp.ge.f32.partialorder %v743_v10, 0.0 }
 0x18d   : > { %v1020_v19 = vsel %vm924_vm10, %v812_v55, %v972_v12  ;;  %v976_v7 = vmul.f32 0.05, %v743_v10  ;;  %v816_v20 = vadd.f32 %v815_v9, %v5219_v51  ;;  %v819_v21 = vpop.f32.mrf.mxu1  ;;  %v748_v23 = vpop.f32.mrf.mxu0  ;;  %1209 = vst [vmem:[#allocation2] sm:$0xff] %v5227_v37  ;;  %v747_v6 = vadd.f32 %v746_v30, %v5225_v11  ;;  %1281 = vrot.lane.b32.xlu1 %v5227_v37, %s4789_s6 }
 0x18e   : > { %v4536_v0 = vpack.c.bf16 %v1020_v19, %v1019_v58  ;;  %v1023_v28 = vsel %vm927_vm12, %v741_v41, %v975_v2  ;;  %v1025_v8 = vsel %vm929_vm14, %v814_v63, %v977_v57  ;;  %v749_v32 = vadd.f32 %v748_v23, %v5225_v11 }
 0x18f   : > { %v1024_v59 = vsel %vm928_vm15, %v743_v10, %v976_v7  ;;  %vm930_vm2 = vcmp.ge.f32.partialorder %v816_v20, 0.0  ;;  %v978_v29 = vmul.f32 0.05, %v816_v20  ;;  %v821_v16 = vpop.f32.mrf.mxu1  ;;  %v750_v31 = vpop.f32.mrf.mxu0  ;;  %v820_v33 = vadd.f32 %v819_v21, %v5225_v11 }
 0x190   : > { %1210 = vst [vmem:[#allocation2 + $0x8] sm:$0xff] %v4536_v0  ;;  %v5238_v60 = vpack.c.bf16 %v1024_v59, %v1023_v28  ;;  %v751_v18 = vadd.f32 %v750_v31, %v5230_v25  ;;  %v822_v34 = vadd.f32 %v821_v16, %v5225_v11  ;;  %vm933_vm5 = vcmp.ge.f32.partialorder %v747_v6, 0.0 }
 0x191   : > { %v1026_v61 = vsel %vm930_vm2, %v816_v20, %v978_v29  ;;  %v823_v24 = vpop.f32.mrf.mxu1  ;;  %vm934_vm6 = vcmp.ge.f32.partialorder %v749_v32, 0.0  ;;  %v981_v35 = vmul.f32 0.05, %v747_v6  ;;  %v752_v36 = vpop.f32.mrf.mxu0  ;;  %1395 = vrot.lane.b32.xlu1 %v5227_v37, %s4788_s30  ;;  %vm935_vm12 = vcmp.ge.f32.partialorder %v820_v33, 0.0 }
 0x192   : > { %1212 = vst [vmem:[#allocation2 + $0x18] sm:$0xff] %v5238_v60  ;;  %v4539_v38 = vpack.c.bf16 %v1026_v61, %v1025_v8  ;;  %vm939_vm10 = vcmp.ge.f32.partialorder %v751_v18, 0.0  ;;  %v987_v42 = vmul.f32 0.05, %v751_v18  ;;  %v824_v39 = vadd.f32 %v823_v24, %v5230_v25 }
 0x193   : > { %vm936_vm14 = vcmp.ge.f32.partialorder %v822_v34, 0.0  ;;  %v982_v44 = vmul.f32 0.05, %v749_v32  ;;  %v983_v40 = vmul.f32 0.05, %v820_v33  ;;  %v825_v46 = vpop.f32.mrf.mxu1  ;;  %v756_v27 = vpop.f32.mrf.mxu0  ;;  %v1029_v1 = vsel %vm933_vm5, %v747_v6, %v981_v35 }
 0x194   : > { %1213 = vst [vmem:[#allocation2 + $0x20] sm:$0xff] %v4539_v38  ;;  %v1035_v26 = vsel %vm939_vm10, %v751_v18, %v987_v42  ;;  %vm941_vm15 = vcmp.ge.f32.partialorder %v824_v39, 0.0  ;;  %v989_v14 = vmul.f32 0.05, %v824_v39  ;;  %v984_v3 = vmul.f32 0.05, %v822_v34 }
 0x195   : > { %v1030_v5 = vsel %vm934_vm6, %v749_v32, %v982_v44  ;;  %v1031_v47 = vsel %vm935_vm12, %v820_v33, %v983_v40  ;;  %v753_v48 = vadd.f32 %v752_v36, %v5230_v25  ;;  %v829_v49 = vpop.f32.mrf.mxu1  ;;  %v758_v13 = vpop.f32.mrf.mxu0  ;;  %v826_v54 = vadd.f32 %v825_v46, %v5230_v25  ;;  %1508 = vrot.lane.b32.xlu1 %v5227_v37, %s4787_s29 }
 0x196   : > { %v1037_v43 = vsel %vm941_vm15, %v824_v39, %v989_v14  ;;  %v1032_v53 = vsel %vm936_vm14, %v822_v34, %v984_v3  ;;  %v5255_v52 = vpack.c.bf16 %v1030_v5, %v1029_v1  ;;  %v757_v58 = vadd.f32 %v756_v27, %v5247_v15  ;;  %v5278_v36 = vpop.permute.xlu1 %641  ;;  %v5285_v27 = vpop.permute.xlu0 %646 }
 0x197   : > { %v4542_v55 = vpack.c.bf16 %v1032_v53, %v1031_v47  ;;  %vm940_vm2 = vcmp.ge.f32.partialorder %v753_v48, 0.0  ;;  %v988_v41 = vmul.f32 0.05, %v753_v48  ;;  %v831_v62 = vpop.f32.mrf.mxu1  ;;  %v1250_v56 = vld [vmem:[#allocation2 + $0x8] sm:$0xf]  ;;  %v760_v22 = vpop.f32.mrf.mxu0  ;;  %vm942_vm5 = vcmp.ge.f32.partialorder %v826_v54, 0.0 }
 0x198   : > { %1215 = vst [vmem:[#allocation2 + $0x30] sm:$0xff] %v5255_v52  ;;  %v990_v63 = vmul.f32 0.05, %v826_v54  ;;  %1283 = vrot.lane.b32.xlu0 %v1250_v56, %s4789_s6  ;;  %v761_v10 = vadd.f32 %v760_v22, %v5252_v50  ;;  %v759_v4 = vadd.f32 %v758_v13, %v5247_v15  ;;  %v830_v30 = vadd.f32 %v829_v49, %v5247_v15  ;;  %v1364_v28 = vld [vmem:[#allocation2 + $0x8] sm:$0xf] }
 0x199   : > { %1216 = vst [vmem:[#allocation2 + $0x38] sm:$0xff] %v4542_v55  ;;  %v1036_v12 = vsel %vm940_vm2, %v753_v48, %v988_v41  ;;  %v833_v9 = vpop.f32.mrf.mxu1  ;;  %v832_v2 = vadd.f32 %v831_v62, %v5247_v15  ;;  %vm945_vm6 = vcmp.ge.f32.partialorder %v757_v58, 0.0  ;;  %v762_v57 = vpop.f32.mrf.mxu0  ;;  %1621 = vrot.lane.b32.xlu1 %v5227_v37, %s4790_s7  ;;  %v993_v59 = vmul.f32 0.05, %v757_v58  ;;  %v1477_v40 = vld [vmem:[#allocation2 + $0x8] sm:$0xf] }
 0x19a   : > { %v5267_v19 = vpack.c.bf16 %v1036_v12, %v1035_v26  ;;  %v1038_v7 = vsel %vm942_vm5, %v826_v54, %v990_v63  ;;  %vm951_vm10 = vcmp.ge.f32.partialorder %v761_v10, 0.0  ;;  %v999_v20 = vmul.f32 0.05, %v761_v10  ;;  %v1590_v22 = vld [vmem:[#allocation2 + $0x8] sm:$0xf] }
 0x19b   : > { %v4545_v21 = vpack.c.bf16 %v1038_v7, %v1037_v43  ;;  %v834_v23 = vadd.f32 %v833_v9, %v5252_v50  ;;  %vm946_vm12 = vcmp.ge.f32.partialorder %v759_v4, 0.0  ;;  %vm947_vm14 = vcmp.ge.f32.partialorder %v830_v30, 0.0  ;;  %v835_v0 = vpop.f32.mrf.mxu1  ;;  %v766_v8 = vpop.f32.mrf.mxu0 }
 0x19c   : > { %1218 = vst [vmem:[#allocation2 + $0x48] sm:$0xff] %v5267_v19  ;;  %v1047_v6 = vsel %vm951_vm10, %v761_v10, %v999_v20  ;;  %vm948_vm15 = vcmp.ge.f32.partialorder %v832_v2, 0.0  ;;  %v994_v29 = vmul.f32 0.05, %v759_v4  ;;  %1397 = vrot.lane.b32.xlu0 %v1364_v28, %s4788_s30  ;;  %v995_v31 = vmul.f32 0.05, %v830_v30 }
 0x19d   : > { %1219 = vst [vmem:[#allocation2 + $0x50] sm:$0xff] %v4545_v21  ;;  %vm953_vm2 = vcmp.ge.f32.partialorder %v834_v23, 0.0  ;;  %v1001_v16 = vmul.f32 0.05, %v834_v23  ;;  %v836_v32 = vadd.f32 %v835_v0, %v5252_v50  ;;  %v839_v18 = vpop.f32.mrf.mxu1  ;;  %v768_v33 = vpop.f32.mrf.mxu0  ;;  %v996_v34 = vmul.f32 0.05, %v832_v2  ;;  %1734 = vrot.lane.b32.xlu1 %v5227_v37, %s4783_s25 }
 0x19e   : > { %v1041_v61 = vsel %vm945_vm6, %v757_v58, %v993_v59  ;;  %v1042_v24 = vsel %vm946_vm12, %v759_v4, %v994_v29  ;;  %v763_v35 = vadd.f32 %v762_v57, %v5252_v50  ;;  %v1043_v42 = vsel %vm947_vm14, %v830_v30, %v995_v31 }
 0x19f   : > { %v1049_v38 = vsel %vm953_vm2, %v834_v23, %v1001_v16  ;;  %v5283_v39 = vpack.c.bf16 %v1042_v24, %v1041_v61  ;;  %vm954_vm5 = vcmp.ge.f32.partialorder %v836_v32, 0.0  ;;  %v841_v44 = vpop.f32.mrf.mxu1  ;;  %v770_v46 = vpop.f32.mrf.mxu0  ;;  %v1044_v26 = vsel %vm948_vm15, %v832_v2, %v996_v34  ;;  %v1929_v2 = vld [vmem:[#allocation2 + $0x8] sm:$0xf] }
 0x1a0   : > { %v1002_v14 = vmul.f32 0.05, %v836_v32  ;;  %vm952_vm6 = vcmp.ge.f32.partialorder %v763_v35, 0.0  ;;  %v1000_v3 = vmul.f32 0.05, %v763_v35  ;;  %1510 = vrot.lane.b32.xlu0 %v1477_v40, %s4787_s29  ;;  %v4548_v1 = vpack.c.bf16 %v1044_v26, %v1043_v42 }
 0x1a1   : > { %1221 = vst [vmem:[#allocation2 + $0x60] sm:$0xff] %v5283_v39  ;;  %v771_v5 = vadd.f32 %v770_v46, %v5285_v27  ;;  %v843_v47 = vpop.f32.mrf.mxu1  ;;  %v767_v48 = vadd.f32 %v766_v8, %v5278_v36  ;;  %v769_v49 = vadd.f32 %v768_v33, %v5278_v36  ;;  %v772_v13 = vpop.f32.mrf.mxu0  ;;  %v840_v55 = vadd.f32 %v839_v18, %v5278_v36  ;;  %v1703_v8 = vld [vmem:[#allocation2 + $0x8] sm:$0xf] }
 0x1a2   : > { %v1050_v43 = vsel %vm954_vm5, %v836_v32, %v1002_v14  ;;  %v1048_v53 = vsel %vm952_vm6, %v763_v35, %v1000_v3  ;;  %v844_v54 = vadd.f32 %v843_v47, %v5285_v27  ;;  %1847 = vrot.lane.b32.xlu1 %v5227_v37, %s4784_s26  ;;  %1222 = vst [vmem:[#allocation2 + $0x68] sm:$0xff] %v4548_v1  ;;  %v2042_v61 = vld [vmem:[#allocation2 + $0x8] sm:$0xf] }
 0x1a3   : > { %v4551_v41 = vpack.c.bf16 %v1050_v43, %v1049_v38  ;;  %v5298_v62 = vpack.c.bf16 %v1048_v53, %v1047_v6  ;;  %vm963_vm10 = vcmp.ge.f32.partialorder %v771_v5, 0.0  ;;  %v1011_v56 = vmul.f32 0.05, %v771_v5  ;;  %v882_v58 = vpop.f32.mrf.mxu0  ;;  %v845_v4 = vpop.f32.mrf.mxu1 }
 0x1a4   : > { %vm965_vm12 = vcmp.ge.f32.partialorder %v844_v54, 0.0  ;;  %v1013_v63 = vmul.f32 0.05, %v844_v54  ;;  %v842_v10 = vadd.f32 %v841_v44, %v5278_v36  ;;  %vm957_vm14 = vcmp.ge.f32.partialorder %v767_v48, 0.0  ;;  %1623 = vrot.lane.b32.xlu0 %v1590_v22, %s4790_s7 }
 0x1a5   : > { %1225 = vst [vmem:[#allocation2 + $0x80] sm:$0xff] %v4551_v41  ;;  %1224 = vst [vmem:[#allocation2 + $0x78] sm:$0xff] %v5298_v62  ;;  %v1059_v12 = vsel %vm963_vm10, %v771_v5, %v1011_v56  ;;  %vm958_vm15 = vcmp.ge.f32.partialorder %v769_v49, 0.0  ;;  %vm959_vm2 = vcmp.ge.f32.partialorder %v840_v55, 0.0  ;;  %v1005_v9 = vmul.f32 0.05, %v767_v48  ;;  %v884_v30 = vpop.f32.mrf.mxu0 }
 0x1a6   : > { %v1061_v57 = vsel %vm965_vm12, %v844_v54, %v1013_v63  ;;  %vm960_vm5 = vcmp.ge.f32.partialorder %v842_v10, 0.0  ;;  %v1006_v7 = vmul.f32 0.05, %v769_v49  ;;  %v1007_v20 = vmul.f32 0.05, %v840_v55  ;;  %1962 = vrot.lane.b32.xlu1 %v1929_v2, %s4785_s27 }
 0x1a7   : > { %v1008_v21 = vmul.f32 0.05, %v842_v10  ;;  %v1053_v23 = vsel %vm957_vm14, %v767_v48, %v1005_v9  ;;  %v846_v0 = vadd.f32 %v845_v4, %v5285_v27  ;;  %v773_v28 = vadd.f32 %v772_v13, %v5285_v27  ;;  %v886_v6 = vpop.f32.mrf.mxu0  ;;  %v1816_v9 = vld [vmem:[#allocation2 + $0x8] sm:$0xf] }
 0x1a8   : > { %v1054_v59 = vsel %vm958_vm15, %v769_v49, %v1006_v7  ;;  %v1055_v29 = vsel %vm959_vm2, %v840_v55, %v1007_v20  ;;  %v883_v16 = vadd.f32 %v882_v58, %v5214_v45  ;;  %1736 = vrot.lane.b32.xlu0 %v1703_v8, %s4783_s25  ;;  %v885_v31 = vadd.f32 %v884_v30, %v5214_v45 }
 0x1a9   : > { %v1056_v32 = vsel %vm960_vm5, %v842_v10, %v1008_v21  ;;  %v5312_v18 = vpack.c.bf16 %v1054_v59, %v1053_v23  ;;  %vm966_vm6 = vcmp.ge.f32.partialorder %v846_v0, 0.0  ;;  %v1014_v33 = vmul.f32 0.05, %v846_v0  ;;  %v888_v34 = vpop.f32.mrf.mxu0 }
 0x1aa   : > { %v4554_v24 = vpack.c.bf16 %v1056_v32, %v1055_v29  ;;  %vm964_vm10 = vcmp.ge.f32.partialorder %v773_v28, 0.0  ;;  %v1012_v35 = vmul.f32 0.05, %v773_v28  ;;  %vm925_vm12 = vcmp.ge.f32.partialorder %v883_v16, 0.0  ;;  %2075 = vrot.lane.b32.xlu1 %v2042_v61, %s4786_s28 }
 0x1ab   : > { %1227 = vst [vmem:[#allocation2 + $0x90] sm:$0xff] %v5312_v18  ;;  %v1062_v38 = vsel %vm966_vm6, %v846_v0, %v1014_v33  ;;  %v973_v42 = vmul.f32 0.05, %v883_v16  ;;  %vm926_vm14 = vcmp.ge.f32.partialorder %v885_v31, 0.0  ;;  %v974_v44 = vmul.f32 0.05, %v885_v31  ;;  %v892_v45 = vpop.f32.mrf.mxu0 }
 0x1ac   : > { %1228 = vst [vmem:[#allocation2 + $0x98] sm:$0xff] %v4554_v24  ;;  %v4557_v40 = vpack.c.bf16 %v1062_v38, %v1061_v57  ;;  %v1060_v46 = vsel %vm964_vm10, %v773_v28, %v1012_v35  ;;  %v887_v26 = vadd.f32 %v886_v6, %v5219_v51  ;;  %v889_v14 = vadd.f32 %v888_v34, %v5219_v51  ;;  %v1252_v28 = vld [vmem:[#allocation2 + $0x20] sm:$0xf] }
 0x1ad   : > { %1960 = vrot.lane.b32.xlu0 %v5227_v37, %s4785_s27  ;;  %v5320_v3 = vpack.c.bf16 %v1060_v46, %v1059_v12  ;;  %v1021_v1 = vsel %vm925_vm12, %v883_v16, %v973_v42  ;;  %v1022_v5 = vsel %vm926_vm14, %v885_v31, %v974_v44  ;;  %v893_v47 = vadd.f32 %v892_v45, %v5225_v11  ;;  %v894_v48 = vpop.f32.mrf.mxu0  ;;  %v1366_v34 = vld [vmem:[#allocation2 + $0x20] sm:$0xf] }
 0x1ae   : > { %1231 = vst [vmem:[#allocation2 + $0xb0] sm:$0xff] %v4557_v40  ;;  %v4537_v49 = vpack.c.bf16 %v1022_v5, %v1021_v1  ;;  %vm931_vm15 = vcmp.ge.f32.partialorder %v887_v26, 0.0  ;;  %v979_v13 = vmul.f32 0.05, %v887_v26  ;;  %vm932_vm2 = vcmp.ge.f32.partialorder %v889_v14, 0.0  ;;  %1285 = vrot.lane.b32.xlu1 %v5238_v60, %s4789_s6 }
 0x1af   : > { %1230 = vst [vmem:[#allocation2 + $0xa8] sm:$0xff] %v5320_v3  ;;  %v980_v51 = vmul.f32 0.05, %v889_v14  ;;  %v985_v43 = vmul.f32 0.05, %v893_v47  ;;  %v895_v53 = vadd.f32 %v894_v48, %v5225_v11  ;;  %v896_v54 = vpop.f32.mrf.mxu0  ;;  %vm937_vm5 = vcmp.ge.f32.partialorder %v893_v47, 0.0 }
 0x1b0   : > { %1211 = vst [vmem:[#allocation2 + $0x10] sm:$0xff] %v4537_v49  ;;  %v897_v55 = vadd.f32 %v896_v54, %v5230_v25  ;;  %v1027_v41 = vsel %vm931_vm15, %v887_v26, %v979_v13  ;;  %v1479_v46 = vld [vmem:[#allocation2 + $0x20] sm:$0xf] }
 0x1b1   : > { %2073 = vrot.lane.b32.xlu0 %v5227_v37, %s4786_s28  ;;  %v1028_v56 = vsel %vm932_vm2, %v889_v14, %v980_v51  ;;  %vm938_vm6 = vcmp.ge.f32.partialorder %v895_v53, 0.0  ;;  %v986_v22 = vmul.f32 0.05, %v895_v53  ;;  %v898_v58 = vpop.f32.mrf.mxu0  ;;  %v1033_v11 = vsel %vm937_vm5, %v893_v47, %v985_v43  ;;  %v1931_v47 = vld [vmem:[#allocation2 + $0x20] sm:$0xf] }
 0x1b2   : > { %v4540_v63 = vpack.c.bf16 %v1028_v56, %v1027_v41  ;;  %v991_v10 = vmul.f32 0.05, %v897_v55  ;;  %v899_v4 = vadd.f32 %v898_v58, %v5230_v25  ;;  %1399 = vrot.lane.b32.xlu1 %v5238_v60, %s4788_s30  ;;  %vm943_vm10 = vcmp.ge.f32.partialorder %v897_v55, 0.0  ;;  %v1592_v43 = vld [vmem:[#allocation2 + $0x20] sm:$0xf] }
 0x1b3   : > { %v1034_v12 = vsel %vm938_vm6, %v895_v53, %v986_v22  ;;  %v902_v30 = vpop.f32.mrf.mxu0  ;;  %v2044_v54 = vld [vmem:[#allocation2 + $0x20] sm:$0xf]  ;;  %v1254_v58 = vld [vmem:[#allocation2 + $0x38] sm:$0xf] }
 0x1b4   : > { %1214 = vst [vmem:[#allocation2 + $0x28] sm:$0xff] %v4540_v63  ;;  %v4543_v37 = vpack.c.bf16 %v1034_v12, %v1033_v11  ;;  %vm944_vm12 = vcmp.ge.f32.partialorder %v899_v4, 0.0  ;;  %v992_v2 = vmul.f32 0.05, %v899_v4  ;;  %v903_v57 = vadd.f32 %v902_v30, %v5247_v15  ;;  %v1705_v22 = vld [vmem:[#allocation2 + $0x20] sm:$0xf] }
 0x1b5   : > { %1849 = vrot.lane.b32.xlu0 %v1816_v9, %s4784_s26  ;;  %v904_v7 = vpop.f32.mrf.mxu0  ;;  %v1039_v20 = vsel %vm943_vm10, %v897_v55, %v991_v10  ;;  %v1368_v63 = vld [vmem:[#allocation2 + $0x38] sm:$0xf]  ;;  %v1256_v30 = vld [vmem:[#allocation2 + $0x50] sm:$0xf] }
 0x1b6   : > { %1217 = vst [vmem:[#allocation2 + $0x40] sm:$0xff] %v4543_v37  ;;  %v1040_v25 = vsel %vm944_vm12, %v899_v4, %v992_v2  ;;  %v905_v21 = vadd.f32 %v904_v7, %v5247_v15  ;;  %1512 = vrot.lane.b32.xlu1 %v5238_v60, %s4787_s29  ;;  %vm949_vm14 = vcmp.ge.f32.partialorder %v903_v57, 0.0  ;;  %v997_v0 = vmul.f32 0.05, %v903_v57  ;;  %v1707_v10 = vld [vmem:[#allocation2 + $0x38] sm:$0xf] }
 0x1b7   : > { %v4546_v23 = vpack.c.bf16 %v1040_v25, %v1039_v20  ;;  %v906_v8 = vpop.f32.mrf.mxu0  ;;  %v1933_v4 = vld [vmem:[#allocation2 + $0x38] sm:$0xf]  ;;  %v1370_v37 = vld [vmem:[#allocation2 + $0x50] sm:$0xf] }
 0x1b8   : > { %vm950_vm15 = vcmp.ge.f32.partialorder %v905_v21, 0.0  ;;  %v998_v6 = vmul.f32 0.05, %v905_v21  ;;  %v907_v59 = vadd.f32 %v906_v8, %v5252_v50  ;;  %v1045_v16 = vsel %vm949_vm14, %v903_v57, %v997_v0  ;;  %v1594_v11 = vld [vmem:[#allocation2 + $0x38] sm:$0xf] }
 0x1b9   : > { %1287 = vrot.lane.b32.xlu0 %v1252_v28, %s4789_s6  ;;  %1220 = vst [vmem:[#allocation2 + $0x58] sm:$0xff] %v4546_v23  ;;  %v908_v29 = vpop.f32.mrf.mxu0  ;;  %v2046_v12 = vld [vmem:[#allocation2 + $0x38] sm:$0xf]  ;;  %v1709_v2 = vld [vmem:[#allocation2 + $0x50] sm:$0xf] }
 0x1ba   : > { %v1046_v31 = vsel %vm950_vm15, %v905_v21, %v998_v6  ;;  %v1003_v32 = vmul.f32 0.05, %v907_v59  ;;  %v909_v15 = vadd.f32 %v908_v29, %v5252_v50  ;;  %1625 = vrot.lane.b32.xlu1 %v5238_v60, %s4790_s7  ;;  %vm955_vm2 = vcmp.ge.f32.partialorder %v907_v59, 0.0  ;;  %v1820_v9 = vld [vmem:[#allocation2 + $0x38] sm:$0xf] }
 0x1bb   : > { %v4549_v33 = vpack.c.bf16 %v1046_v31, %v1045_v16  ;;  %v912_v61 = vpop.f32.mrf.mxu0  ;;  %v1483_v57 = vld [vmem:[#allocation2 + $0x50] sm:$0xf]  ;;  %vm3998_vm15 = vcmask 523264  }
 0x1bc   : > { %vm956_vm5 = vcmp.ge.f32.partialorder %v909_v15, 0.0  ;;  %v1004_v24 = vmul.f32 0.05, %v909_v15  ;;  %v913_v35 = vadd.f32 %v912_v61, %v5278_v36  ;;  %v1051_v42 = vsel %vm955_vm2, %v907_v59, %v1003_v32  ;;  %v1596_v20 = vld [vmem:[#allocation2 + $0x50] sm:$0xf] }
 0x1bd   : > { %1401 = vrot.lane.b32.xlu0 %v1366_v34, %s4788_s30  ;;  %1223 = vst [vmem:[#allocation2 + $0x70] sm:$0xff] %v4549_v33  ;;  %v914_v38 = vpop.f32.mrf.mxu0  ;;  %v2048_v21 = vld [vmem:[#allocation2 + $0x50] sm:$0xf]  ;;  %v1258_v32 = vld [vmem:[#allocation2 + $0x68] sm:$0xf] }
 0x1be   : > { %v1052_v44 = vsel %vm956_vm5, %v909_v15, %v1004_v24  ;;  %v1009_v45 = vmul.f32 0.05, %v913_v35  ;;  %v915_v50 = vadd.f32 %v914_v38, %v5278_v36  ;;  %1738 = vrot.lane.b32.xlu1 %v5238_v60, %s4783_s25  ;;  %vm961_vm6 = vcmp.ge.f32.partialorder %v913_v35, 0.0  ;;  %v1822_v0 = vld [vmem:[#allocation2 + $0x50] sm:$0xf] }
 0x1bf   : > { %v4552_v40 = vpack.c.bf16 %v1052_v44, %v1051_v42  ;;  %v916_v26 = vpop.f32.mrf.mxu0  ;;  %v1372_v34 = vld [vmem:[#allocation2 + $0x68] sm:$0xf]  ;;  %v1378_v17 = vld [vmem:[#allocation2 + $0xb0] sm:$0xf] }
 0x1c0   : > { %vm962_vm10 = vcmp.ge.f32.partialorder %v915_v50, 0.0  ;;  %v1010_v14 = vmul.f32 0.05, %v915_v50  ;;  %v917_v1 = vadd.f32 %v916_v26, %v5285_v27  ;;  %v1057_v48 = vsel %vm961_vm6, %v913_v35, %v1009_v45  ;;  %v1711_v61 = vld [vmem:[#allocation2 + $0x68] sm:$0xf] }
 0x1c1   : > { %1514 = vrot.lane.b32.xlu0 %v1479_v46, %s4787_s29  ;;  %1226 = vst [vmem:[#allocation2 + $0x88] sm:$0xff] %v4552_v40  ;;  %v918_v5 = vpop.f32.mrf.mxu0  ;;  %v1485_v35 = vld [vmem:[#allocation2 + $0x68] sm:$0xf] }
 0x1c2   : > { %v1058_v49 = vsel %vm962_vm10, %v915_v50, %v1010_v14  ;;  %v1015_v13 = vmul.f32 0.05, %v917_v1  ;;  %v919_v36 = vadd.f32 %v918_v5, %v5285_v27  ;;  %1966 = vrot.lane.b32.xlu1 %v1931_v47, %s4785_s27  ;;  %vm967_vm12 = vcmp.ge.f32.partialorder %v917_v1, 0.0  ;;  %v1818_v27 = vld [vmem:[#allocation2 + $0x20] sm:$0xf] }
 0x1c3   : > { %v4555_v51 = vpack.c.bf16 %v1058_v49, %v1057_v48  ;;  %v1937_v42 = vld [vmem:[#allocation2 + $0x68] sm:$0xf] }
 0x1c4   : > { %vm968_vm14 = vcmp.ge.f32.partialorder %v919_v36, 0.0  ;;  %v1016_v53 = vmul.f32 0.05, %v919_v36  ;;  %v1063_v55 = vsel %vm967_vm12, %v917_v1, %v1015_v13  ;;  %v1598_v45 = vld [vmem:[#allocation2 + $0x68] sm:$0xf] }
 0x1c5   : > { %1627 = vrot.lane.b32.xlu0 %v1592_v43, %s4790_s7  ;;  %1229 = vst [vmem:[#allocation2 + $0xa0] sm:$0xff] %v4555_v51  ;;  %v2050_v40 = vld [vmem:[#allocation2 + $0x68] sm:$0xf]  ;;  %v1260_v51 = vld [vmem:[#allocation2 + $0x80] sm:$0xf] }
 0x1c6   : > { %v1064_v41 = vsel %vm968_vm14, %v919_v36, %v1016_v53  ;;  %2079 = vrot.lane.b32.xlu1 %v2044_v54, %s4786_s28  ;;  %v1824_v14 = vld [vmem:[#allocation2 + $0x68] sm:$0xf]  ;;  %v1374_v54 = vld [vmem:[#allocation2 + $0x80] sm:$0xf] }
 0x1c7   : > { %v4558_v56 = vpack.c.bf16 %v1064_v41, %v1063_v55  ;;  %v1713_v55 = vld [vmem:[#allocation2 + $0x80] sm:$0xf] }
 0x1c9   : > { %1740 = vrot.lane.b32.xlu0 %v1705_v22, %s4783_s25  ;;  %1232 = vst [vmem:[#allocation2 + $0xb8] sm:$0xff] %v4558_v56  ;;  %v1487_v56 = vld [vmem:[#allocation2 + $0x80] sm:$0xf] }
 0x1ca   : > { %1851 = vrot.lane.b32.xlu1 %v5238_v60, %s4784_s26 }
 0x1cd   : > { %1964 = vrot.lane.b32.xlu0 %v5238_v60, %s4785_s27 }
 0x1ce   : > { %1289 = vrot.lane.b32.xlu1 %v5255_v52, %s4789_s6 }
 0x1d1   : > { %2077 = vrot.lane.b32.xlu0 %v5238_v60, %s4786_s28  ;;  %v1481_v60 = vld [vmem:[#allocation2 + $0x38] sm:$0xf] }
 0x1d2   : > { %1403 = vrot.lane.b32.xlu1 %v5255_v52, %s4788_s30 }
 0x1d5   : > { %1853 = vrot.lane.b32.xlu0 %v1818_v27, %s4784_s26  ;;  %v1939_v27 = vld [vmem:[#allocation2 + $0x80] sm:$0xf] }
 0x1d6   : > { %1516 = vrot.lane.b32.xlu1 %v5255_v52, %s4787_s29 }
 0x1d9   : > { %1291 = vrot.lane.b32.xlu0 %v1254_v58, %s4789_s6 }
 0x1da   : > { %1629 = vrot.lane.b32.xlu1 %v5255_v52, %s4790_s7 }
 0x1dd   : > { %1405 = vrot.lane.b32.xlu0 %v1368_v63, %s4788_s30  ;;  %v1600_v63 = vld [vmem:[#allocation2 + $0x80] sm:$0xf] }
 0x1de   : > { %1744 = vrot.lane.b32.xlu1 %v1707_v10, %s4783_s25 }
 0x1e1   : > { %1518 = vrot.lane.b32.xlu0 %v1481_v60, %s4787_s29  ;;  %v2052_v60 = vld [vmem:[#allocation2 + $0x80] sm:$0xf] }
 0x1e2   : > { %1970 = vrot.lane.b32.xlu1 %v1933_v4, %s4785_s27 }
 0x1e5   : > { %1631 = vrot.lane.b32.xlu0 %v1594_v11, %s4790_s7 }
 0x1e6   : > { %2083 = vrot.lane.b32.xlu1 %v2046_v12, %s4786_s28  ;;  %v1826_v12 = vld [vmem:[#allocation2 + $0x80] sm:$0xf] }
 0x1e9   : > { %1742 = vrot.lane.b32.xlu0 %v5255_v52, %s4783_s25 }
 0x1ea   : > { %1857 = vrot.lane.b32.xlu1 %v1820_v9, %s4784_s26 }
 0x1ed   : > { %1968 = vrot.lane.b32.xlu0 %v5255_v52, %s4785_s27 }
 0x1ee   : > { %1293 = vrot.lane.b32.xlu1 %v5267_v19, %s4789_s6 }
 0x1f1   : > { %2081 = vrot.lane.b32.xlu0 %v5255_v52, %s4786_s28 }
 0x1f2   : > { %1407 = vrot.lane.b32.xlu1 %v5267_v19, %s4788_s30 }
 0x1f5   : > { %1855 = vrot.lane.b32.xlu0 %v5255_v52, %s4784_s26  ;;  %v1935_v52 = vld [vmem:[#allocation2 + $0x50] sm:$0xf] }
 0x1f6   : > { %1520 = vrot.lane.b32.xlu1 %v5267_v19, %s4787_s29 }
 0x1f9   : > { %1295 = vrot.lane.b32.xlu0 %v1256_v30, %s4789_s6 }
 0x1fa   : > { %1633 = vrot.lane.b32.xlu1 %v5267_v19, %s4790_s7 }
 0x1fd   : > { %1409 = vrot.lane.b32.xlu0 %v1370_v37, %s4788_s30 }
 0x1fe   : > { %1748 = vrot.lane.b32.xlu1 %v1709_v2, %s4783_s25 }
 0x1ff   : > { %v5398_v7 = vpop.permute.xlu1 %1281 }
 0x201   : > { %1522 = vrot.lane.b32.xlu0 %v1483_v57, %s4787_s29 }
 0x202   : > { %1974 = vrot.lane.b32.xlu1 %v1935_v52, %s4785_s27 }
 0x203   : > { %v5402_v25 = vpop.permute.xlu1 %1395 }
 0x205   : > { %1635 = vrot.lane.b32.xlu0 %v1596_v20, %s4790_s7 }
 0x206   : > { %2087 = vrot.lane.b32.xlu1 %v2048_v21, %s4786_s28  ;;  %v1262_v21 = vld [vmem:[#allocation2 + $0x98] sm:$0xf] }
 0x207   : > { %v5407_v23 = vpop.permute.xlu1 %1508 }
 0x209   : > { %1746 = vrot.lane.b32.xlu0 %v5267_v19, %s4783_s25 }
 0x20a   : > { %v5409_v28 = vpop.permute.xlu0 %1283  ;;  %1861 = vrot.lane.b32.xlu1 %v1822_v0, %s4784_s26 }
 0x20b   : > { %v5414_v8 = vpop.permute.xlu1 %1621 }
 0x20d   : > { %1972 = vrot.lane.b32.xlu0 %v5267_v19, %s4785_s27 }
 0x20e   : > { %v5416_v6 = vpop.permute.xlu0 %1397  ;;  %1297 = vrot.lane.b32.xlu1 %v5283_v39, %s4789_s6 }
 0x20f   : > { %v5422_v59 = vpop.permute.xlu1 %1734 }
 0x211   : > { %2085 = vrot.lane.b32.xlu0 %v5267_v19, %s4786_s28 }
 0x212   : > { %v5424_v29 = vpop.permute.xlu0 %1510  ;;  %1411 = vrot.lane.b32.xlu1 %v5283_v39, %s4788_s30 }
 0x214   : > { %v5430_v16 = vpop.permute.xlu1 %1847 }
 0x215   : > { %1859 = vrot.lane.b32.xlu0 %v5267_v19, %s4784_s26  ;;  %6838 = vst [vmem:[#allocation4_spill] sm:$0xff] %v5430_v16  ;;  %v1717_v16 = vld [vmem:[#allocation2 + $0xb0] sm:$0xf] }
 0x216   : > { %v5432_v31 = vpop.permute.xlu0 %1623  ;;  %1524 = vrot.lane.b32.xlu1 %v5283_v39, %s4787_s29 }
 0x218   : > { %v5437_v15 = vpop.permute.xlu1 %1962 }
 0x219   : > { %1299 = vrot.lane.b32.xlu0 %v1258_v32, %s4789_s6 }
 0x21a   : > { %v5439_v33 = vpop.permute.xlu0 %1736  ;;  %1637 = vrot.lane.b32.xlu1 %v5283_v39, %s4790_s7 }
 0x21c   : > { %v5444_v19 = vpop.permute.xlu1 %2075 }
 0x21d   : > { %1413 = vrot.lane.b32.xlu0 %v1372_v34, %s4788_s30  ;;  %6839 = vst [vmem:[#allocation5_spill] sm:$0xff] %v5444_v19  ;;  %v1376_v34 = vld [vmem:[#allocation2 + $0x98] sm:$0xf] }
 0x21e   : > { %1752 = vrot.lane.b32.xlu1 %v1711_v61, %s4783_s25  ;;  %v1715_v61 = vld [vmem:[#allocation2 + $0x98] sm:$0xf] }
 0x21f   : > { %v5446_v24 = vpop.permute.xlu0 %1960 }
 0x220   : > { %v5450_v38 = vpop.permute.xlu1 %1285 }
 0x221   : > { %1526 = vrot.lane.b32.xlu0 %v1485_v35, %s4787_s29 }
 0x222   : > { %1978 = vrot.lane.b32.xlu1 %v1937_v42, %s4785_s27  ;;  %v1489_v42 = vld [vmem:[#allocation2 + $0x98] sm:$0xf] }
 0x223   : > { %v5452_v44 = vpop.permute.xlu0 %2073 }
 0x224   : > { %6840 = vst [vmem:[#allocation6_spill] sm:$0xff] %v5452_v44  ;;  %v5456_v50 = vpop.permute.xlu1 %1399 }
 0x225   : > { %1639 = vrot.lane.b32.xlu0 %v1598_v45, %s4790_s7 }
 0x226   : > { %2091 = vrot.lane.b32.xlu1 %v2050_v40, %s4786_s28  ;;  %v1941_v40 = vld [vmem:[#allocation2 + $0x98] sm:$0xf] }
 0x227   : > { %v5458_v46 = vpop.permute.xlu0 %1849 }
 0x228   : > { %6841 = vst [vmem:[#allocation7_spill] sm:$0xff] %v5458_v46  ;;  %v5463_v26 = vpop.permute.xlu1 %1512  ;;  %v2171_v46 = vld [vmem:[#allocation2 + $0x14] sm:$0xf] }
 0x229   : > { %1750 = vrot.lane.b32.xlu0 %v5283_v39, %s4783_s25 }
 0x22a   : > { %1865 = vrot.lane.b32.xlu1 %v1824_v14, %s4784_s26 }
 0x22b   : > { %v5465_v1 = vpop.permute.xlu0 %1287 }
 0x22c   : > { %v5470_v5 = vpop.permute.xlu1 %1625 }
 0x22d   : > { %1976 = vrot.lane.b32.xlu0 %v5283_v39, %s4785_s27 }
 0x22e   : > { %1301 = vrot.lane.b32.xlu1 %v5298_v62, %s4789_s6 }
 0x22f   : > { %v5472_v47 = vpop.permute.xlu0 %1401 }
 0x230   : > { %v5478_v48 = vpop.permute.xlu1 %1738 }
 0x231   : > { %2089 = vrot.lane.b32.xlu0 %v5283_v39, %s4786_s28 }
 0x232   : > { %1415 = vrot.lane.b32.xlu1 %v5298_v62, %s4788_s30 }
 0x233   : > { %v5480_v49 = vpop.permute.xlu0 %1514 }
 0x234   : > { %v5486_v13 = vpop.permute.xlu1 %1966 }
 0x235   : > { %1863 = vrot.lane.b32.xlu0 %v5283_v39, %s4784_s26  ;;  %6842 = vst [vmem:[#allocation8_spill] sm:$0xff] %v5486_v13  ;;  %v2517_v13 = vld [vmem:[#allocation2 + $0x8c] sm:$0xf] }
 0x236   : > { %1528 = vrot.lane.b32.xlu1 %v5298_v62, %s4787_s29 }
 0x237   : > { %v5488_v36 = vpop.permute.xlu0 %1627 }
 0x238   : > { %v5493_v43 = vpop.permute.xlu1 %2079 }
 0x239   : > { %1303 = vrot.lane.b32.xlu0 %v1260_v51, %s4789_s6  ;;  %6843 = vst [vmem:[#allocation9_spill] sm:$0xff] %v5493_v43  ;;  %v1602_v51 = vld [vmem:[#allocation2 + $0x98] sm:$0xf]  ;;  %v1491_v43 = vld [vmem:[#allocation2 + $0xb0] sm:$0xf] }
 0x23a   : > { %1641 = vrot.lane.b32.xlu1 %v5298_v62, %s4790_s7 }
 0x23b   : > { %v5495_v53 = vpop.permute.xlu0 %1740 }
 0x23c   : > { %v5500_v39 = vpop.permute.xlu1 %1851 }
 0x23d   : > { %1417 = vrot.lane.b32.xlu0 %v1374_v54, %s4788_s30  ;;  %6844 = vst [vmem:[#allocation10_spill] sm:$0xff] %v5500_v39 }
 0x23e   : > { %1756 = vrot.lane.b32.xlu1 %v1713_v55, %s4783_s25  ;;  %v2054_v55 = vld [vmem:[#allocation2 + $0x98] sm:$0xf] }
 0x23f   : > { %v5502_v41 = vpop.permute.xlu0 %1964 }
 0x240   : > { %v5506_v22 = vpop.permute.xlu1 %1289 }
 0x241   : > { %1530 = vrot.lane.b32.xlu0 %v1487_v56, %s4787_s29 }
 0x242   : > { %1982 = vrot.lane.b32.xlu1 %v1939_v27, %s4785_s27 }
 0x243   : > { %v5508_v58 = vpop.permute.xlu0 %2077 }
 0x244   : > { %6845 = vst [vmem:[#allocation11_spill] sm:$0xff] %v5508_v58  ;;  %v5512_v10 = vpop.permute.xlu1 %1403 }
 0x245   : > { %1643 = vrot.lane.b32.xlu0 %v1600_v63, %s4790_s7  ;;  %6846 = vst [vmem:[#allocation12_spill] sm:$0xff] %v5512_v10  ;;  %v1828_v63 = vld [vmem:[#allocation2 + $0x98] sm:$0xf] }
 0x246   : > { %2095 = vrot.lane.b32.xlu1 %v2052_v60, %s4786_s28 }
 0x247   : > { %v5514_v4 = vpop.permute.xlu0 %1853 }
 0x248   : > { %6847 = vst [vmem:[#allocation13_spill] sm:$0xff] %v5514_v4  ;;  %v5519_v11 = vpop.permute.xlu1 %1516 }
 0x249   : > { %1754 = vrot.lane.b32.xlu0 %v5298_v62, %s4783_s25  ;;  %6848 = vst [vmem:[#allocation14_spill] sm:$0xff] %v5519_v11 }
 0x24a   : > { %1869 = vrot.lane.b32.xlu1 %v1826_v12, %s4784_s26 }
 0x24b   : > { %v5521_v9 = vpop.permute.xlu0 %1291 }
 0x24c   : > { %v5526_v30 = vpop.permute.xlu1 %1629 }
 0x24d   : > { %1980 = vrot.lane.b32.xlu0 %v5298_v62, %s4785_s27  ;;  %6849 = vst [vmem:[#allocation15_spill] sm:$0xff] %v5526_v30  ;;  %v1540_v30 = vrot.slane %v5407_v23, 4 }
 0x24e   : > { %1305 = vrot.lane.b32.xlu1 %v5312_v18, %s4789_s6 }
 0x24f   : > { %v5528_v37 = vpop.permute.xlu0 %1405 }
 0x250   : > { %6850 = vst [vmem:[#allocation16_spill] sm:$0xff] %v5528_v37  ;;  %v5534_v2 = vpop.permute.xlu1 %1744  ;;  %v2625_v37 = vld [vmem:[#allocation2 + $0x5c] sm:$0xf] }
 0x251   : > { %2093 = vrot.lane.b32.xlu0 %v5298_v62, %s4786_s28 }
 0x252   : > { %1419 = vrot.lane.b32.xlu1 %v5312_v18, %s4788_s30 }
 0x253   : > { %v5536_v57 = vpop.permute.xlu0 %1518 }
 0x254   : > { %6851 = vst [vmem:[#allocation17_spill] sm:$0xff] %v5536_v57  ;;  %v5542_v52 = vpop.permute.xlu1 %1970  ;;  %v1541_v57 = vrot.slane %v5424_v29, 4  ;;  %v1992_v29 = vrot.slane %v5446_v24, 4 }
 0x255   : > { %1867 = vrot.lane.b32.xlu0 %v5298_v62, %s4784_s26  ;;  %6852 = vst [vmem:[#allocation18_spill] sm:$0xff] %v5542_v52  ;;  %v2619_v52 = vld [vmem:[#allocation2 + $0x14] sm:$0xf] }
 0x256   : > { %1532 = vrot.lane.b32.xlu1 %v5312_v18, %s4787_s29 }
 0x257   : > { %v5544_v20 = vpop.permute.xlu0 %1631 }
 0x258   : > { %6853 = vst [vmem:[#allocation19_spill] sm:$0xff] %v5544_v20  ;;  %v5549_v0 = vpop.permute.xlu1 %2083 }
 0x259   : > { %1307 = vrot.lane.b32.xlu0 %v1262_v21, %s4789_s6  ;;  %6854 = vst [vmem:[#allocation20_spill] sm:$0xff] %v5549_v0  ;;  %v5660_v0 = vld [vmem:[#allocation2 + $0x24] sm:$0xff] }
 0x25a   : > { %1645 = vrot.lane.b32.xlu1 %v5312_v18, %s4790_s7  ;;  %6878 = vst [vmem:[#allocation44_spill] sm:$0xff] %v5660_v0 }
 0x25b   : > { %v5551_v32 = vpop.permute.xlu0 %1742 }
 0x25c   : > { %v5556_v62 = vpop.permute.xlu1 %1857 }
 0x25d   : > { %1421 = vrot.lane.b32.xlu0 %v1376_v34, %s4788_s30  ;;  %6855 = vst [vmem:[#allocation21_spill] sm:$0xff] %v5556_v62  ;;  %v1943_v62 = vld [vmem:[#allocation2 + $0xb0] sm:$0xf] }
 0x25e   : > { %1760 = vrot.lane.b32.xlu1 %v1715_v61, %s4783_s25 }
 0x25f   : > { %v5558_v35 = vpop.permute.xlu0 %1968 }
 0x260   : > { %6856 = vst [vmem:[#allocation22_spill] sm:$0xff] %v5558_v35  ;;  %v5562_v45 = vpop.permute.xlu1 %1293  ;;  %v5714_v35 = vld [vmem:[#allocation2 + $0x6c] sm:$0xff] }
 0x261   : > { %1534 = vrot.lane.b32.xlu0 %v1489_v42, %s4787_s29  ;;  %6889 = vst [vmem:[#allocation55_spill] sm:$0xff] %v5714_v35 }
 0x262   : > { %1986 = vrot.lane.b32.xlu1 %v1941_v40, %s4785_s27 }
 0x263   : > { %v5564_v14 = vpop.permute.xlu0 %2081 }
 0x264   : > { %6857 = vst [vmem:[#allocation23_spill] sm:$0xff] %v5564_v14  ;;  %v5568_v54 = vpop.permute.xlu1 %1407 }
 0x265   : > { %1647 = vrot.lane.b32.xlu0 %v1602_v51, %s4790_s7  ;;  %6858 = vst [vmem:[#allocation24_spill] sm:$0xff] %v5568_v54  ;;  %v1264_v51 = vld [vmem:[#allocation2 + $0xb0] sm:$0xf] }
 0x266   : > { %2099 = vrot.lane.b32.xlu1 %v2054_v55, %s4786_s28 }
 0x267   : > { %v5570_v56 = vpop.permute.xlu0 %1855 }
 0x268   : > { %6859 = vst [vmem:[#allocation25_spill] sm:$0xff] %v5570_v56  ;;  %v5575_v27 = vpop.permute.xlu1 %1520 }
 0x269   : > { %1758 = vrot.lane.b32.xlu0 %v5312_v18, %s4783_s25  ;;  %6860 = vst [vmem:[#allocation26_spill] sm:$0xff] %v5575_v27  ;;  %v5756_v27 = vld [vmem:[#allocation2 + $0x9c] sm:$0xff] }
 0x26a   : > { %1873 = vrot.lane.b32.xlu1 %v1828_v63, %s4784_s26  ;;  %6899 = vst [vmem:[#allocation65_spill] sm:$0xff] %v5756_v27 }
 0x26b   : > { %v5577_v60 = vpop.permute.xlu0 %1295 }
 0x26c   : > { %v5582_v12 = vpop.permute.xlu1 %1633 }
 0x26d   : > { %1984 = vrot.lane.b32.xlu0 %v5312_v18, %s4785_s27  ;;  %6861 = vst [vmem:[#allocation27_spill] sm:$0xff] %v5582_v12  ;;  %v4793_v12 = vmov 1983009808  }
 0x26e   : > { %1309 = vrot.lane.b32.xlu1 %v5320_v3, %s4789_s6 }
 0x26f   : > { %v5584_v21 = vpop.permute.xlu0 %1409 }
 0x270   : > { %6862 = vst [vmem:[#allocation28_spill] sm:$0xff] %v5584_v21  ;;  %v5590_v34 = vpop.permute.xlu1 %1748 }
 0x271   : > { %2097 = vrot.lane.b32.xlu0 %v5312_v18, %s4786_s28 }
 0x272   : > { %1423 = vrot.lane.b32.xlu1 %v5320_v3, %s4788_s30 }
 0x273   : > { %v5592_v61 = vpop.permute.xlu0 %1522 }
 0x274   : > { %6863 = vst [vmem:[#allocation29_spill] sm:$0xff] %v5592_v61  ;;  %v5598_v42 = vpop.permute.xlu1 %1974 }
 0x275   : > { %1871 = vrot.lane.b32.xlu0 %v5312_v18, %s4784_s26  ;;  %6864 = vst [vmem:[#allocation30_spill] sm:$0xff] %v5598_v42 }
 0x276   : > { %1536 = vrot.lane.b32.xlu1 %v5320_v3, %s4787_s29 }
 0x277   : > { %v5600_v40 = vpop.permute.xlu0 %1635 }
 0x278   : > { %6865 = vst [vmem:[#allocation31_spill] sm:$0xff] %v5600_v40  ;;  %v5605_v55 = vpop.permute.xlu1 %2087 }
 0x279   : > { %1311 = vrot.lane.b32.xlu0 %v1264_v51, %s4789_s6  ;;  %6866 = vst [vmem:[#allocation32_spill] sm:$0xff] %v5605_v55 }
 0x27a   : > { %1649 = vrot.lane.b32.xlu1 %v5320_v3, %s4790_s7  ;;  %v1604_v3 = vld [vmem:[#allocation2 + $0xb0] sm:$0xf] }
 0x27b   : > { %v5607_v63 = vpop.permute.xlu0 %1746 }
 0x27c   : > { %v5612_v18 = vpop.permute.xlu1 %1861 }
 0x27d   : > { %1425 = vrot.lane.b32.xlu0 %v1378_v17, %s4788_s30  ;;  %6867 = vst [vmem:[#allocation33_spill] sm:$0xff] %v5612_v18  ;;  %v2056_v18 = vld [vmem:[#allocation2 + $0xb0] sm:$0xf] }
 0x27e   : > { %1764 = vrot.lane.b32.xlu1 %v1717_v16, %s4783_s25  ;;  %v5629_v16 = vld [vmem:[#allocation2 + $0xa8] sm:$0xff] }
 0x27f   : > { %v5614_v39 = vpop.permute.xlu0 %1972  ;;  %6872 = vst [vmem:[#allocation38_spill] sm:$0xff] %v5629_v16 }
 0x280   : > { %6868 = vst [vmem:[#allocation34_spill] sm:$0xff] %v5614_v39  ;;  %v5618_v51 = vpop.permute.xlu1 %1297  ;;  %v2173_v39 = vld [vmem:[#allocation2 + $0x2c] sm:$0xf] }
 0x281   : > { %1538 = vrot.lane.b32.xlu0 %v1491_v43, %s4787_s29 }
 0x282   : > { %1990 = vrot.lane.b32.xlu1 %v1943_v62, %s4785_s27 }
 0x283   : > { %v5620_v4 = vpop.permute.xlu0 %2085 }
 0x284   : > { %6869 = vst [vmem:[#allocation35_spill] sm:$0xff] %v5620_v4  ;;  %v5624_v17 = vpop.permute.xlu1 %1411  ;;  %v1830_v4 = vld [vmem:[#allocation2 + $0xb0] sm:$0xf] }
 0x285   : > { %1651 = vrot.lane.b32.xlu0 %v1604_v3, %s4790_s7  ;;  %6870 = vst [vmem:[#allocation36_spill] sm:$0xff] %v5624_v17  ;;  %v5642_v3 = vld [vmem:[#allocation2 + $0xc] sm:$0xff] }
 0x286   : > { %2103 = vrot.lane.b32.xlu1 %v2056_v18, %s4786_s28 }
 0x287   : > { %v5626_v55 = vpop.permute.xlu0 %1859 }
 0x288   : > { %6871 = vst [vmem:[#allocation37_spill] sm:$0xff] %v5626_v55  ;;  %v5633_v43 = vpop.permute.xlu1 %1524 }
 0x289   : > { %1762 = vrot.lane.b32.xlu0 %v5629_v16, %s4783_s25  ;;  %6873 = vst [vmem:[#allocation39_spill] sm:$0xff] %v5633_v43  ;;  %v2181_v43 = vld [vmem:[#allocation2 + $0x8c] sm:$0xf] }
 0x28a   : > { %1877 = vrot.lane.b32.xlu1 %v1830_v4, %s4784_s26 }
 0x28b   : > { %v5635_v56 = vpop.permute.xlu0 %1299 }
 0x28c   : > { %v5640_v62 = vpop.permute.xlu1 %1637 }
 0x28d   : > { %1988 = vrot.lane.b32.xlu0 %v5629_v16, %s4785_s27  ;;  %6874 = vst [vmem:[#allocation40_spill] sm:$0xff] %v5640_v62  ;;  %v3252_v62 = vunpack.c.l.s4 %v4793_v12 }
 0x28e   : > { %2202 = vrot.lane.b32.xlu1 %v5642_v3, %s4789_s6 }
 0x28f   : > { %v5644_v18 = vpop.permute.xlu0 %1413  ;;  %v3253_v40 = vunpack.c.0.s8 %v3252_v62 }
 0x290   : > { %6875 = vst [vmem:[#allocation41_spill] sm:$0xff] %v5644_v18  ;;  %v5650_v55 = vpop.permute.xlu1 %1752 }
 0x291   : > { %2101 = vrot.lane.b32.xlu0 %v5629_v16, %s4786_s28 }
 0x292   : > { %2650 = vrot.lane.b32.xlu1 %v5642_v3, %s4783_s25 }
 0x293   : > { %v5652_v14 = vpop.permute.xlu0 %1526 }
 0x294   : > { %6876 = vst [vmem:[#allocation42_spill] sm:$0xff] %v5652_v14  ;;  %v5658_v4 = vpop.permute.xlu1 %1978 }
 0x295   : > { %1875 = vrot.lane.b32.xlu0 %v5629_v16, %s4784_s26  ;;  %6877 = vst [vmem:[#allocation43_spill] sm:$0xff] %v5658_v4  ;;  %v2175_v4 = vld [vmem:[#allocation2 + $0x44] sm:$0xf]  ;;  %v1654_v16 = vrot.slane %v5432_v31, 4  ;;  %v1315_v31 = vrot.slane %v5450_v38, 4 }
 0x296   : > { %2206 = vrot.lane.b32.xlu1 %v5660_v0, %s4789_s6 }
 0x297   : > { %v5662_v58 = vpop.permute.xlu0 %1639 }
 0x298   : > { %6879 = vst [vmem:[#allocation45_spill] sm:$0xff] %v5662_v58  ;;  %v5667_v44 = vpop.permute.xlu1 %2091 }
 0x299   : > { %2204 = vrot.lane.b32.xlu0 %v2171_v46, %s4789_s6  ;;  %6880 = vst [vmem:[#allocation46_spill] sm:$0xff] %v5667_v44  ;;  %v5682_v44 = vld [vmem:[#allocation2 + $0x3c] sm:$0xff] }
 0x29a   : > { %2654 = vrot.lane.b32.xlu1 %v5660_v0, %s4783_s25  ;;  %v2515_v0 = vld [vmem:[#allocation2 + $0x74] sm:$0xf] }
 0x29b   : > { %v5669_v19 = vpop.permute.xlu0 %1750 }
 0x29c   : > { %v5674_v42 = vpop.permute.xlu1 %1865 }
 0x29d   : > { %2652 = vrot.lane.b32.xlu0 %v2619_v52, %s4783_s25  ;;  %6881 = vst [vmem:[#allocation47_spill] sm:$0xff] %v5674_v42  ;;  %v2621_v52 = vld [vmem:[#allocation2 + $0x2c] sm:$0xf] }
 0x29e   : > { %2212 = vrot.lane.b32.xlu1 %v2175_v4, %s4789_s6  ;;  %v5698_v4 = vld [vmem:[#allocation2 + $0x54] sm:$0xff] }
 0x29f   : > { %v5676_v17 = vpop.permute.xlu0 %1976 }
 0x2a0   : > { %6882 = vst [vmem:[#allocation48_spill] sm:$0xff] %v5676_v17  ;;  %v5680_v46 = vpop.permute.xlu1 %1301  ;;  %v2177_v17 = vld [vmem:[#allocation2 + $0x5c] sm:$0xf] }
 0x2a1   : > { %2208 = vrot.lane.b32.xlu0 %v2173_v39, %s4789_s6 }
 0x2a2   : > { %2658 = vrot.lane.b32.xlu1 %v5682_v44, %s4783_s25 }
 0x2a3   : > { %v5684_v18 = vpop.permute.xlu0 %2089 }
 0x2a4   : > { %6883 = vst [vmem:[#allocation49_spill] sm:$0xff] %v5684_v18  ;;  %v5689_v42 = vpop.permute.xlu1 %1415 }
 0x2a5   : > { %2656 = vrot.lane.b32.xlu0 %v2621_v52, %s4783_s25  ;;  %6884 = vst [vmem:[#allocation50_spill] sm:$0xff] %v5689_v42  ;;  %v2623_v52 = vld [vmem:[#allocation2 + $0x44] sm:$0xf] }
 0x2a6   : > { %2216 = vrot.lane.b32.xlu1 %v2177_v17, %s4789_s6 }
 0x2a7   : > { %v5691_v54 = vpop.permute.xlu0 %1863 }
 0x2a8   : > { %6885 = vst [vmem:[#allocation51_spill] sm:$0xff] %v5691_v54  ;;  %v5696_v39 = vpop.permute.xlu1 %1528  ;;  %v2179_v54 = vld [vmem:[#allocation2 + $0x74] sm:$0xf] }
 0x2a9   : > { %2210 = vrot.lane.b32.xlu0 %v5682_v44, %s4789_s6  ;;  %6886 = vst [vmem:[#allocation52_spill] sm:$0xff] %v5696_v39  ;;  %v3066_v39 = vld [vmem:[%s6772_s2] sm:$0xff] }
 0x2aa   : > { %2662 = vrot.lane.b32.xlu1 %v5698_v4, %s4783_s25 }
 0x2ab   : > { %v5700_v18 = vpop.permute.xlu0 %1303 }
 0x2ac   : > { %v5705_v42 = vpop.permute.xlu1 %1641 }
 0x2ad   : > { %2660 = vrot.lane.b32.xlu0 %v2623_v52, %s4783_s25  ;;  %6887 = vst [vmem:[#allocation53_spill] sm:$0xff] %v5705_v42  ;;  %v3254_v52 = vlaneseq }
 0x2ae   : > { %2220 = vrot.lane.b32.xlu1 %v2179_v54, %s4789_s6 }
 0x2af   : > { %v5707_v21 = vpop.permute.xlu0 %1417  ;;  %v3255_v54 = vshrl.u32 %v3254_v52, 7 }
 0x2b0   : > { %6888 = vst [vmem:[#allocation54_spill] sm:$0xff] %v5707_v21  ;;  %v5712_v17 = vpop.permute.xlu1 %1756 }
 0x2b1   : > { %2214 = vrot.lane.b32.xlu0 %v5698_v4, %s4789_s6  ;;  %v3256_v58 = vsub.s32 %v3253_v40, %v3255_v54  ;;  %v2183_v54 = vld [vmem:[#allocation2 + $0xa4] sm:$0xf] }
 0x2b2   : > { %2666 = vrot.lane.b32.xlu1 %v5714_v35, %s4783_s25 }
 0x2b3   : > { %v5716_v10 = vpop.permute.xlu0 %1530 }
 0x2b4   : > { %6890 = vst [vmem:[#allocation56_spill] sm:$0xff] %v5716_v10  ;;  %v5721_v21 = vpop.permute.xlu1 %1982 }
 0x2b5   : > { %2664 = vrot.lane.b32.xlu0 %v2625_v37, %s4783_s25  ;;  %6891 = vst [vmem:[#allocation57_spill] sm:$0xff] %v5721_v21  ;;  %v5733_v37 = vld [vmem:[#allocation2 + $0x84] sm:$0xff]  ;;  %v5735_v21 = vrot.slane %v3066_v39, %v3256_v58 }
 0x2b6   : > { %2224 = vrot.lane.b32.xlu1 %v2181_v43, %s4789_s6  ;;  %6894 = vst [vmem:[#allocation60_spill] sm:$0xff] %v5733_v37  ;;  %v2627_v43 = vld [vmem:[#allocation2 + $0x74] sm:$0xf] }
 0x2b7   : > { %v5723_v42 = vpop.permute.xlu0 %1643  ;;  %6895 = vst [vmem:[#allocation61_spill] sm:$0xff] %v5735_v21  ;;  %v5743_v62 = vcombine.high %v5735_v21, %v5735_v21 }
 0x2b8   : > { %6892 = vst [vmem:[#allocation58_spill] sm:$0xff] %v5723_v42  ;;  %v5731_v12 = vpop.permute.xlu1 %2095  ;;  %v2519_v42 = vld [vmem:[#allocation2 + $0xa4] sm:$0xf] }
 0x2b9   : > { %2218 = vrot.lane.b32.xlu0 %v5714_v35, %s4789_s6  ;;  %6893 = vst [vmem:[#allocation59_spill] sm:$0xff] %v5731_v12  ;;  %6896 = vst [vmem:[#allocation62_spill] sm:$0xff] %v5743_v62  ;;  %4034 = vmatprep.mubr.bf16.mxu1 %v5743_v62 }
 0x2ba   : > { %2670 = vrot.lane.b32.xlu1 %v5733_v37, %s4783_s25 }
 0x2bb   : > { %v5737_v52 = vpop.permute.xlu0 %1754 }
 0x2bc   : > { %v5746_v40 = vpop.permute.xlu1 %1869 }
 0x2bd   : > { %2668 = vrot.lane.b32.xlu0 %v2627_v43, %s4783_s25  ;;  %6897 = vst [vmem:[#allocation63_spill] sm:$0xff] %v5746_v40  ;;  %v2629_v43 = vld [vmem:[#allocation2 + $0x8c] sm:$0xf] }
 0x2be   : > { %2228 = vrot.lane.b32.xlu1 %v2183_v54, %s4789_s6 }
 0x2bf   : > { %v5749_v12 = vpop.permute.xlu0 %1980 }
 0x2c0   : > { %6898 = vst [vmem:[#allocation64_spill] sm:$0xff] %v5749_v12  ;;  %v5754_v14 = vpop.permute.xlu1 %1305 }
 0x2c1   : > { %2222 = vrot.lane.b32.xlu0 %v5733_v37, %s4789_s6 }
 0x2c2   : > { %2674 = vrot.lane.b32.xlu1 %v5756_v27, %s4783_s25 }
 0x2c3   : > { %v5758_v21 = vpop.permute.xlu0 %2093 }
 0x2c4   : > { %6900 = vst [vmem:[#allocation66_spill] sm:$0xff] %v5758_v21  ;;  %v5763_v62 = vpop.permute.xlu1 %1419  ;;  %v2631_v21 = vld [vmem:[#allocation2 + $0xa4] sm:$0xf] }
 0x2c5   : > { %2672 = vrot.lane.b32.xlu0 %v2629_v43, %s4783_s25  ;;  %6901 = vst [vmem:[#allocation67_spill] sm:$0xff] %v5763_v62  ;;  %v2185_v62 = vld [vmem:[#allocation2 + $0xbc] sm:$0xf] }
 0x2c6   : > { %2562 = vrot.lane.b32.xlu1 %v5756_v27, %s4790_s7 }
 0x2c7   : > { %v5765_v40 = vpop.permute.xlu0 %1867 }
 0x2c8   : > { %6902 = vst [vmem:[#allocation68_spill] sm:$0xff] %v5765_v40  ;;  %v5771_v54 = vpop.permute.xlu1 %1532 }
 0x2c9   : > { %2226 = vrot.lane.b32.xlu0 %v5756_v27, %s4789_s6  ;;  %6903 = vst [vmem:[#allocation69_spill] sm:$0xff] %v5771_v54  ;;  %v5786_v54 = vld [vmem:[#allocation2 + $0xb4] sm:$0xff] }
 0x2ca   : > { %2450 = vrot.lane.b32.xlu1 %v5756_v27, %s4787_s29  ;;  %6906 = vst [vmem:[#allocation72_spill] sm:$0xff] %v5786_v54  ;;  %v3250_v27 = vcombine.high %v3066_v39, %v3066_v39 }
 0x2cb   : > { %v5773_v12 = vpop.permute.xlu0 %1307 }
 0x2cc   : > { %v5778_v43 = vpop.permute.xlu1 %1645 }
 0x2cd   : > { %2676 = vrot.lane.b32.xlu0 %v2631_v21, %s4783_s25  ;;  %6904 = vst [vmem:[#allocation70_spill] sm:$0xff] %v5778_v43  ;;  %v2407_v21 = vld [vmem:[#allocation2 + $0xa4] sm:$0xf] }
 0x2ce   : > { %2232 = vrot.lane.b32.xlu1 %v2185_v62, %s4789_s6 }
 0x2cf   : > { %v5780_v40 = vpop.permute.xlu0 %1421 }
 0x2d0   : > { %6905 = vst [vmem:[#allocation71_spill] sm:$0xff] %v5780_v40  ;;  %v5784_v10 = vpop.permute.xlu1 %1760  ;;  %v5795_v40 = vrot.slane %v3250_v27, %v3256_v58  ;;  %v2633_v58 = vld [vmem:[#allocation2 + $0xbc] sm:$0xf] }
 0x2d1   : > { %2564 = vrot.lane.b32.xlu0 %v2519_v42, %s4790_s7 }
 0x2d2   : > { %2678 = vrot.lane.b32.xlu1 %v5786_v54, %s4783_s25  ;;  %6909 = vst [vmem:[#allocation75_spill] sm:$0xff] %v5795_v40  ;;  %v5803_v42 = vcombine.high %v5795_v40, %v5795_v40  ;;  %v2521_v40 = vld [vmem:[#allocation2 + $0xbc] sm:$0xf] }
 0x2d3   : > { %v5788_v61 = vpop.permute.xlu0 %1534 }
 0x2d4   : > { %6907 = vst [vmem:[#allocation73_spill] sm:$0xff] %v5788_v61  ;;  %v5793_v43 = vpop.permute.xlu1 %1986  ;;  %6911 = vst [vmem:[#allocation77_spill] sm:$0xff] %v5803_v42  ;;  %4075 = vmatprep.mubr.bf16.mxu0 %v5803_v42  ;;  %v1314_v42 = vrot.slane %v5409_v28, 4  ;;  %v1324_v28 = vrot.slane %v5700_v18, 4 }
 0x2d5   : > { %2452 = vrot.lane.b32.xlu0 %v2407_v21, %s4787_s29  ;;  %6908 = vst [vmem:[#allocation74_spill] sm:$0xff] %v5793_v43 }
 0x2d6   : > { %2566 = vrot.lane.b32.xlu1 %v5786_v54, %s4790_s7 }
 0x2d7   : > { %v5797_v62 = vpop.permute.xlu0 %1647 }
 0x2d8   : > { %6910 = vst [vmem:[#allocation76_spill] sm:$0xff] %v5797_v62  ;;  %v5807_v20 = vpop.permute.xlu1 %2099 }
 0x2d9   : > { %2230 = vrot.lane.b32.xlu0 %v5786_v54, %s4789_s6  ;;  %6912 = vst [vmem:[#allocation78_spill] sm:$0xff] %v5807_v20 }
 0x2da   : > { %2454 = vrot.lane.b32.xlu1 %v5786_v54, %s4787_s29  ;;  %v2409_v54 = vld [vmem:[#allocation2 + $0xbc] sm:$0xf] }
 0x2db   : > { %v5810_v39 = vpop.permute.xlu0 %1758 }
 0x2dc   : > { %v5815_v27 = vpop.permute.xlu1 %1873 }
 0x2dd   : > { %2680 = vrot.lane.b32.xlu0 %v2633_v58, %s4783_s25  ;;  %6913 = vst [vmem:[#allocation79_spill] sm:$0xff] %v5815_v27  ;;  %v1313_v58 = vrot.slane %v5398_v7, 4 }
 0x2de   : > { %2554 = vrot.lane.b32.xlu1 %v5714_v35, %s4790_s7 }
 0x2df   : > { %v5817_v21 = vpop.permute.xlu0 %1984  ;;  %v1330_v62 = vsel %vm397_vm13, %v1313_v58, %v1314_v42  ;;  %v1653_v42 = vrot.slane %v5414_v8, 4 }
 0x2e0   : > { %6914 = vst [vmem:[#allocation80_spill] sm:$0xff] %v5817_v21  ;;  %v1310_v20 = vpop.permute.xlu1 %1309  ;;  %v5831_v21 = vld [vmem:[#allocation2 + $0x90] sm:$0xff]  ;;  %v5853_v18 = vsel %vm251_vm9, %v5398_v7, %v1330_v62 }
 0x2e1   : > { %2568 = vrot.lane.b32.xlu0 %v2521_v40, %s4790_s7  ;;  %v1428_v40 = vrot.slane %v5416_v6, 4  ;;  %v1327_v58 = vrot.slane %v1310_v20, 4 }
 0x2e2   : > { %2558 = vrot.lane.b32.xlu1 %v5733_v37, %s4790_s7 }
 0x2e3   : > { %v5823_v43 = vpop.permute.xlu0 %2097 }
 0x2e4   : > { %6915 = vst [vmem:[#allocation81_spill] sm:$0xff] %v5823_v43  ;;  %v5829_v27 = vpop.permute.xlu1 %1423  ;;  %v1326_v43 = vrot.slane %v5773_v12, 4  ;;  %v1322_v12 = vrot.slane %v5635_v56, 4 }
 0x2e5   : > { %2456 = vrot.lane.b32.xlu0 %v2409_v54, %s4787_s29  ;;  %6916 = vst [vmem:[#allocation82_spill] sm:$0xff] %v5829_v27  ;;  %v1427_v27 = vrot.slane %v5402_v25, 4  ;;  %v1323_v54 = vrot.slane %v5680_v46, 4 }
 0x2e6   : > { %2442 = vrot.lane.b32.xlu1 %v5714_v35, %s4787_s29 }
 0x2e7   : > { %v5835_v61 = vpop.permute.xlu0 %1871  ;;  %v1443_v35 = vsel %vm397_vm13, %v1427_v27, %v1428_v40  ;;  %v1341_v7 = vsel %vm397_vm13, %v1323_v54, %v1324_v28  ;;  %v1767_v27 = vrot.slane %v5439_v33, 4  ;;  %v1319_v28 = vrot.slane %v5562_v45, 4 }
 0x2e8   : > { %6917 = vst [vmem:[#allocation83_spill] sm:$0xff] %v5835_v61  ;;  %v5847_v6 = vpop.permute.xlu1 %1536  ;;  %v1325_v61 = vrot.slane %v5754_v14, 4  ;;  %v1342_v33 = vsel %vm251_vm9, %v5680_v46, %v1341_v7  ;;  %v1766_v46 = vrot.slane %v5422_v59, 4 }
 0x2e9   : > { %2556 = vrot.lane.b32.xlu0 %v2515_v0, %s4790_s7  ;;  %6918 = vst [vmem:[#allocation84_spill] sm:$0xff] %v5847_v6  ;;  %v1320_v0 = vrot.slane %v5577_v60, 4  ;;  %v1321_v6 = vrot.slane %v5618_v51, 4  ;;  %v1316_v60 = vrot.slane %v5465_v1, 4 }
 0x2ea   : > { %2446 = vrot.lane.b32.xlu1 %v5733_v37, %s4787_s29  ;;  %v1343_v56 = vsel %vm397_vm13, %v1325_v61, %v1326_v43  ;;  %v1318_v37 = vrot.slane %v5521_v9, 4  ;;  %v1317_v9 = vrot.slane %v5506_v22, 4 }
 0x2eb   : > { %v1312_v11 = vpop.permute.xlu0 %1311  ;;  %v1344_v1 = vsel %vm251_vm9, %v5754_v14, %v1343_v56  ;;  %v1337_v54 = vsel %vm397_vm13, %v1319_v28, %v1320_v0  ;;  %v1333_v14 = vsel %vm397_vm13, %v1315_v31, %v1316_v60  ;;  %v5899_v56 = vsel %vm270_vm8, %v5402_v25, %v1443_v35 }
 0x2ec   : > { %v1328_v62 = vrot.slane %v1312_v11, 4  ;;  %v5871_v40 = vpop.permute.xlu1 %1649  ;;  %v1339_v11 = vsel %vm397_vm13, %v1321_v6, %v1322_v12  ;;  %v1993_v0 = vrot.slane %v5437_v15, 4  ;;  %v1335_v28 = vsel %vm397_vm13, %v1317_v9, %v1318_v37  ;;  %v2405_v37 = vld [vmem:[#allocation2 + $0x8c] sm:$0xf]  ;;  %v2511_v9 = vld [vmem:[#allocation2 + $0x44] sm:$0xf] }
 0x2ed   : > { %2560 = vrot.lane.b32.xlu0 %v2517_v13, %s4790_s7  ;;  %v1782_v60 = vsel %vm397_vm13, %v1766_v46, %v1767_v27  ;;  %v1334_v35 = vsel %vm251_vm9, %v5450_v38, %v1333_v14  ;;  %v1336_v27 = vsel %vm251_vm9, %v5506_v22, %v1335_v28  ;;  %v1542_v22 = vrot.slane %v5463_v26, 4 }
 0x2ee   : > { %v1345_v61 = vsel %vm397_vm13, %v1327_v58, %v1328_v62  ;;  %2546 = vrot.lane.b32.xlu1 %v5682_v44, %s4790_s7  ;;  %v2403_v58 = vld [vmem:[#allocation2 + $0x74] sm:$0xf]  ;;  %v1556_v62 = vsel %vm397_vm13, %v1540_v30, %v1541_v57  ;;  %v1669_v57 = vsel %vm397_vm13, %v1653_v42, %v1654_v16  ;;  %v2008_v15 = vsel %vm397_vm13, %v1992_v29, %v1993_v0 }
 0x2ef   : > { %v1346_v13 = vsel %vm251_vm9, %v1310_v20, %v1345_v61  ;;  %v5883_v43 = vpop.permute.xlu0 %1425  ;;  %v1340_v20 = vsel %vm251_vm9, %v5618_v51, %v1339_v11  ;;  %v1338_v51 = vsel %vm251_vm9, %v5562_v45, %v1337_v54  ;;  %v5913_v25 = vsel %vm289_vm7, %v5407_v23, %v1556_v62 }
 0x2f0   : > { %v4413_v6 = vcombine.low %v1344_v1, %v1346_v13  ;;  %v4414_v12 = vcombine.high %v1344_v1, %v1346_v13  ;;  %v5895_v7 = vpop.permute.xlu1 %1764  ;;  %v4410_v30 = vcombine.high %v1340_v20, %v1342_v33  ;;  %v1430_v16 = vrot.slane %v5472_v47, 4 }
 0x2f1   : > { %2444 = vrot.lane.b32.xlu0 %v2403_v58, %s4787_s29  ;;  %v1543_v45 = vrot.slane %v5480_v49, 4  ;;  %v1656_v42 = vrot.slane %v5488_v36, 4  ;;  %v4409_v61 = vcombine.low %v1340_v20, %v1342_v33  ;;  %v5928_v29 = vsel %vm306_vm11, %v5414_v8, %v1669_v57 }
 0x2f2   : > { %4002 = vmatprep.subr.bf16.mxu1 %v4414_v12  ;;  %2550 = vrot.lane.b32.xlu1 %v5698_v4, %s4790_s7  ;;  %v5932_v38 = vsel %vm325_vm1, %v5422_v59, %v1782_v60  ;;  %v1429_v47 = vrot.slane %v5456_v50, 4  ;;  %v4406_v49 = vcombine.high %v1336_v27, %v1338_v51  ;;  %v4401_v36 = vcombine.low %v5853_v18, %v1334_v35 }
 0x2f3   : > { %v5907_v11 = vpop.permute.xlu0 %1538  ;;  %4003 = vmatpush1.bf16.msra.mxu1 %v4413_v6  ;;  %v1655_v31 = vrot.slane %v5470_v5, 4  ;;  %v5944_v8 = vsel %vm363_vm3, %v5446_v24, %v2008_v15  ;;  %v1776_v1 = vrot.slane %v5737_v52, 4  ;;  %v1778_v13 = vrot.slane %v5810_v39, 4 }
 0x2f4   : > { %4004 = vmatprep.subr.bf16.mxu1 %v4410_v30  ;;  %v5924_v23 = vpop.permute.xlu1 %1990  ;;  %v1446_v59 = vsel %vm397_vm13, %v1429_v47, %v1430_v16  ;;  %v4402_v54 = vcombine.high %v5853_v18, %v1334_v35  ;;  %v1559_v6 = vsel %vm397_vm13, %v1542_v22, %v1543_v45  ;;  %v4405_v12 = vcombine.low %v1336_v27, %v1338_v51  ;;  %v6919_v47 = vld [vmem:[#allocation38_spill] sm:$0xff] }
 0x2f5   : > { %2448 = vrot.lane.b32.xlu0 %v2405_v37, %s4787_s29  ;;  %v1672_v58 = vsel %vm397_vm13, %v1655_v31, %v1656_v42  ;;  %v1772_v62 = vrot.slane %v5607_v63, 4  ;;  %v1774_v46 = vrot.slane %v5669_v19, 4  ;;  %v1777_v14 = vrot.slane %v5712_v17, 4  ;;  %v6921_v31 = vld [vmem:[#allocation8_spill] sm:$0xff] }
 0x2f6   : > { %2434 = vrot.lane.b32.xlu1 %v5682_v44, %s4787_s29  ;;  %v1769_v44 = vrot.slane %v5495_v53, 4  ;;  %v1779_v20 = vrot.slane %v5784_v10, 4  ;;  %v5962_v18 = vsel %vm270_vm8, %v5456_v50, %v1446_v59  ;;  %v1768_v0 = vrot.slane %v5478_v48, 4  ;;  %v2513_v50 = vld [vmem:[#allocation2 + $0x5c] sm:$0xf] }
 0x2f7   : > { %v5938_v33 = vpop.permute.xlu0 %1651  ;;  %4005 = vmatpush1.bf16.msra.mxu1 %v4409_v61  ;;  %v1773_v53 = vrot.slane %v5590_v34, 4  ;;  %v1775_v28 = vrot.slane %v5650_v55, 4  ;;  %v1793_v57 = vsel %vm397_vm13, %v1776_v1, %v1777_v14  ;;  %v1781_v60 = vrot.slane %v5895_v7, 4 }
 0x2f8   : > { %4006 = vmatprep.subr.bf16.mxu1 %v4406_v49  ;;  %v5954_v24 = vpop.permute.xlu1 %2103  ;;  %v1795_v17 = vsel %vm397_vm13, %v1778_v13, %v1779_v20  ;;  %v5974_v51 = vsel %vm289_vm7, %v5463_v26, %v1559_v6  ;;  %v5978_v34 = vsel %vm306_vm11, %v5470_v5, %v1672_v58  ;;  %v1785_v55 = vsel %vm397_vm13, %v1768_v0, %v1769_v44  ;;  %v6943_v44 = vld [vmem:[#allocation39_spill] sm:$0xff] }
 0x2f9   : > { %2548 = vrot.lane.b32.xlu0 %v2511_v9, %s4790_s7  ;;  %v1994_v7 = vrot.slane %v5502_v41, 4  ;;  %v1789_v35 = vsel %vm397_vm13, %v1772_v62, %v1773_v53  ;;  %v1791_v16 = vsel %vm397_vm13, %v1774_v46, %v1775_v28  ;;  %v1771_v37 = vrot.slane %v5534_v2, 4  ;;  %v2401_v28 = vld [vmem:[#allocation2 + $0x5c] sm:$0xf] }
 0x2fa   : > { %2438 = vrot.lane.b32.xlu1 %v5698_v4, %s4787_s29  ;;  %v1770_v4 = vrot.slane %v5551_v32, 4  ;;  %v1796_v45 = vsel %vm325_vm1, %v5810_v39, %v1795_v17  ;;  %v1794_v27 = vsel %vm325_vm1, %v5737_v52, %v1793_v57  ;;  %v6003_v2 = vsel %vm325_vm1, %v5478_v48, %v1785_v55  ;;  %v2399_v39 = vld [vmem:[#allocation2 + $0x44] sm:$0xf]  ;;  %v6924_v57 = vld [vmem:[#allocation17_spill] sm:$0xff]  ;;  %v6942_v9 = vld [vmem:[#allocation31_spill] sm:$0xff] }
 0x2fb   : > { %v1763_v30 = vpop.permute.xlu0 %1762  ;;  %4007 = vmatpush1.bf16.msra.mxu1 %v4405_v12  ;;  %v6920_v49 = vcombine.high %v5831_v21, %v6919_v47  ;;  %v1995_v59 = vrot.slane %v6921_v31, 4  ;;  %v1792_v48 = vsel %vm325_vm1, %v5669_v19, %v1791_v16  ;;  %v1790_v58 = vsel %vm325_vm1, %v5607_v63, %v1789_v35  ;;  %v6923_v63 = vld [vmem:[#allocation14_spill] sm:$0xff]  ;;  %v6929_v35 = vld [vmem:[#allocation76_spill] sm:$0xff]  ;;  %v6945_v12 = vld [vmem:[#allocation27_spill] sm:$0xff] }
 0x2fc   : > { %v1780_v10 = vrot.slane %v1763_v30, 4  ;;  %4008 = vmatprep.subr.bf16.mxu1 %v4402_v54  ;;  %v5983_v15 = vpop.permute.xlu1 %1877  ;;  %v1787_v1 = vsel %vm397_vm13, %v1770_v4, %v1771_v37  ;;  %v4756_v54 = vld [vmem:[#allocation2 + $0x64] ss:$24 sps:$4 sm:$0xff]   ;;  %v4474_v6 = vcombine.high %v1792_v48, %v1794_v27  ;;  %v6922_v46 = vcombine.low %v5831_v21, %v6919_v47  ;;  %v4757_v52 = vld [vmem:[#allocation2 + $0x30] ss:$24 sps:$4 sm:$0xff]  }
 0x2fd   : > { %2552 = vrot.lane.b32.xlu0 %v2513_v50, %s4790_s7  ;;  %v6026_v62 = vsel %vm397_vm13, %v1994_v7, %v1995_v59  ;;  %v4466_v14 = vcombine.high %v5932_v38, %v6003_v2  ;;  %v1544_v20 = vrot.slane %v6923_v63, 4  ;;  %v1555_v0 = vrot.slane %v5907_v11, 4  ;;  %v6925_v21 = vld [vmem:[#allocation15_spill] sm:$0xff]  ;;  %v6926_v4 = vld [vmem:[#allocation44_spill] sm:$0xff] }
 0x2fe   : > { %v1797_v26 = vsel %vm397_vm13, %v1780_v10, %v1781_v60  ;;  %2538 = vrot.lane.b32.xlu1 %v5642_v3, %s4790_s7  ;;  %v1668_v53 = vrot.slane %v5938_v33, 4  ;;  %v1545_v17 = vrot.slane %v6924_v57, 4  ;;  %v4754_v60 = vld [vmem:[#allocation2 + $0x60] ss:$24 sps:$4 sm:$0xff]   ;;  %v4473_v50 = vcombine.low %v1792_v48, %v1794_v27  ;;  %v6928_v33 = vld [vmem:[#allocation73_spill] sm:$0xff] }
 0x2ff   : > { %v5990_v5 = vpop.permute.xlu0 %1988  ;;  %4009 = vmatpush1.bf16.msra.mxu1 %v4401_v36  ;;  %v1798_v42 = vsel %vm325_vm1, %v1763_v30, %v1797_v26  ;;  %v1788_v30 = vsel %vm325_vm1, %v5551_v32, %v1787_v1  ;;  %v1553_v7 = vrot.slane %v6928_v33, 4  ;;  %v1666_v16 = vrot.slane %v6929_v35, 4  ;;  %v6930_v26 = vld [vmem:[#allocation84_spill] sm:$0xff]  ;;  %v6932_v27 = vld [vmem:[#allocation29_spill] sm:$0xff]  ;;  %v2507_v33 = vld [vmem:[#allocation2 + $0x14] sm:$0xf] }
 0x300   : > { %4010 = vmatprep.subr.bf16.mxu1 %v6920_v49  ;;  %v4477_v36 = vcombine.low %v1796_v45, %v1798_v42  ;;  %v4478_v22 = vcombine.high %v1796_v45, %v1798_v42  ;;  %v6015_v13 = vpop.permute.xlu1 %2202  ;;  %v4470_v55 = vcombine.high %v1788_v30, %v1790_v58  ;;  %v1554_v32 = vrot.slane %v6930_v26, 4  ;;  %v4759_v45 = vld [vmem:[#allocation2 + $0x34] ss:$24 sps:$4 sm:$0xff]   ;;  %v6931_v42 = vld [vmem:[#allocation19_spill] sm:$0xff] }
 0x301   : > { %2436 = vrot.lane.b32.xlu0 %v2399_v39, %s4787_s29  ;;  %v1667_v37 = vrot.slane %v5871_v40, 4  ;;  %v1658_v47 = vrot.slane %v6931_v42, 4  ;;  %v1547_v49 = vrot.slane %v6932_v27, 4  ;;  %v6933_v39 = vld [vmem:[#allocation56_spill] sm:$0xff]  ;;  %v6935_v1 = vld [vmem:[#allocation69_spill] sm:$0xff]  ;;  %v6937_v35 = vld [vmem:[#allocation26_spill] sm:$0xff]  ;;  %v6948_v57 = vcombine.low %v5932_v38, %v6003_v2 }
 0x302   : > { %4043 = vmatprep.subr.bf16.mxu0 %v4478_v22  ;;  %2542 = vrot.lane.b32.xlu1 %v6926_v4, %s4790_s7  ;;  %v6934_v22 = vld [vmem:[#allocation58_spill] sm:$0xff]  ;;  %v1552_v48 = vrot.slane %v6935_v1, 4  ;;  %v1546_v42 = vrot.slane %v6937_v35, 4 }
 0x303   : > { %v6028_v19 = vpop.permute.xlu0 %2101  ;;  %4011 = vmatpush1.bf16.msra.mxu1 %v6922_v46  ;;  %4044 = vmatpush1.bf16.msra.mxu0 %v4477_v36  ;;  %v1551_v36 = vrot.slane %v6933_v39, 4  ;;  %v1664_v31 = vrot.slane %v6934_v22, 4  ;;  %v1571_v46 = vsel %vm397_vm13, %v1554_v32, %v1555_v0  ;;  %v6938_v27 = vld [vmem:[#allocation42_spill] sm:$0xff]  ;;  %v6939_v22 = vld [vmem:[#allocation45_spill] sm:$0xff]  ;;  %v6940_v0 = vld [vmem:[#allocation52_spill] sm:$0xff] }
 0x304   : > { %4012 = vmatprep.subr.bf16.mxu1 %v4756_v54  ;;  %4045 = vmatprep.subr.bf16.mxu0 %v4474_v6  ;;  %v6045_v11 = vpop.permute.xlu1 %2650  ;;  %v6936_v54 = vld [vmem:[#allocation70_spill] sm:$0xff]  ;;  %v1549_v39 = vrot.slane %v6938_v27, 4  ;;  %v1662_v61 = vrot.slane %v6939_v22, 4  ;;  %v6941_v32 = vld [vmem:[#allocation53_spill] sm:$0xff]  ;;  %v4762_v27 = vld [vmem:[#allocation2 + $0x4] ss:$24 sps:$4 sm:$0xff]   ;;  %v1563_v10 = vsel %vm397_vm13, %v1546_v42, %v1547_v49 }
 0x305   : > { %2440 = vrot.lane.b32.xlu0 %v2401_v28, %s4787_s29  ;;  %6927 = vst [vmem:[#allocation38_spill] sm:$0xff] %v6045_v11  ;;  %v1665_v6 = vrot.slane %v6936_v54, 4  ;;  %v1684_v28 = vsel %vm397_vm13, %v1667_v37, %v1668_v53  ;;  %v1550_v53 = vrot.slane %v6940_v0, 4  ;;  %v1569_v37 = vsel %vm397_vm13, %v1552_v48, %v1553_v7  ;;  %v6944_v7 = vld [vmem:[#allocation40_spill] sm:$0xff]  ;;  %v6994_v11 = vld [vmem:[#allocation51_spill] sm:$0xff] }
 0x306   : > { %2426 = vrot.lane.b32.xlu1 %v5642_v3, %s4787_s29  ;;  %v1660_v22 = vrot.slane %v6942_v9, 4  ;;  %v1685_v3 = vsel %vm306_vm11, %v5871_v40, %v1684_v28  ;;  %v1661_v48 = vrot.slane %v6944_v7, 4  ;;  %v1570_v40 = vsel %vm289_vm7, %v6935_v1, %v1569_v37  ;;  %v4760_v49 = vld [vmem:[#allocation2] ss:$24 sps:$4 sm:$0xff]  }
 0x307   : > { %v6055_v59 = vpop.permute.xlu0 %1875  ;;  %4013 = vmatpush1.bf16.msra.mxu1 %v4754_v60  ;;  %4046 = vmatpush1.bf16.msra.mxu0 %v4473_v50  ;;  %v4469_v60 = vcombine.low %v1788_v30, %v1790_v58  ;;  %v1548_v58 = vrot.slane %v6943_v44, 4  ;;  %v1572_v30 = vsel %vm289_vm7, %v6930_v26, %v1571_v46  ;;  %v1659_v26 = vrot.slane %v6945_v12, 4  ;;  %v6947_v42 = vld [vmem:[#allocation16_spill] sm:$0xff] }
 0x308   : > { %4014 = vmatprep.subr.bf16.mxu1 %v4759_v45  ;;  %4047 = vmatprep.subr.bf16.mxu0 %v4470_v55  ;;  %v6067_v50 = vpop.permute.xlu1 %2206  ;;  %v1663_v55 = vrot.slane %v6941_v32, 4  ;;  %v1682_v45 = vsel %vm397_vm13, %v1665_v6, %v1666_v16  ;;  %v1567_v16 = vsel %vm397_vm13, %v1550_v53, %v1551_v36  ;;  %v2509_v6 = vld [vmem:[#allocation2 + $0x2c] sm:$0xf]  ;;  %v4446_v1 = vcombine.high %v1570_v40, %v1572_v30 }
 0x309   : > { %2540 = vrot.lane.b32.xlu0 %v2507_v33, %s4790_s7  ;;  %v1565_v46 = vsel %vm397_vm13, %v1548_v58, %v1549_v39  ;;  %v1676_v39 = vsel %vm397_vm13, %v1659_v26, %v1660_v22  ;;  %v4445_v2 = vcombine.low %v1570_v40, %v1572_v30  ;;  %v4450_v22 = vcombine.high %v5928_v29, %v5978_v34 }
 0x30a   : > { %v1680_v9 = vsel %vm397_vm13, %v1663_v55, %v1664_v31  ;;  %2430 = vrot.lane.b32.xlu1 %v6926_v4, %s4787_s29  ;;  %v1678_v31 = vsel %vm397_vm13, %v1661_v48, %v1662_v61  ;;  %v6949_v61 = vrot.slane %v6925_v21, 4  ;;  %v6950_v55 = vld [vmem:[#allocation12_spill] sm:$0xff]  ;;  %v1442_v48 = vrot.slane %v5883_v43, 4  ;;  %v6954_v43 = vld [vmem:[#allocation71_spill] sm:$0xff] }
 0x30b   : > { %v6079_v33 = vpop.permute.xlu0 %2204  ;;  %4015 = vmatpush1.bf16.msra.mxu1 %v4757_v52  ;;  %4048 = vmatpush1.bf16.msra.mxu0 %v4469_v60  ;;  %v1683_v52 = vsel %vm306_vm11, %v6936_v54, %v1682_v45  ;;  %v1432_v54 = vrot.slane %v6947_v42, 4  ;;  %v1568_v60 = vsel %vm289_vm7, %v6940_v0, %v1567_v16  ;;  %v1681_v4 = vsel %vm306_vm11, %v6941_v32, %v1680_v9  ;;  %v2395_v32 = vld [vmem:[#allocation2 + $0x14] sm:$0xf]  ;;  %v2397_v9 = vld [vmem:[#allocation2 + $0x2c] sm:$0xf]  ;;  %v6957_v42 = vld [vmem:[#allocation28_spill] sm:$0xff] }
 0x30c   : > { %4016 = vmatprep.subr.bf16.mxu1 %v4762_v27  ;;  %4049 = vmatprep.subr.bf16.mxu0 %v4466_v14  ;;  %v6094_v36 = vpop.permute.xlu1 %2654  ;;  %v1561_v14 = vsel %vm397_vm13, %v1544_v20, %v1545_v17  ;;  %v4462_v28 = vcombine.high %v1683_v52, %v1685_v3  ;;  %v1674_v20 = vsel %vm397_vm13, %v6949_v61, %v1658_v47  ;;  %v1431_v37 = vrot.slane %v6950_v55, 4  ;;  %v6951_v47 = vld [vmem:[#allocation65_spill] sm:$0xff]  ;;  %v6960_v61 = vld [vmem:[#allocation64_spill] sm:$0xff] }
 0x30d   : > { %2544 = vrot.lane.b32.xlu0 %v2509_v6, %s4790_s7  ;;  %6946 = vst [vmem:[#allocation8_spill] sm:$0xff] %v6094_v36  ;;  %v6118_v17 = vsel %vm289_vm7, %v6937_v35, %v1563_v10  ;;  %v1566_v0 = vsel %vm289_vm7, %v6943_v44, %v1565_v46  ;;  %v1679_v38 = vsel %vm306_vm11, %v6944_v7, %v1678_v31  ;;  %v2006_v16 = vrot.slane %v5990_v5, 4  ;;  %v6952_v6 = vld [vmem:[#allocation22_spill] sm:$0xff] }
 0x30e   : > { %v4461_v45 = vcombine.low %v1683_v52, %v1685_v3  ;;  %2898 = vrot.lane.b32.xlu1 %v6951_v47, %s4785_s27  ;;  %v1677_v44 = vsel %vm306_vm11, %v6945_v12, %v1676_v39  ;;  %v4442_v35 = vcombine.high %v1566_v0, %v1568_v60  ;;  %v4458_v27 = vcombine.high %v1679_v38, %v1681_v4  ;;  %v6956_v31 = vld [vmem:[#allocation82_spill] sm:$0xff]  ;;  %v6958_v39 = vld [vmem:[#allocation24_spill] sm:$0xff] }
 0x30f   : > { %v6108_v53 = vpop.permute.xlu0 %2652  ;;  %4050 = vmatpush1.bf16.msra.mxu0 %v6948_v57  ;;  %4017 = vmatpush1.bf16.msra.mxu1 %v4760_v49  ;;  %v6135_v58 = vsel %vm397_vm13, %v1431_v37, %v1432_v54  ;;  %v1562_v30 = vsel %vm289_vm7, %v6923_v63, %v1561_v14  ;;  %v6144_v7 = vsel %vm363_vm3, %v5502_v41, %v6026_v62  ;;  %v6953_v62 = vld [vmem:[#allocation72_spill] sm:$0xff]  ;;  %v1440_v52 = vrot.slane %v6954_v43, 4  ;;  %v6964_v43 = vld [vmem:[#allocation41_spill] sm:$0xff] }
 0x310   : > { %4018 = vmatprep.subr.bf16.mxu1 %v4446_v1  ;;  %4051 = vmatprep.subr.bf16.mxu0 %v4462_v28  ;;  %v6128_v10 = vpop.permute.xlu1 %2212  ;;  %v1675_v12 = vsel %vm306_vm11, %v6925_v21, %v1674_v20  ;;  %v4438_v63 = vcombine.high %v1562_v30, %v6118_v17  ;;  %v4441_v46 = vcombine.low %v1566_v0, %v1568_v60  ;;  %v6955_v49 = vld [vmem:[#allocation80_spill] sm:$0xff]  ;;  %v1441_v1 = vrot.slane %v6956_v31, 4 }
 0x311   : > { %2428 = vrot.lane.b32.xlu0 %v2395_v32, %s4787_s29  ;;  %v4457_v40 = vcombine.low %v1679_v38, %v1681_v4  ;;  %v4454_v41 = vcombine.high %v1675_v12, %v1677_v44  ;;  %v2004_v14 = vrot.slane %v6955_v49, 4  ;;  %v2007_v28 = vrot.slane %v5924_v23, 4  ;;  %v6959_v4 = vld [vmem:[#allocation54_spill] sm:$0xff]  ;;  %v6962_v32 = vld [vmem:[#allocation67_spill] sm:$0xff] }
 0x312   : > { %2902 = vrot.lane.b32.xlu1 %v6953_v62, %s4785_s27  ;;  %v1434_v54 = vrot.slane %v6957_v42, 4  ;;  %v1433_v60 = vrot.slane %v6958_v39, 4  ;;  %v1438_v57 = vrot.slane %v6959_v4, 4  ;;  %v2002_v20 = vrot.slane %v6960_v61, 4  ;;  %v6963_v38 = vld [vmem:[#allocation74_spill] sm:$0xff]  ;;  %v6965_v4 = vld [vmem:[#allocation48_spill] sm:$0xff] }
 0x313   : > { %v6139_v3 = vpop.permute.xlu0 %2208  ;;  %4052 = vmatpush1.bf16.msra.mxu0 %v4461_v45  ;;  %4019 = vmatpush2.bf16.msra.mxu1 %v4445_v2  ;;  %v1439_v37 = vrot.slane %v6962_v32, 4  ;;  %v2005_v2 = vrot.slane %v6963_v38, 4  ;;  %v1458_v45 = vsel %vm397_vm13, %v1441_v1, %v1442_v48  ;;  %v2023_v23 = vsel %vm397_vm13, %v2006_v16, %v2007_v28  ;;  %v6966_v48 = vld [vmem:[#allocation50_spill] sm:$0xff]  ;;  %v6967_v16 = vld [vmem:[#allocation57_spill] sm:$0xff] }
 0x314   : > { %4020 = vmatprep.subr.bf16.mxu1 %v4442_v35  ;;  %4053 = vmatprep.subr.bf16.mxu0 %v4458_v27  ;;  %v6155_v21 = vpop.permute.xlu1 %2658  ;;  %v2855_v35 = vld [vmem:[#allocation2 + $0xa4] sm:$0xf]  ;;  %v4437_v27 = vcombine.low %v1562_v30, %v6118_v17  ;;  %v1436_v42 = vrot.slane %v6964_v43, 4  ;;  %v2000_v26 = vrot.slane %v6965_v4, 4  ;;  %v1459_v28 = vsel %vm270_vm8, %v6956_v31, %v1458_v45  ;;  %v6970_v43 = vld [vmem:[#allocation43_spill] sm:$0xff]  ;;  %v6972_v45 = vld [vmem:[#allocation30_spill] sm:$0xff] }
 0x315   : > { %2432 = vrot.lane.b32.xlu0 %v2397_v9, %s4787_s29  ;;  %v4453_v9 = vcombine.low %v1675_v12, %v1677_v44  ;;  %v2021_v17 = vsel %vm397_vm13, %v2004_v14, %v2005_v2  ;;  %v6968_v44 = vld [vmem:[#allocation34_spill] sm:$0xff]  ;;  %v6969_v12 = vld [vmem:[#allocation36_spill] sm:$0xff]  ;;  %v6971_v2 = vcombine.high %v5913_v25, %v5974_v51  ;;  %v2857_v31 = vld [vmem:[#allocation2 + $0xbc] sm:$0xf] }
 0x316   : > { %2338 = vrot.lane.b32.xlu1 %v6951_v47, %s4788_s30  ;;  %v1998_v30 = vrot.slane %v6968_v44, 4  ;;  %v1435_v1 = vrot.slane %v6969_v12, 4  ;;  %v2024_v47 = vsel %vm363_vm3, %v5990_v5, %v2023_v23 }
 0x317   : > { %v6165_v0 = vpop.permute.xlu0 %2656  ;;  %4054 = vmatpush1.bf16.msra.mxu0 %v4457_v40  ;;  %4021 = vmatpush2.bf16.msra.mxu1 %v4441_v46  ;;  %v1437_v40 = vrot.slane %v6966_v48, 4 }
 0x318   : > { %6961 = vst [vmem:[#allocation14_spill] sm:$0xff] %v6165_v0  ;;  %4022 = vmatprep.subr.bf16.mxu1 %v4438_v63  ;;  %4055 = vmatprep.subr.bf16.mxu0 %v4454_v41  ;;  %v6177_v46 = vpop.permute.xlu1 %2216  ;;  %v2003_v63 = vrot.slane %v6967_v16, 4  ;;  %v1456_v41 = vsel %vm397_vm13, %v1439_v37, %v1440_v52  ;;  %v2001_v52 = vrot.slane %v6970_v43, 4  ;;  %v6992_v16 = vld [vmem:[#allocation79_spill] sm:$0xff]  ;;  %v1887_v0 = vrot.slane %v6994_v11, 4 }
 0x319   : > { %2900 = vrot.lane.b32.xlu0 %v2855_v35, %s4785_s27  ;;  %v1450_v35 = vsel %vm397_vm13, %v1433_v60, %v1434_v54  ;;  %v1454_v14 = vsel %vm397_vm13, %v1437_v40, %v1438_v57  ;;  %v1457_v5 = vsel %vm270_vm8, %v6962_v32, %v1456_v41  ;;  %v2022_v54 = vsel %vm363_vm3, %v6955_v49, %v2021_v17  ;;  %v6973_v57 = vld [vmem:[#allocation18_spill] sm:$0xff] }
 0x31a   : > { %v2019_v37 = vsel %vm397_vm13, %v2002_v20, %v2003_v63  ;;  %2342 = vrot.lane.b32.xlu1 %v6953_v62, %s4788_s30  ;;  %v2017_v20 = vsel %vm397_vm13, %v2000_v26, %v2001_v52  ;;  %v4430_v23 = vcombine.high %v1457_v5, %v1459_v28  ;;  %v4510_v40 = vcombine.high %v2022_v54, %v2024_v47  ;;  %v6978_v17 = vld [vmem:[#allocation6_spill] sm:$0xff] }
 0x31b   : > { %v6187_v38 = vpop.permute.xlu0 %2210  ;;  %4056 = vmatpush1.bf16.msra.mxu0 %v4453_v9  ;;  %4023 = vmatpush2.bf16.msra.mxu1 %v4437_v27  ;;  %v1999_v9 = vrot.slane %v6972_v45, 4  ;;  %v1452_v27 = vsel %vm397_vm13, %v1435_v1, %v1436_v42  ;;  %v6974_v42 = vld [vmem:[#allocation5_spill] sm:$0xff]  ;;  %v1455_v63 = vsel %vm270_vm8, %v6966_v48, %v1454_v14  ;;  %v6976_v62 = vcombine.low %v5928_v29, %v5978_v34 }
 0x31c   : > { %4024 = vmatprep.subr.bf16.mxu1 %v6971_v2  ;;  %4057 = vmatprep.subr.bf16.mxu0 %v4450_v22  ;;  %v6207_v60 = vpop.permute.xlu1 %2662  ;;  %v1997_v22 = vrot.slane %v6973_v57, 4  ;;  %v6977_v49 = vcombine.low %v5913_v25, %v5974_v51  ;;  %v2020_v26 = vsel %vm363_vm3, %v6960_v61, %v2019_v37  ;;  %v6231_v48 = vsel %vm270_vm8, %v6958_v39, %v1450_v35  ;;  %v2295_v25 = vld [vmem:[#allocation2 + $0xa4] sm:$0xf]  ;;  %v6980_v51 = vld [vmem:[#allocation7_spill] sm:$0xff] }
 0x31d   : > { %2904 = vrot.lane.b32.xlu0 %v2857_v31, %s4785_s27  ;;  %v2015_v32 = vsel %vm397_vm13, %v1998_v30, %v1999_v9  ;;  %v6979_v30 = vrot.slane %v6952_v6, 4  ;;  %v1453_v29 = vsel %vm270_vm8, %v6969_v12, %v1452_v27  ;;  %v4429_v52 = vcombine.low %v1457_v5, %v1459_v28  ;;  %v6981_v37 = vld [vmem:[#allocation55_spill] sm:$0xff]  ;;  %v6993_v31 = vld [vmem:[#allocation49_spill] sm:$0xff] }
 0x31e   : > { %v4509_v61 = vcombine.low %v2022_v54, %v2024_v47  ;;  %v2018_v14 = vsel %vm363_vm3, %v6965_v4, %v2017_v20  ;;  %2890 = vrot.lane.b32.xlu1 %v6981_v37, %s4785_s27  ;;  %v4426_v35 = vcombine.high %v1453_v29, %v1455_v63  ;;  %v2016_v12 = vsel %vm363_vm3, %v6968_v44, %v2015_v32  ;;  %v6982_v28 = vld [vmem:[#allocation11_spill] sm:$0xff]  ;;  %v6984_v32 = vld [vmem:[#allocation60_spill] sm:$0xff]  ;;  %v6991_v47 = vld [vmem:[#allocation78_spill] sm:$0xff] }
 0x31f   : > { %v6215_v41 = vpop.permute.xlu0 %2660  ;;  %4058 = vmatpush1.bf16.msra.mxu0 %v6976_v62  ;;  %4025 = vmatpush2.bf16.msra.mxu1 %v6977_v49  ;;  %v2013_v43 = vsel %vm397_vm13, %v6979_v30, %v1997_v22  ;;  %v4506_v2 = vcombine.high %v2018_v14, %v2020_v26  ;;  %v1449_v45 = vsel %vm270_vm8, %v6950_v55, %v6135_v58  ;;  %v2119_v44 = vrot.slane %v6028_v19, 4  ;;  %v2297_v54 = vld [vmem:[#allocation2 + $0xbc] sm:$0xf]  ;;  %v6983_v58 = vld [vmem:[#allocation20_spill] sm:$0xff]  ;;  %v6985_v49 = vld [vmem:[#allocation81_spill] sm:$0xff] }
 0x320   : > { %6975 = vst [vmem:[#allocation17_spill] sm:$0xff] %v6215_v41  ;;  %4026 = vmatprep.subr.bf16.mxu1 %v4430_v23  ;;  %4059 = vmatprep.subr.bf16.mxu0 %v4510_v40  ;;  %v6241_v39 = vpop.permute.xlu1 %2220  ;;  %v4498_v27 = vcombine.high %v5944_v8, %v6144_v7  ;;  %v1893_v5 = vrot.slane %v6055_v59, 4  ;;  %v4422_v57 = vcombine.high %v1449_v45, %v6231_v48  ;;  %v2117_v30 = vrot.slane %v6985_v49, 4  ;;  %v2851_v22 = vld [vmem:[#allocation2 + $0x74] sm:$0xf] }
 0x321   : > { %2340 = vrot.lane.b32.xlu0 %v2295_v25, %s4788_s30  ;;  %v2014_v55 = vsel %vm363_vm3, %v6952_v6, %v2013_v43  ;;  %v4425_v20 = vcombine.low %v1453_v29, %v1455_v63  ;;  %v4505_v23 = vcombine.low %v2018_v14, %v2020_v26  ;;  %v6986_v25 = vld [vmem:[#allocation83_spill] sm:$0xff]  ;;  %v1894_v6 = vrot.slane %v5983_v15, 4  ;;  %v6988_v63 = vld [vmem:[#allocation25_spill] sm:$0xff]  ;;  %v6989_v29 = vld [vmem:[#allocation66_spill] sm:$0xff] }
 0x322   : > { %v4502_v40 = vcombine.high %v2014_v55, %v2016_v12  ;;  %2894 = vrot.lane.b32.xlu1 %v6984_v32, %s4785_s27  ;;  %v6987_v43 = vld [vmem:[#allocation23_spill] sm:$0xff]  ;;  %v2115_v14 = vrot.slane %v6989_v29, 4  ;;  %v2118_v1 = vrot.slane %v6991_v47, 4  ;;  %v1892_v9 = vrot.slane %v6992_v16, 4 }
 0x323   : > { %v6251_v4 = vpop.permute.xlu0 %2214  ;;  %4060 = vmatpush2.bf16.msra.mxu0 %v4509_v61  ;;  %4027 = vmatpush2.bf16.msra.mxu1 %v4429_v52  ;;  %v1891_v52 = vrot.slane %v6986_v25, 4  ;;  %v2120_v61 = vrot.slane %v5954_v24, 4  ;;  %v1910_v15 = vsel %vm397_vm13, %v1893_v5, %v1894_v6  ;;  %v4421_v26 = vcombine.low %v1449_v45, %v6231_v48  ;;  %v6995_v47 = vld [vmem:[#allocation59_spill] sm:$0xff] }
 0x324   : > { %4028 = vmatprep.subr.bf16.mxu1 %v4426_v35  ;;  %4061 = vmatprep.subr.bf16.mxu0 %v4506_v2  ;;  %v6266_v62 = vpop.permute.xlu1 %2666  ;;  %v2109_v35 = vrot.slane %v6987_v43, 4  ;;  %v6990_v2 = vld [vmem:[#allocation68_spill] sm:$0xff]  ;;  %v2113_v36 = vrot.slane %v6993_v31, 4  ;;  %v4501_v41 = vcombine.low %v2014_v55, %v2016_v12  ;;  %v6996_v5 = vld [vmem:[#allocation63_spill] sm:$0xff] }
 0x325   : > { %2344 = vrot.lane.b32.xlu0 %v2297_v54, %s4788_s30  ;;  %v1889_v54 = vrot.slane %v6990_v2, 4  ;;  %v2136_v24 = vsel %vm397_vm13, %v2119_v44, %v2120_v61  ;;  %v2116_v44 = vrot.slane %v6995_v47, 4  ;;  %v1908_v48 = vsel %vm397_vm13, %v1891_v52, %v1892_v9  ;;  %v6997_v45 = vld [vmem:[#allocation35_spill] sm:$0xff] }
 0x326   : > { %2330 = vrot.lane.b32.xlu1 %v6981_v37, %s4788_s30  ;;  %v1911_v37 = vsel %vm344_vm0, %v6055_v59, %v1910_v15  ;;  %v2137_v55 = vsel %vm378_vm4, %v6028_v19, %v2136_v24  ;;  %v7000_v47 = vld [vmem:[#allocation47_spill] sm:$0xff]  ;;  %v7001_v52 = vcombine.high %v5899_v56, %v5962_v18  ;;  %v1909_v19 = vsel %vm344_vm0, %v6986_v25, %v1908_v48  ;;  %v7003_v24 = vld [vmem:[#allocation33_spill] sm:$0xff] }
 0x327   : > { %v6276_v34 = vpop.permute.xlu0 %2664  ;;  %4062 = vmatpush2.bf16.msra.mxu0 %v4505_v23  ;;  %4029 = vmatpush2.bf16.msra.mxu1 %v4425_v20  ;;  %v2134_v20 = vsel %vm397_vm13, %v2117_v30, %v2118_v1  ;;  %v2111_v23 = vrot.slane %v6997_v45, 4  ;;  %v1888_v1 = vrot.slane %v7000_v47, 4  ;;  %v2132_v9 = vsel %vm397_vm13, %v2115_v14, %v2116_v44  ;;  %v7008_v47 = vld [vmem:[#allocation21_spill] sm:$0xff] }
 0x328   : > { %4030 = vmatprep.subr.bf16.mxu1 %v4422_v57  ;;  %4063 = vmatprep.subr.bf16.mxu0 %v4502_v40  ;;  %v6288_v16 = vpop.permute.xlu1 %2224  ;;  %v1890_v57 = vrot.slane %v6996_v5, 4  ;;  %v6998_v40 = vld [vmem:[#allocation46_spill] sm:$0xff]  ;;  %v2135_v14 = vsel %vm378_vm4, %v6985_v49, %v2134_v20  ;;  %v4494_v44 = vcombine.high %v1909_v19, %v1911_v37  ;;  %v7006_v49 = vcombine.low %v5944_v8, %v6144_v7 }
 0x329   : > { %2892 = vrot.lane.b32.xlu0 %v2851_v22, %s4785_s27  ;;  %v2114_v61 = vrot.slane %v6998_v40, 4  ;;  %v6999_v22 = vld [vmem:[#allocation37_spill] sm:$0xff]  ;;  %v1904_v15 = vsel %vm397_vm13, %v1887_v0, %v1888_v1  ;;  %v2133_v20 = vsel %vm378_vm4, %v6989_v29, %v2132_v9  ;;  %v2291_v8 = vld [vmem:[#allocation2 + $0x74] sm:$0xf] }
 0x32a   : > { %v1885_v6 = vrot.slane %v6999_v22, 4  ;;  %v1906_v30 = vsel %vm397_vm13, %v1889_v54, %v1890_v57  ;;  %2334 = vrot.lane.b32.xlu1 %v6984_v32, %s4788_s30  ;;  %v4526_v57 = vcombine.high %v2135_v14, %v2137_v55  ;;  %v7007_v32 = vcombine.low %v5899_v56, %v5962_v18  ;;  %v6343_v56 = vld [vmem:[#allocation2 + $0x3c] sm:$0xff]  ;;  %v7009_v18 = vld [vmem:[#allocation9_spill] sm:$0xff] }
 0x32b   : > { %v6296_v12 = vpop.permute.xlu0 %2218  ;;  %4064 = vmatpush2.bf16.msra.mxu0 %v4501_v41  ;;  %4031 = vmatpush2.bf16.msra.mxu1 %v4421_v26  ;;  %v2853_v41 = vld [vmem:[#allocation2 + $0x8c] sm:$0xf]  ;;  %v7002_v26 = vld [vmem:[#allocation32_spill] sm:$0xff]  ;;  %v2130_v59 = vsel %vm397_vm13, %v2113_v36, %v2114_v61  ;;  %v7005_v61 = vrot.slane %v6983_v58, 4  ;;  %v1907_v0 = vsel %vm344_vm0, %v6990_v2, %v1906_v30  ;;  %v1884_v58 = vrot.slane %v7008_v47, 4 }
 0x32c   : > { %4032 = vmatprep.subr.bf16.mxu1 %v7001_v52  ;;  %4065 = vmatprep.subr.bf16.mxu0 %v4498_v27  ;;  %v2112_v5 = vrot.slane %v7002_v26, 4  ;;  %v6318_v54 = vpop.permute.xlu1 %2670  ;;  %v1886_v27 = vrot.slane %v7003_v24, 4  ;;  %v7004_v36 = vld [vmem:[#allocation13_spill] sm:$0xff]  ;;  %v2131_v7 = vsel %vm378_vm4, %v6993_v31, %v2130_v59  ;;  %v2108_v52 = vrot.slane %v7009_v18, 4 }
 0x32d   : > { %2896 = vrot.lane.b32.xlu0 %v2853_v41, %s4785_s27  ;;  %v1882_v40 = vrot.slane %v7004_v36, 4  ;;  %v2126_v25 = vsel %vm397_vm13, %v2109_v35, %v7005_v61  ;;  %v4493_v2 = vcombine.low %v1909_v19, %v1911_v37  ;;  %v4525_v30 = vcombine.low %v2135_v14, %v2137_v55  ;;  %v7012_v26 = vld [vmem:[#allocation61_spill] sm:$0xff] }
 0x32e   : > { %v2128_v35 = vsel %vm397_vm13, %v2111_v23, %v2112_v5  ;;  %v1902_v1 = vsel %vm397_vm13, %v1885_v6, %v1886_v27  ;;  %v1905_v29 = vsel %vm344_vm0, %v6994_v11, %v1904_v15  ;;  %2882 = vrot.lane.b32.xlu1 %v6343_v56, %s4785_s27  ;;  %v7010_v6 = vld [vmem:[#allocation10_spill] sm:$0xff]  ;;  %v7011_v31 = vrot.slane %v6988_v63, 4  ;;  %v7015_v27 = vld [vmem:[#allocation4_spill] sm:$0xff]  ;;  %v2293_v36 = vld [vmem:[#allocation2 + $0x8c] sm:$0xf] }
 0x32f   : > { %v6326_v48 = vpop.permute.xlu0 %2668  ;;  %4066 = vmatpush2.bf16.msra.mxu0 %v7006_v49  ;;  %4033 = vmatpush2.bf16.msra.mxu1 %v7007_v32  ;;  %v1881_v9 = vrot.slane %v7010_v6, 4  ;;  %v4490_v37 = vcombine.high %v1905_v29, %v1907_v0  ;;  %v4522_v55 = vcombine.high %v2131_v7, %v2133_v20  ;;  %v7013_v5 = vrot.slane %v6974_v42, 4  ;;  %v6376_v49 = vld [vmem:[#allocation2 + $0x54] sm:$0xff] }
 0x330   : > { %4067 = vmatprep.subr.bf16.mxu0 %v4494_v44  ;;  %4092 = vmatprep.subr.bf16.mxu1 %v4526_v57  ;;  %v6351_v23 = vpop.permute.xlu1 %2228  ;;  %v1900_v41 = vsel %vm397_vm13, %v7011_v31, %v1884_v58  ;;  %v7014_v59 = vrot.slane %v6978_v17, 4  ;;  %v1903_v14 = vsel %vm344_vm0, %v6999_v22, %v1902_v1  ;;  %v2129_v24 = vsel %vm378_vm4, %v6997_v45, %v2128_v35  ;;  %v2847_v1 = vld [vmem:[#allocation2 + $0x44] sm:$0xf] }
 0x331   : > { %2332 = vrot.lane.b32.xlu0 %v2291_v8, %s4788_s30  ;;  %v1879_v15 = vrot.slane %v7015_v27, 4  ;;  %v7016_v44 = vrot.slane %v6982_v28, 4  ;;  %v1898_v57 = vsel %vm397_vm13, %v1881_v9, %v1882_v40  ;;  %v2127_v61 = vsel %vm378_vm4, %v6987_v43, %v2126_v25 }
 0x332   : > { %4035 = vmatmul.mubr.bf16.vlgmr.msra.gmra.mxu1 %v7012_v26  ;;  %v2121_v11 = vsel %vm397_vm13, %v7014_v59, %v7013_v5  ;;  %v4489_v22 = vcombine.low %v1905_v29, %v1907_v0  ;;  %v4521_v32 = vcombine.low %v2131_v7, %v2133_v20  ;;  %v1901_v45 = vsel %vm344_vm0, %v6988_v63, %v1900_v41  ;;  %v4384_v41 = vld.sshfl [vmem:[%s6772_s2 + $0x8] sm:$0x3 pattern:$0x76325410]  ;;  %v7019_v59 = vld [vmem:[#allocation75_spill] sm:$0xff] }
 0x333   : > { %v6363_v19 = vpop.permute.xlu0 %2222  ;;  %4068 = vmatpush2.bf16.msra.mxu0 %v4493_v2  ;;  %4093 = vmatpush1.bf16.msra.mxu1 %v4525_v30  ;;  %v2124_v42 = vsel %vm397_vm13, %v7016_v44, %v2108_v52  ;;  %v7017_v40 = vrot.slane %v6980_v51, 4  ;;  %v4486_v35 = vcombine.high %v1901_v45, %v1903_v14  ;;  %v4518_v43 = vcombine.high %v2127_v61, %v2129_v24  ;;  %v6428_v44 = vld [vmem:[#allocation2 + $0x24] sm:$0xff] }
 0x334   : > { %4069 = vmatprep.subr.bf16.mxu0 %v4490_v37  ;;  %4094 = vmatprep.subr.bf16.mxu1 %v4522_v55  ;;  %v6383_v47 = vpop.permute.xlu1 %2674  ;;  %v7018_v25 = vmov 0   ;;  %v1899_v0 = vsel %vm344_vm0, %v7010_v6, %v1898_v57  ;;  %v2125_v63 = vsel %vm378_vm4, %v6982_v28, %v2124_v42  ;;  %v2123_v51 = vsel %vm378_vm4, %v6978_v17, %v2121_v11  ;;  %v2849_v17 = vld [vmem:[#allocation2 + $0x5c] sm:$0xf]  ;;  %v2287_v37 = vld [vmem:[#allocation2 + $0x44] sm:$0xf]  ;;  %v6416_v55 = vld [vmem:[#allocation2 + $0xc] sm:$0xff] }
 0x335   : > { %2336 = vrot.lane.b32.xlu0 %v2293_v36, %s4788_s30  ;;  %2886 = vrot.lane.b32.xlu1 %v6376_v49, %s4785_s27  ;;  %v1895_v58 = vsel %vm397_vm13, %v1879_v15, %v7017_v40  ;;  %v4485_v7 = vcombine.low %v1901_v45, %v1903_v14  ;;  %v4517_v18 = vcombine.low %v2127_v61, %v2129_v24  ;;  %v7020_v14 = vld [vmem:[#allocation62_spill] sm:$0xff]  ;;  %v7021_v24 = vld [vmem:[#allocation77_spill] sm:$0xff]  ;;  %v2289_v15 = vld [vmem:[#allocation2 + $0x5c] sm:$0xf]  ;;  %v2237_v42 = vrot.slane %v6139_v3, 4 }
 0x336   : > { %4116 = vmatprep.mubr.bf16.mxu1 %v7018_v25  ;;  %v1897_v8 = vsel %vm344_vm0, %v7015_v27, %v1895_v58  ;;  %v4514_v28 = vcombine.high %v2123_v51, %v2125_v63  ;;  %v4513_v6 = vcombine.low %v2123_v51, %v2125_v63  ;;  %v2235_v27 = vrot.slane %v6079_v33, 4  ;;  %v2843_v40 = vld [vmem:[#allocation2 + $0x14] sm:$0xf] }
 0x337   : > { %v6391_v20 = vpop.permute.xlu0 %2672  ;;  %4070 = vmatpush2.bf16.msra.mxu0 %v4489_v22  ;;  %4095 = vmatpush1.bf16.msra.mxu1 %v4521_v32  ;;  %v4482_v2 = vcombine.high %v1897_v8, %v1899_v0  ;;  %v4481_v29 = vcombine.low %v1897_v8, %v1899_v0  ;;  %v2234_v36 = vrot.slane %v6015_v13, 4  ;;  %v2236_v61 = vrot.slane %v6067_v50, 4 }
 0x338   : > { %4071 = vmatprep.subr.bf16.mxu0 %v4486_v35  ;;  %4096 = vmatprep.subr.bf16.mxu1 %v4518_v43  ;;  %v6402_v52 = vpop.permute.xlu1 %2562  ;;  %v2244_v22 = vrot.slane %v6363_v19, 4  ;;  %v2240_v3 = vrot.slane %v6251_v4, 4  ;;  %v2683_v58 = vrot.slane %v6108_v53, 4  ;;  %v2239_v43 = vrot.slane %v6128_v10, 4 }
 0x339   : > { %2884 = vrot.lane.b32.xlu0 %v2847_v1, %s4785_s27  ;;  %2322 = vrot.lane.b32.xlu1 %v6343_v56, %s4788_s30  ;;  %v6442_v33 = vsel %vm397_vm13, %v2234_v36, %v2235_v27  ;;  %v6448_v35 = vsel %vm397_vm13, %v2236_v61, %v2237_v42  ;;  %v2245_v0 = vrot.slane %v6288_v16, 4  ;;  %v2238_v1 = vrot.slane %v6187_v38, 4 }
 0x33a   : > { %v2241_v51 = vrot.slane %v6177_v46, 4  ;;  %v2242_v8 = vrot.slane %v6296_v12, 4  ;;  %v2693_v16 = vrot.slane %v6391_v20, 4  ;;  %v2845_v46 = vld [vmem:[#allocation2 + $0x2c] sm:$0xf] }
 0x33b   : > { %v6404_v30 = vpop.permute.xlu0 %2226  ;;  %4072 = vmatpush2.bf16.msra.mxu0 %v4485_v7  ;;  %4097 = vmatpush1.bf16.msra.mxu1 %v4517_v18  ;;  %v2247_v7 = vrot.slane %v6351_v23, 4  ;;  %v2243_v18 = vrot.slane %v6241_v39, 4  ;;  %v2260_v10 = vsel %vm397_vm13, %v2244_v22, %v2245_v0  ;;  %v2690_v23 = vrot.slane %v6266_v62, 4  ;;  %v6487_v0 = vld [vmem:[#allocation2 + $0x9c] sm:$0xff] }
 0x33c   : > { %4073 = vmatprep.subr.bf16.mxu0 %v4482_v2  ;;  %4098 = vmatprep.subr.bf16.mxu1 %v4514_v28  ;;  %v6409_v9 = vpop.permute.xlu1 %2450  ;;  %v2246_v45 = vrot.slane %v6404_v30, 4  ;;  %v2692_v39 = vrot.slane %v6318_v54, 4 }
 0x33d   : > { %2888 = vrot.lane.b32.xlu0 %v2849_v17, %s4785_s27  ;;  %2326 = vrot.lane.b32.xlu1 %v6376_v49, %s4788_s30  ;;  %v2256_v17 = vsel %vm397_vm13, %v2240_v3, %v2241_v51  ;;  %v2686_v51 = vrot.slane %v6155_v21, 4 }
 0x33e   : > { %v2708_v27 = vsel %vm397_vm13, %v2692_v39, %v2693_v16 }
 0x33f   : > { %v6411_v31 = vpop.permute.xlu0 %2676  ;;  %4074 = vmatpush2.bf16.msra.mxu0 %v4481_v29  ;;  %4099 = vmatpush1.bf16.msra.mxu1 %v4513_v6  ;;  %v2262_v29 = vsel %vm397_vm13, %v2246_v45, %v2247_v7  ;;  %v2283_v45 = vld [vmem:[#allocation2 + $0x14] sm:$0xf] }
 0x340   : > { %v2233_v5 = vpop.permute.xlu1 %2232  ;;  %v2695_v2 = vrot.slane %v6411_v31, 4  ;;  %v2258_v31 = vsel %vm397_vm13, %v2242_v8, %v2243_v18  ;;  %v2263_v36 = vsel %vm251_vm9, %v6404_v30, %v2262_v29  ;;  %v2688_v8 = vrot.slane %v6207_v60, 4  ;;  %v7022_v18 = vld [vmem:[#allocation17_spill] sm:$0xff] }
 0x341   : > { %2324 = vrot.lane.b32.xlu0 %v2287_v37, %s4788_s30  ;;  %2874 = vrot.lane.b32.xlu1 %v6416_v55, %s4785_s27  ;;  %v2689_v37 = vrot.slane %v6276_v34, 4  ;;  %v2261_v34 = vsel %vm251_vm9, %v6363_v19, %v2260_v10  ;;  %v2254_v19 = vsel %vm397_vm13, %v2238_v1, %v2239_v43  ;;  %v2259_v30 = vsel %vm251_vm9, %v6296_v12, %v2258_v31 }
 0x342   : > { %4529 = vmatmul.mubr.msk.bf16.vlgmr.msra.gmra.mxu1 %vm3998_vm15, %v4384_v41  ;;  %4076 = vmatmul.mubr.bf16.vlgmr.msra.gmra.mxu0 %v7019_v59  ;;  %v2249_v41 = vrot.slane %v2233_v5, 4  ;;  %v2691_v5 = vrot.slane %v6326_v48, 4  ;;  %v2687_v10 = vrot.slane %v7022_v18, 4  ;;  %v4412_v1 = vcombine.high %v2259_v30, %v2261_v34 }
 0x343   : > { %v6423_v11 = vpop.permute.xlu0 %2564  ;;  %4157 = vmatprep.mubr.bf16.mxu1 %v7020_v14  ;;  %4198 = vmatprep.mubr.bf16.mxu0 %v7021_v24  ;;  %v2694_v14 = vrot.slane %v6383_v47, 4 }
 0x344   : > { %v6434_v57 = vpop.permute.xlu1 %2678  ;;  %v2706_v16 = vsel %vm397_vm13, %v2690_v23, %v2691_v5  ;;  %v2704_v23 = vsel %vm397_vm13, %v2688_v8, %v2689_v37  ;;  %v7024_v5 = vld [vmem:[#allocation38_spill] sm:$0xff]  ;;  %v7025_v37 = vld [vmem:[#allocation8_spill] sm:$0xff]  ;;  %v2583_v53 = vrot.slane %v6423_v11, 4 }
 0x345   : > { %2328 = vrot.lane.b32.xlu0 %v2289_v15, %s4788_s30  ;;  %2878 = vrot.lane.b32.xlu1 %v6428_v44, %s4785_s27  ;;  %v2710_v15 = vsel %vm397_vm13, %v2694_v14, %v2695_v2  ;;  %v2696_v3 = vrot.slane %v6434_v57, 4  ;;  %v2709_v2 = vsel %vm325_vm1, %v6318_v54, %v2708_v27  ;;  %v2285_v14 = vld [vmem:[#allocation2 + $0x2c] sm:$0xf]  ;;  %v6512_v54 = vld [vmem:[#allocation2 + $0xb4] sm:$0xff]  ;;  %v2684_v27 = vrot.slane %v7025_v37, 4 }
 0x347   : > { %v6439_v32 = vpop.permute.xlu0 %2452 }
 0x348   : > { %v6455_v63 = vpop.permute.xlu1 %2566 }
 0x349   : > { %2876 = vrot.lane.b32.xlu0 %v2843_v40, %s4785_s27  ;;  %2314 = vrot.lane.b32.xlu1 %v6416_v55, %s4788_s30 }
 0x34b   : > { %v2231_v28 = vpop.permute.xlu0 %2230 }
 0x34c   : > { %v2248_v6 = vrot.slane %v2231_v28, 4  ;;  %v6474_v20 = vpop.permute.xlu1 %2454 }
 0x34d   : > { %2880 = vrot.lane.b32.xlu0 %v2845_v46, %s4785_s27  ;;  %2318 = vrot.lane.b32.xlu1 %v6428_v44, %s4788_s30 }
 0x34e   : > { %v2264_v24 = vsel %vm397_vm13, %v2248_v6, %v2249_v41  ;;  %v2257_v6 = vsel %vm251_vm9, %v6251_v4, %v2256_v17  ;;  %v7023_v41 = vld [vmem:[#allocation14_spill] sm:$0xff]  ;;  %v2255_v4 = vsel %vm251_vm9, %v6187_v38, %v2254_v19 }
 0x34f   : > { %v2681_v42 = vpop.permute.xlu0 %2680  ;;  %v2265_v61 = vsel %vm251_vm9, %v2231_v28, %v2264_v24  ;;  %v2711_v28 = vsel %vm325_vm1, %v6383_v47, %v2710_v15  ;;  %v2685_v46 = vrot.slane %v7023_v41, 4  ;;  %v2682_v47 = vrot.slane %v7024_v5, 4 }
 0x350   : > { %v2697_v22 = vrot.slane %v2681_v42, 4  ;;  %v4415_v48 = vcombine.low %v2263_v36, %v2265_v61  ;;  %v4416_v40 = vcombine.high %v2263_v36, %v2265_v61  ;;  %v6497_v7 = vpop.permute.xlu1 %2554  ;;  %v4411_v24 = vcombine.low %v2259_v30, %v2261_v34  ;;  %v2745_v30 = vld [vmem:[#allocation2 + $0xbc] sm:$0xf] }
 0x351   : > { %2316 = vrot.lane.b32.xlu0 %v2283_v45, %s4788_s30  ;;  %2786 = vrot.lane.b32.xlu1 %v6487_v0, %s4784_s26  ;;  %v2702_v15 = vsel %vm397_vm13, %v2686_v51, %v2687_v10  ;;  %v4408_v42 = vcombine.high %v2255_v4, %v2257_v6  ;;  %v2705_v34 = vsel %vm325_vm1, %v6207_v60, %v2704_v23  ;;  %v2578_v41 = vrot.slane %v6497_v7, 4 }
 0x352   : > { %v2712_v43 = vsel %vm397_vm13, %v2696_v3, %v2697_v22  ;;  %4125 = vmatprep.subr.bf16.mxu1 %v4416_v40  ;;  %v2251_v61 = vsel %vm251_vm9, %v6015_v13, %v6442_v33  ;;  %v2698_v22 = vsel %vm397_vm13, %v2682_v47, %v2683_v58  ;;  %v2700_v3 = vsel %vm397_vm13, %v2684_v27, %v2685_v46 }
 0x353   : > { %v2713_v12 = vsel %vm325_vm1, %v6434_v57, %v2712_v43  ;;  %v2569_v29 = vpop.permute.xlu0 %2568  ;;  %4126 = vmatpush1.bf16.msra.mxu1 %v4415_v48  ;;  %v2707_v57 = vsel %vm325_vm1, %v6266_v62, %v2706_v16  ;;  %v2253_v62 = vsel %vm251_vm9, %v6067_v50, %v6448_v35  ;;  %v2743_v50 = vld [vmem:[#allocation2 + $0xa4] sm:$0xf]  ;;  %v2703_v60 = vsel %vm325_vm1, %v6155_v21, %v2702_v15 }
 0x354   : > { %v4479_v39 = vcombine.low %v2711_v28, %v2713_v12  ;;  %4127 = vmatprep.subr.bf16.mxu1 %v4412_v1  ;;  %v4480_v31 = vcombine.high %v2711_v28, %v2713_v12  ;;  %v6522_v17 = vpop.permute.xlu1 %2558  ;;  %v4476_v36 = vcombine.high %v2707_v57, %v2709_v2  ;;  %v2585_v45 = vrot.slane %v2569_v29, 4 }
 0x355   : > { %2320 = vrot.lane.b32.xlu0 %v2285_v14, %s4788_s30  ;;  %2790 = vrot.lane.b32.xlu1 %v6512_v54, %s4784_s26  ;;  %v4475_v35 = vcombine.low %v2707_v57, %v2709_v2  ;;  %v4407_v48 = vcombine.low %v2255_v4, %v2257_v6  ;;  %v2584_v33 = vrot.slane %v6455_v63, 4  ;;  %v4404_v58 = vcombine.high %v2251_v61, %v2253_v62  ;;  %v6565_v6 = vld [vmem:[#allocation2 + $0x84] sm:$0xff]  ;;  %v2158_v14 = vld [vmem:[#allocation2 + $0x6c] sm:$0xff] }
 0x356   : > { %4166 = vmatprep.subr.bf16.mxu0 %v4480_v31  ;;  %v4472_v40 = vcombine.high %v2703_v60, %v2705_v34  ;;  %v2701_v19 = vsel %vm325_vm1, %v7025_v37, %v2700_v3  ;;  %v2582_v21 = vrot.slane %v6402_v52, 4  ;;  %v2699_v11 = vsel %vm325_vm1, %v7024_v5, %v2698_v22 }
 0x357   : > { %v6531_v38 = vpop.permute.xlu0 %2456  ;;  %4167 = vmatpush1.bf16.msra.mxu0 %v4479_v39  ;;  %4128 = vmatpush1.bf16.msra.mxu1 %v4411_v24  ;;  %v2600_v8 = vsel %vm397_vm13, %v2584_v33, %v2585_v45  ;;  %v4403_v18 = vcombine.low %v2251_v61, %v2253_v62  ;;  %v4471_v10 = vcombine.low %v2703_v60, %v2705_v34  ;;  %v2580_v23 = vrot.slane %v6522_v17, 4  ;;  %v2967_v39 = vld [vmem:[#allocation2 + $0xa4] sm:$0xf] }
 0x358   : > { %4129 = vmatprep.subr.bf16.mxu1 %v4408_v42  ;;  %4168 = vmatprep.subr.bf16.mxu0 %v4476_v36  ;;  %v6545_v13 = vpop.permute.xlu1 %2442  ;;  %v2598_v43 = vsel %vm397_vm13, %v2582_v21, %v2583_v53  ;;  %v4400_v2 = vcombine.high %v6487_v0, %v6512_v54  ;;  %v4468_v28 = vcombine.high %v2699_v11, %v2701_v19  ;;  %v2471_v62 = vrot.slane %v6439_v32, 4 }
 0x359   : > { %2788 = vrot.lane.b32.xlu0 %v2743_v50, %s4784_s26  ;;  %3010 = vrot.lane.b32.xlu1 %v6487_v0, %s4786_s28  ;;  %v2601_v12 = vsel %vm306_vm11, %v6455_v63, %v2600_v8  ;;  %v4467_v31 = vcombine.low %v2699_v11, %v2701_v19  ;;  %v2599_v5 = vsel %vm306_vm11, %v6402_v52, %v2598_v43  ;;  %v2472_v34 = vrot.slane %v6474_v20, 4  ;;  %v2739_v50 = vld [vmem:[#allocation2 + $0x74] sm:$0xf] }
 0x35a   : > { %v4399_v63 = vcombine.low %v6487_v0, %v6512_v54  ;;  %v4396_v4 = vcombine.high %v2158_v14, %v6565_v6  ;;  %v4464_v37 = vcombine.high %v2599_v5, %v2601_v12  ;;  %v2473_v0 = vrot.slane %v6531_v38, 4 }
 0x35b   : > { %v2557_v51 = vpop.permute.xlu0 %2556  ;;  %4169 = vmatpush1.bf16.msra.mxu0 %v4475_v35  ;;  %4130 = vmatpush1.bf16.msra.mxu1 %v4407_v48  ;;  %v4463_v15 = vcombine.low %v2599_v5, %v2601_v12  ;;  %v4395_v36 = vcombine.low %v2158_v14, %v6565_v6  ;;  %v4392_v61 = vcombine.high %v6343_v56, %v6376_v49 }
 0x35c   : > { %4131 = vmatprep.subr.bf16.mxu1 %v4404_v58  ;;  %4170 = vmatprep.subr.bf16.mxu0 %v4472_v40  ;;  %v6558_v16 = vpop.permute.xlu1 %2446  ;;  %v2579_v1 = vrot.slane %v2557_v51, 4  ;;  %v2488_v3 = vsel %vm397_vm13, %v2472_v34, %v2473_v0  ;;  %v4391_v32 = vcombine.low %v6343_v56, %v6376_v49  ;;  %v4388_v58 = vcombine.high %v6416_v55, %v6428_v44 }
 0x35d   : > { %2792 = vrot.lane.b32.xlu0 %v2745_v30, %s4784_s26  ;;  %3014 = vrot.lane.b32.xlu1 %v6512_v54, %s4786_s28  ;;  %v2969_v54 = vld [vmem:[#allocation2 + $0xbc] sm:$0xf]  ;;  %v2468_v33 = vrot.slane %v6558_v16, 4  ;;  %v2489_v40 = vsel %vm289_vm7, %v6474_v20, %v2488_v3  ;;  %v2466_v51 = vrot.slane %v6545_v13, 4  ;;  %v2741_v30 = vld [vmem:[#allocation2 + $0x8c] sm:$0xf] }
 0x35e   : > { %v2594_v57 = vsel %vm397_vm13, %v2578_v41, %v2579_v1  ;;  %v2963_v41 = vld [vmem:[#allocation2 + $0x74] sm:$0xf] }
 0x35f   : > { %v2561_v29 = vpop.permute.xlu0 %2560  ;;  %4171 = vmatpush1.bf16.msra.mxu0 %v4471_v10  ;;  %4132 = vmatpush1.bf16.msra.mxu1 %v4403_v18  ;;  %v2595_v42 = vsel %vm306_vm11, %v6497_v7, %v2594_v57  ;;  %v2470_v7 = vrot.slane %v6409_v9, 4  ;;  %v4387_v18 = vcombine.low %v6416_v55, %v6428_v44 }
 0x360   : > { %v2581_v46 = vrot.slane %v2561_v29, 4  ;;  %4133 = vmatprep.subr.bf16.mxu1 %v4400_v2  ;;  %4172 = vmatprep.subr.bf16.mxu0 %v4468_v28  ;;  %v6575_v47 = vpop.permute.xlu1 %2546 }
 0x361   : > { %3012 = vrot.lane.b32.xlu0 %v2967_v39, %s4786_s28  ;;  %2778 = vrot.lane.b32.xlu1 %v2158_v14, %s4784_s26  ;;  %v2486_v48 = vsel %vm397_vm13, %v2470_v7, %v2471_v62  ;;  %v2574_v1 = vrot.slane %v6575_v47, 4  ;;  %v2737_v7 = vld [vmem:[#allocation2 + $0x5c] sm:$0xf] }
 0x362   : > { %v2596_v24 = vsel %vm397_vm13, %v2580_v23, %v2581_v46  ;;  %v2487_v11 = vsel %vm289_vm7, %v6409_v9, %v2486_v48 }
 0x363   : > { %v2597_v27 = vsel %vm306_vm11, %v6522_v17, %v2596_v24  ;;  %v2445_v52 = vpop.permute.xlu0 %2444  ;;  %4173 = vmatpush1.bf16.msra.mxu0 %v4467_v31  ;;  %4134 = vmatpush1.bf16.msra.mxu1 %v4399_v63  ;;  %v4448_v10 = vcombine.high %v2487_v11, %v2489_v40  ;;  %v4447_v46 = vcombine.low %v2487_v11, %v2489_v40 }
 0x364   : > { %4135 = vmatprep.subr.bf16.mxu1 %v4396_v4  ;;  %4174 = vmatprep.subr.bf16.mxu0 %v4464_v37  ;;  %v2551_v17 = vpop.permute.xlu1 %2550  ;;  %v4460_v38 = vcombine.high %v2595_v42, %v2597_v27  ;;  %v4459_v60 = vcombine.low %v2595_v42, %v2597_v27  ;;  %v2467_v53 = vrot.slane %v2445_v52, 4 }
 0x365   : > { %3016 = vrot.lane.b32.xlu0 %v2969_v54, %s4786_s28  ;;  %2782 = vrot.lane.b32.xlu1 %v6565_v6, %s4784_s26  ;;  %v2576_v29 = vrot.slane %v2551_v17, 4 }
 0x366   : > { %v2482_v43 = vsel %vm397_vm13, %v2466_v51, %v2467_v53 }
 0x367   : > { %v2449_v22 = vpop.permute.xlu0 %2448  ;;  %4175 = vmatpush1.bf16.msra.mxu0 %v4463_v15  ;;  %4136 = vmatpush1.bf16.msra.mxu1 %v4395_v36  ;;  %v2735_v15 = vld [vmem:[#allocation2 + $0x44] sm:$0xf] }
 0x368   : > { %v2469_v45 = vrot.slane %v2449_v22, 4  ;;  %4137 = vmatprep.subr.bf16.mxu1 %v4392_v61  ;;  %4176 = vmatprep.subr.bf16.mxu0 %v4460_v38  ;;  %v6599_v35 = vpop.permute.xlu1 %2434 }
 0x369   : > { %2780 = vrot.lane.b32.xlu0 %v2739_v50, %s4784_s26  ;;  %3002 = vrot.lane.b32.xlu1 %v2158_v14, %s4786_s28  ;;  %v2462_v37 = vrot.slane %v6599_v35, 4 }
 0x36a   : > { %v2484_v21 = vsel %vm397_vm13, %v2468_v33, %v2469_v45 }
 0x36b   : > { %v2549_v19 = vpop.permute.xlu0 %2548  ;;  %4177 = vmatpush1.bf16.msra.mxu0 %v4459_v60  ;;  %4138 = vmatpush1.bf16.msra.mxu1 %v4391_v32  ;;  %v2485_v2 = vsel %vm289_vm7, %v6558_v16, %v2484_v21  ;;  %v2961_v21 = vld [vmem:[#allocation2 + $0x5c] sm:$0xf] }
 0x36c   : > { %v2575_v8 = vrot.slane %v2549_v19, 4  ;;  %4139 = vmatprep.subr.bf16.mxu1 %v4388_v58  ;;  %v2439_v20 = vpop.permute.xlu1 %2438 }
 0x36d   : > { %2784 = vrot.lane.b32.xlu0 %v2741_v30, %s4784_s26  ;;  %3006 = vrot.lane.b32.xlu1 %v6565_v6, %s4786_s28  ;;  %v2483_v6 = vsel %vm289_vm7, %v6545_v13, %v2482_v43  ;;  %v2965_v13 = vld [vmem:[#allocation2 + $0x8c] sm:$0xf]  ;;  %v2464_v54 = vrot.slane %v2439_v20, 4  ;;  %v2731_v43 = vld [vmem:[#allocation2 + $0x14] sm:$0xf] }
 0x36e   : > { %v2590_v9 = vsel %vm397_vm13, %v2574_v1, %v2575_v8  ;;  %v4444_v39 = vcombine.high %v2483_v6, %v2485_v2  ;;  %v4443_v4 = vcombine.low %v2483_v6, %v2485_v2  ;;  %v2733_v6 = vld [vmem:[#allocation2 + $0x2c] sm:$0xf] }
 0x36f   : > { %v2553_v28 = vpop.permute.xlu0 %2552  ;;  %4140 = vmatpush1.bf16.msra.mxu1 %v4387_v18  ;;  %v2591_v14 = vsel %vm306_vm11, %v6575_v47, %v2590_v9 }
 0x370   : > { %v2577_v12 = vrot.slane %v2553_v28, 4  ;;  %4141 = vmatprep.subr.bf16.mxu1 %v4448_v10  ;;  %v2539_v23 = vpop.permute.xlu1 %2538 }
 0x371   : > { %3004 = vrot.lane.b32.xlu0 %v2963_v41, %s4786_s28  ;;  %2770 = vrot.lane.b32.xlu1 %v6343_v56, %s4784_s26  ;;  %v2570_v3 = vrot.slane %v2539_v23, 4 }
 0x372   : > { %v2592_v16 = vsel %vm397_vm13, %v2576_v29, %v2577_v12 }
 0x373   : > { %v2593_v31 = vsel %vm306_vm11, %v2551_v17, %v2592_v16  ;;  %v2437_v5 = vpop.permute.xlu0 %2436  ;;  %4142 = vmatpush2.bf16.msra.mxu1 %v4447_v46 }
 0x374   : > { %v4455_v63 = vcombine.low %v2591_v14, %v2593_v31  ;;  %v4456_v57 = vcombine.high %v2591_v14, %v2593_v31  ;;  %v2463_v24 = vrot.slane %v2437_v5, 4  ;;  %4143 = vmatprep.subr.bf16.mxu1 %v4444_v39  ;;  %v2543_v47 = vpop.permute.xlu1 %2542 }
 0x375   : > { %3008 = vrot.lane.b32.xlu0 %v2965_v13, %s4786_s28  ;;  %2774 = vrot.lane.b32.xlu1 %v6376_v49, %s4784_s26  ;;  %v2572_v32 = vrot.slane %v2543_v47, 4 }
 0x376   : > { %4178 = vmatprep.subr.bf16.mxu0 %v4456_v57  ;;  %v2478_v52 = vsel %vm397_vm13, %v2462_v37, %v2463_v24  ;;  %v3212_v57 = vld [vmem:[%s4838_s24] sm:$0x77] }
 0x377   : > { %v2441_v27 = vpop.permute.xlu0 %2440  ;;  %4179 = vmatpush1.bf16.msra.mxu0 %v4455_v63  ;;  %4144 = vmatpush2.bf16.msra.mxu1 %v4443_v4  ;;  %v2479_v36 = vsel %vm289_vm7, %v6599_v35, %v2478_v52  ;;  %v2959_v35 = vld [vmem:[#allocation2 + $0x44] sm:$0xf]  ;;  %v2955_v63 = vld [vmem:[#allocation2 + $0x14] sm:$0xf]  ;;  %v3218_v24 = vcombine.high %v3212_v57, %v3212_v57 }
 0x378   : > { %v2465_v0 = vrot.slane %v2441_v27, 4  ;;  %v2427_v34 = vpop.permute.xlu1 %2426 }
 0x379   : > { %2772 = vrot.lane.b32.xlu0 %v2735_v15, %s4784_s26  ;;  %2994 = vrot.lane.b32.xlu1 %v6343_v56, %s4786_s28  ;;  %v2458_v8 = vrot.slane %v2427_v34, 4 }
 0x37a   : > { %v2480_v42 = vsel %vm397_vm13, %v2464_v54, %v2465_v0  ;;  %v2957_v54 = vld [vmem:[#allocation2 + $0x2c] sm:$0xf] }
 0x37b   : > { %v2481_v17 = vsel %vm289_vm7, %v2439_v20, %v2480_v42  ;;  %v2541_v62 = vpop.permute.xlu0 %2540 }
 0x37c   : > { %v4439_v38 = vcombine.low %v2479_v36, %v2481_v17  ;;  %v4440_v61 = vcombine.high %v2479_v36, %v2481_v17  ;;  %v2571_v22 = vrot.slane %v2541_v62, 4  ;;  %v2431_v45 = vpop.permute.xlu1 %2430 }
 0x37d   : > { %2776 = vrot.lane.b32.xlu0 %v2737_v7, %s4784_s26  ;;  %2998 = vrot.lane.b32.xlu1 %v6376_v49, %s4786_s28  ;;  %v2460_v10 = vrot.slane %v2431_v45, 4 }
 0x37e   : > { %4145 = vmatprep.subr.bf16.mxu1 %v4440_v61  ;;  %v2586_v50 = vsel %vm397_vm13, %v2570_v3, %v2571_v22  ;;  %v3213_v61 = vld [vmem:[%s4838_s24 + $0x8] sm:$0x7]  ;;  %v4382_v22 = vld [vmem:[%s4838_s24 + $0x10] sm:$0x77] }
 0x37f   : > { %v2545_v56 = vpop.permute.xlu0 %2544  ;;  %4146 = vmatpush2.bf16.msra.mxu1 %v4439_v38  ;;  %v2587_v53 = vsel %vm306_vm11, %v2539_v23, %v2586_v50 }
 0x380   : > { %v2573_v60 = vrot.slane %v2545_v56, 4  ;;  %v2899_v58 = vpop.permute.xlu1 %2898 }
 0x381   : > { %2996 = vrot.lane.b32.xlu0 %v2959_v35, %s4786_s28  ;;  %2762 = vrot.lane.b32.xlu1 %v6416_v55, %s4784_s26  ;;  %v2918_v23 = vrot.slane %v2899_v58, 4  ;;  %v4383_v35 = vld [vmem:[%s4838_s24 + $0x18] sm:$0x7] }
 0x382   : > { %v2588_v48 = vsel %vm397_vm13, %v2572_v32, %v2573_v60 }
 0x383   : > { %v2589_v49 = vsel %vm306_vm11, %v2543_v47, %v2588_v48  ;;  %v2429_v33 = vpop.permute.xlu0 %2428  ;;  %v3231_v48 = vcombine.high %v4382_v22, %v4382_v22 }
 0x384   : > { %v4451_v40 = vcombine.low %v2587_v53, %v2589_v49  ;;  %v4452_v19 = vcombine.high %v2587_v53, %v2589_v49  ;;  %v2459_v51 = vrot.slane %v2429_v33, 4  ;;  %v2903_v11 = vpop.permute.xlu1 %2902 }
 0x385   : > { %3000 = vrot.lane.b32.xlu0 %v2961_v21, %s4786_s28  ;;  %2766 = vrot.lane.b32.xlu1 %v6428_v44, %s4784_s26  ;;  %v2920_v5 = vrot.slane %v2903_v11, 4 }
 0x386   : > { %4180 = vmatprep.subr.bf16.mxu0 %v4452_v19  ;;  %v2474_v18 = vsel %vm397_vm13, %v2458_v8, %v2459_v51 }
 0x387   : > { %v2433_v30 = vpop.permute.xlu0 %2432  ;;  %4181 = vmatpush1.bf16.msra.mxu0 %v4451_v40  ;;  %v2475_v2 = vsel %vm289_vm7, %v2427_v34, %v2474_v18 }
 0x388   : > { %v2461_v20 = vrot.slane %v2433_v30, 4  ;;  %v2339_v12 = vpop.permute.xlu1 %2338 }
 0x389   : > { %2764 = vrot.lane.b32.xlu0 %v2731_v43, %s4784_s26  ;;  %2986 = vrot.lane.b32.xlu1 %v6416_v55, %s4786_s28  ;;  %v3242_v55 = vld [vmem:[%s6774_s4] sm:$0x7]  ;;  %v2358_v15 = vrot.slane %v2339_v12, 4 }
 0x38a   : > { %v2476_v1 = vsel %vm397_vm13, %v2460_v10, %v2461_v20 }
 0x38b   : > { %v2477_v28 = vsel %vm289_vm7, %v2431_v45, %v2476_v1  ;;  %v2901_v9 = vpop.permute.xlu0 %2900 }
 0x38c   : > { %v4435_v29 = vcombine.low %v2475_v2, %v2477_v28  ;;  %v4436_v41 = vcombine.high %v2475_v2, %v2477_v28  ;;  %v2919_v46 = vrot.slane %v2901_v9, 4  ;;  %v2343_v16 = vpop.permute.xlu1 %2342 }
 0x38d   : > { %2768 = vrot.lane.b32.xlu0 %v2733_v6, %s4784_s26  ;;  %2990 = vrot.lane.b32.xlu1 %v6428_v44, %s4786_s28  ;;  %v2360_v34 = vrot.slane %v2343_v16, 4 }
 0x38e   : > { %4147 = vmatprep.subr.bf16.mxu1 %v4436_v41  ;;  %v2934_v14 = vsel %vm397_vm13, %v2918_v23, %v2919_v46 }
 0x38f   : > { %v2905_v39 = vpop.permute.xlu0 %2904  ;;  %4148 = vmatpush2.bf16.msra.mxu1 %v4435_v29  ;;  %v2935_v13 = vsel %vm363_vm3, %v2899_v58, %v2934_v14 }
 0x390   : > { %v2921_v31 = vrot.slane %v2905_v39, 4  ;;  %v2891_v27 = vpop.permute.xlu1 %2890 }
 0x391   : > { %2988 = vrot.lane.b32.xlu0 %v2955_v63, %s4786_s28  ;;  %3245 = vperm.xlu1 %4739, %v3242_v55   ;;  %v2914_v53 = vrot.slane %v2891_v27, 4 }
 0x392   : > { %v2936_v44 = vsel %vm397_vm13, %v2920_v5, %v2921_v31 }
 0x393   : > { %v2937_v4 = vsel %vm363_vm3, %v2903_v11, %v2936_v44  ;;  %v2341_v37 = vpop.permute.xlu0 %2340 }
 0x394   : > { %v4511_v47 = vcombine.low %v2935_v13, %v2937_v4  ;;  %v4512_v52 = vcombine.high %v2935_v13, %v2937_v4  ;;  %v2359_v0 = vrot.slane %v2341_v37, 4  ;;  %v2895_v36 = vpop.permute.xlu1 %2894 }
 0x395   : > { %2992 = vrot.lane.b32.xlu0 %v2957_v54, %s4786_s28  ;;  %3221 = vrot.lane.b32.xlu1 %v3218_v24, %s4786_s28  ;;  %v2916_v19 = vrot.slane %v2895_v36, 4 }
 0x396   : > { %4182 = vmatprep.subr.bf16.mxu0 %v4512_v52  ;;  %v2374_v17 = vsel %vm397_vm13, %v2358_v15, %v2359_v0 }
 0x397   : > { %v2345_v42 = vpop.permute.xlu0 %2344  ;;  %4183 = vmatpush2.bf16.msra.mxu0 %v4511_v47  ;;  %v2375_v7 = vsel %vm270_vm8, %v2339_v12, %v2374_v17 }
 0x398   : > { %v2361_v62 = vrot.slane %v2345_v42, 4  ;;  %v2331_v45 = vpop.permute.xlu1 %2330 }
 0x399   : > { %3219 = vrot.lane.b32.xlu0 %v3212_v57, %s4786_s28  ;;  %3232 = vrot.lane.b32.xlu1 %v4382_v22, %s4786_s28  ;;  %v2354_v43 = vrot.slane %v2331_v45, 4 }
 0x39a   : > { %v2376_v38 = vsel %vm397_vm13, %v2360_v34, %v2361_v62 }
 0x39b   : > { %v2377_v3 = vsel %vm270_vm8, %v2343_v16, %v2376_v38  ;;  %v2893_v56 = vpop.permute.xlu0 %2892 }
 0x39c   : > { %v4431_v50 = vcombine.low %v2375_v7, %v2377_v3  ;;  %v4432_v60 = vcombine.high %v2375_v7, %v2377_v3  ;;  %v2915_v32 = vrot.slane %v2893_v56, 4  ;;  %v2335_v33 = vpop.permute.xlu1 %2334 }
 0x39d   : > { %3223 = vrot.lane.b32.xlu0 %v3213_v61, %s4786_s28  ;;  %3236 = vrot.lane.b32.xlu1 %v4383_v35, %s4786_s28  ;;  %v2356_v12 = vrot.slane %v2335_v33, 4 }
 0x39e   : > { %4149 = vmatprep.subr.bf16.mxu1 %v4432_v60  ;;  %v2930_v58 = vsel %vm397_vm13, %v2914_v53, %v2915_v32 }
 0x39f   : > { %v2897_v49 = vpop.permute.xlu0 %2896  ;;  %4150 = vmatpush2.bf16.msra.mxu1 %v4431_v50  ;;  %v2931_v21 = vsel %vm363_vm3, %v2891_v27, %v2930_v58 }
 0x3a0   : > { %v2917_v40 = vrot.slane %v2897_v49, 4  ;;  %v2883_v11 = vpop.permute.xlu1 %2882 }
 0x3a1   : > { %3234 = vrot.lane.b32.xlu0 %v3231_v48, %s4786_s28  ;;  %v2910_v14 = vrot.slane %v2883_v11, 4  ;;  %s4534_s28 = sshll.u32 %s7029_s19, 4 }
 0x3a2   : > { %v2932_v51 = vsel %vm397_vm13, %v2916_v19, %v2917_v40  ;;  %s6761_s22 = scalar_lea.vmem %s6775_s5, %s4534_s28 }
 0x3a3   : > { %v2933_v8 = vsel %vm363_vm3, %v2895_v36, %v2932_v51  ;;  %v2333_v30 = vpop.permute.xlu0 %2332 }
 0x3a4   : > { %v4507_v18 = vcombine.low %v2931_v21, %v2933_v8  ;;  %v4508_v20 = vcombine.high %v2931_v21, %v2933_v8  ;;  %v2355_v10 = vrot.slane %v2333_v30, 4 }
 0x3a6   : > { %4184 = vmatprep.subr.bf16.mxu0 %v4508_v20  ;;  %v2370_v28 = vsel %vm397_vm13, %v2354_v43, %v2355_v10 }
 0x3a7   : > { %v2337_v1 = vpop.permute.xlu0 %2336  ;;  %4185 = vmatpush2.bf16.msra.mxu0 %v4507_v18  ;;  %v2887_v2 = vpop.permute.xlu1 %2886  ;;  %v2371_v41 = vsel %vm270_vm8, %v2331_v45, %v2370_v28 }
 0x3a8   : > { %v2357_v9 = vrot.slane %v2337_v1, 4  ;;  %v2912_v24 = vrot.slane %v2887_v2, 4 }
 0x3aa   : > { %v2372_v29 = vsel %vm397_vm13, %v2356_v12, %v2357_v9 }
 0x3ab   : > { %v2373_v46 = vsel %vm270_vm8, %v2335_v33, %v2372_v29  ;;  %v2885_v6 = vpop.permute.xlu0 %2884  ;;  %v2323_v23 = vpop.permute.xlu1 %2322 }
 0x3ac   : > { %v4427_v55 = vcombine.low %v2371_v41, %v2373_v46  ;;  %v4428_v39 = vcombine.high %v2371_v41, %v2373_v46  ;;  %v2911_v16 = vrot.slane %v2885_v6, 4  ;;  %v2350_v54 = vrot.slane %v2323_v23, 4 }
 0x3ae   : > { %4151 = vmatprep.subr.bf16.mxu1 %v4428_v39  ;;  %v2926_v63 = vsel %vm397_vm13, %v2910_v14, %v2911_v16 }
 0x3af   : > { %v2889_v31 = vpop.permute.xlu0 %2888  ;;  %4152 = vmatpush2.bf16.msra.mxu1 %v4427_v55  ;;  %v2327_v5 = vpop.permute.xlu1 %2326  ;;  %v2927_v13 = vsel %vm363_vm3, %v2883_v11, %v2926_v63 }
 0x3b0   : > { %v2913_v57 = vrot.slane %v2889_v31, 4  ;;  %v2352_v62 = vrot.slane %v2327_v5, 4 }
 0x3b2   : > { %v2928_v44 = vsel %vm397_vm13, %v2912_v24, %v2913_v57 }
 0x3b3   : > { %v2929_v4 = vsel %vm363_vm3, %v2887_v2, %v2928_v44  ;;  %v2325_v37 = vpop.permute.xlu0 %2324  ;;  %v2875_v27 = vpop.permute.xlu1 %2874 }
 0x3b4   : > { %v4503_v47 = vcombine.low %v2927_v13, %v2929_v4  ;;  %v4504_v52 = vcombine.high %v2927_v13, %v2929_v4  ;;  %v2351_v0 = vrot.slane %v2325_v37, 4  ;;  %v2906_v50 = vrot.slane %v2875_v27, 4 }
 0x3b6   : > { %4186 = vmatprep.subr.bf16.mxu0 %v4504_v52  ;;  %v2366_v36 = vsel %vm397_vm13, %v2350_v54, %v2351_v0 }
 0x3b7   : > { %v2329_v15 = vpop.permute.xlu0 %2328  ;;  %4187 = vmatpush2.bf16.msra.mxu0 %v4503_v47  ;;  %v2879_v42 = vpop.permute.xlu1 %2878  ;;  %v2367_v38 = vsel %vm270_vm8, %v2323_v23, %v2366_v36 }
 0x3b8   : > { %v2353_v17 = vrot.slane %v2329_v15, 4  ;;  %v2908_v53 = vrot.slane %v2879_v42, 4 }
 0x3ba   : > { %v2368_v34 = vsel %vm397_vm13, %v2352_v62, %v2353_v17 }
 0x3bb   : > { %v2369_v61 = vsel %vm270_vm8, %v2327_v5, %v2368_v34  ;;  %v2877_v22 = vpop.permute.xlu0 %2876  ;;  %v2315_v7 = vpop.permute.xlu1 %2314 }
 0x3bc   : > { %v4423_v3 = vcombine.low %v2367_v38, %v2369_v61  ;;  %v4424_v56 = vcombine.high %v2367_v38, %v2369_v61  ;;  %v2907_v45 = vrot.slane %v2877_v22, 4  ;;  %v2346_v30 = vrot.slane %v2315_v7, 4 }
 0x3be   : > { %4153 = vmatprep.subr.bf16.mxu1 %v4424_v56  ;;  %v2922_v35 = vsel %vm397_vm13, %v2906_v50, %v2907_v45 }
 0x3bf   : > { %v2881_v60 = vpop.permute.xlu0 %2880  ;;  %4154 = vmatpush2.bf16.msra.mxu1 %v4423_v3  ;;  %v2319_v32 = vpop.permute.xlu1 %2318  ;;  %v2923_v33 = vsel %vm363_vm3, %v2875_v27, %v2922_v35 }
 0x3c0   : > { %v2909_v48 = vrot.slane %v2881_v60, 4  ;;  %v2348_v43 = vrot.slane %v2319_v32, 4 }
 0x3c2   : > { %v2924_v49 = vsel %vm397_vm13, %v2908_v53, %v2909_v48 }
 0x3c3   : > { %v2925_v58 = vsel %vm363_vm3, %v2879_v42, %v2924_v49  ;;  %v2317_v40 = vpop.permute.xlu0 %2316  ;;  %v2787_v19 = vpop.permute.xlu1 %2786 }
 0x3c4   : > { %v4499_v51 = vcombine.low %v2923_v33, %v2925_v58  ;;  %v4500_v21 = vcombine.high %v2923_v33, %v2925_v58  ;;  %v2347_v8 = vrot.slane %v2317_v40, 4  ;;  %v2806_v6 = vrot.slane %v2787_v19, 4 }
 0x3c6   : > { %4188 = vmatprep.subr.bf16.mxu0 %v4500_v21  ;;  %v2362_v20 = vsel %vm397_vm13, %v2346_v30, %v2347_v8 }
 0x3c7   : > { %v2321_v11 = vpop.permute.xlu0 %2320  ;;  %4189 = vmatpush2.bf16.msra.mxu0 %v4499_v51  ;;  %v2791_v18 = vpop.permute.xlu1 %2790  ;;  %v2363_v2 = vsel %vm270_vm8, %v2315_v7, %v2362_v20 }
 0x3c8   : > { %v2349_v10 = vrot.slane %v2321_v11, 4  ;;  %v2808_v14 = vrot.slane %v2791_v18, 4 }
 0x3ca   : > { %v2364_v1 = vsel %vm397_vm13, %v2348_v43, %v2349_v10 }
 0x3cb   : > { %v2365_v28 = vsel %vm270_vm8, %v2319_v32, %v2364_v1  ;;  %v2789_v9 = vpop.permute.xlu0 %2788  ;;  %v3011_v12 = vpop.permute.xlu1 %3010 }
 0x3cc   : > { %v4419_v29 = vcombine.low %v2363_v2, %v2365_v28  ;;  %v4420_v41 = vcombine.high %v2363_v2, %v2365_v28  ;;  %v2807_v46 = vrot.slane %v2789_v9, 4  ;;  %v3030_v37 = vrot.slane %v3011_v12, 4 }
 0x3ce   : > { %4155 = vmatprep.subr.bf16.mxu1 %v4420_v41  ;;  %v2822_v39 = vsel %vm397_vm13, %v2806_v6, %v2807_v46 }
 0x3cf   : > { %v2793_v23 = vpop.permute.xlu0 %2792  ;;  %4156 = vmatpush2.bf16.msra.mxu1 %v4419_v29  ;;  %v3015_v55 = vpop.permute.xlu1 %3014  ;;  %v2823_v5 = vsel %vm344_vm0, %v2787_v19, %v2822_v39 }
 0x3d0   : > { %v2809_v16 = vrot.slane %v2793_v23, 4 }
 0x3d2   : > { %v2824_v31 = vsel %vm397_vm13, %v2808_v14, %v2809_v16  ;;  %4158 = vmatmul.mubr.bf16.vlgmr.msra.gmra.mxu1 %v7012_v26  ;;  %v3032_v26 = vrot.slane %v3015_v55, 4 }
 0x3d3   : > { %v2825_v63 = vsel %vm344_vm0, %v2791_v18, %v2824_v31  ;;  %v3013_v57 = vpop.permute.xlu0 %3012  ;;  %v2779_v24 = vpop.permute.xlu1 %2778  ;;  %4239 = vmatprep.mubr.bf16.mxu1 %v7018_v25 }
 0x3d4   : > { %v4495_v44 = vcombine.low %v2823_v5, %v2825_v63  ;;  %v4496_v13 = vcombine.high %v2823_v5, %v2825_v63  ;;  %v3031_v4 = vrot.slane %v3013_v57, 4  ;;  %v2802_v38 = vrot.slane %v2779_v24, 4 }
 0x3d6   : > { %4190 = vmatprep.subr.bf16.mxu0 %v4496_v13  ;;  %v3046_v52 = vsel %vm397_vm13, %v3030_v37, %v3031_v4 }
 0x3d7   : > { %v3017_v27 = vpop.permute.xlu0 %3016  ;;  %4191 = vmatpush2.bf16.msra.mxu0 %v4495_v44  ;;  %v2783_v47 = vpop.permute.xlu1 %2782  ;;  %v3047_v15 = vsel %vm378_vm4, %v3011_v12, %v3046_v52 }
 0x3d8   : > { %v3033_v0 = vrot.slane %v3017_v27, 4  ;;  %v2804_v56 = vrot.slane %v2783_v47, 4 }
 0x3da   : > { %v3048_v54 = vsel %vm397_vm13, %v3032_v26, %v3033_v0 }
 0x3db   : > { %v3049_v42 = vsel %vm378_vm4, %v3015_v55, %v3048_v54  ;;  %v2781_v36 = vpop.permute.xlu0 %2780  ;;  %v3003_v25 = vpop.permute.xlu1 %3002 }
 0x3dc   : > { %v4527_v17 = vcombine.low %v3047_v15, %v3049_v42  ;;  %v4528_v62 = vcombine.high %v3047_v15, %v3049_v42  ;;  %v2803_v34 = vrot.slane %v2781_v36, 4  ;;  %v3026_v33 = vrot.slane %v3003_v25, 4 }
 0x3de   : > { %4215 = vmatprep.subr.bf16.mxu1 %v4528_v62  ;;  %v2818_v7 = vsel %vm397_vm13, %v2802_v38, %v2803_v34 }
 0x3df   : > { %v2785_v61 = vpop.permute.xlu0 %2784  ;;  %4216 = vmatpush1.bf16.msra.mxu1 %v4527_v17  ;;  %v3007_v22 = vpop.permute.xlu1 %3006  ;;  %v2819_v50 = vsel %vm344_vm0, %v2779_v24, %v2818_v7 }
 0x3e0   : > { %v2805_v3 = vrot.slane %v2785_v61, 4  ;;  %v3028_v21 = vrot.slane %v3007_v22, 4 }
 0x3e2   : > { %v2820_v45 = vsel %vm397_vm13, %v2804_v56, %v2805_v3 }
 0x3e3   : > { %v2821_v60 = vsel %vm344_vm0, %v2783_v47, %v2820_v45  ;;  %v3005_v32 = vpop.permute.xlu0 %3004  ;;  %v2771_v35 = vpop.permute.xlu1 %2770 }
 0x3e4   : > { %v4491_v48 = vcombine.low %v2819_v50, %v2821_v60  ;;  %v4492_v53 = vcombine.high %v2819_v50, %v2821_v60  ;;  %v3027_v49 = vrot.slane %v3005_v32, 4  ;;  %v2798_v2 = vrot.slane %v2771_v35, 4 }
 0x3e6   : > { %4192 = vmatprep.subr.bf16.mxu0 %v4492_v53  ;;  %v3042_v19 = vsel %vm397_vm13, %v3026_v33, %v3027_v49 }
 0x3e7   : > { %v3009_v58 = vpop.permute.xlu0 %3008  ;;  %4193 = vmatpush2.bf16.msra.mxu0 %v4491_v48  ;;  %v2775_v40 = vpop.permute.xlu1 %2774  ;;  %v3043_v30 = vsel %vm378_vm4, %v3003_v25, %v3042_v19 }
 0x3e8   : > { %v3029_v51 = vrot.slane %v3009_v58, 4  ;;  %v2800_v41 = vrot.slane %v2775_v40, 4 }
 0x3ea   : > { %v3044_v8 = vsel %vm397_vm13, %v3028_v21, %v3029_v51 }
 0x3eb   : > { %v3045_v11 = vsel %vm378_vm4, %v3007_v22, %v3044_v8  ;;  %v2773_v18 = vpop.permute.xlu0 %2772  ;;  %v2995_v20 = vpop.permute.xlu1 %2994 }
 0x3ec   : > { %v4523_v10 = vcombine.low %v3043_v30, %v3045_v11  ;;  %v4524_v43 = vcombine.high %v3043_v30, %v3045_v11  ;;  %v2799_v1 = vrot.slane %v2773_v18, 4  ;;  %v3022_v57 = vrot.slane %v2995_v20, 4 }
 0x3ee   : > { %4217 = vmatprep.subr.bf16.mxu1 %v4524_v43  ;;  %v2814_v12 = vsel %vm397_vm13, %v2798_v2, %v2799_v1 }
 0x3ef   : > { %v2777_v28 = vpop.permute.xlu0 %2776  ;;  %4218 = vmatpush1.bf16.msra.mxu1 %v4523_v10  ;;  %v2999_v9 = vpop.permute.xlu1 %2998  ;;  %v2815_v23 = vsel %vm344_vm0, %v2771_v35, %v2814_v12 }
 0x3f0   : > { %v2801_v29 = vrot.slane %v2777_v28, 4  ;;  %v3024_v37 = vrot.slane %v2999_v9, 4 }
 0x3f2   : > { %v2816_v46 = vsel %vm397_vm13, %v2800_v41, %v2801_v29  ;;  %v6732_v6 = vpop.f32.mrf.mxu1 }
 0x3f3   : > { %v2817_v55 = vsel %vm344_vm0, %v2775_v40, %v2816_v46  ;;  %v2997_v39 = vpop.permute.xlu0 %2996  ;;  %v2763_v16 = vpop.permute.xlu1 %2762 }
 0x3f4   : > { %v4487_v14 = vcombine.low %v2815_v23, %v2817_v55  ;;  %v4488_v31 = vcombine.high %v2815_v23, %v2817_v55  ;;  %v3023_v5 = vrot.slane %v2997_v39, 4  ;;  %v4038_v63 = vpop.f32.mrf.mxu1  ;;  %v2794_v25 = vrot.slane %v2763_v16, 4 }
 0x3f6   : > { %4194 = vmatprep.subr.bf16.mxu0 %v4488_v31  ;;  %v4040_v24 = vpop.f32.mrf.mxu1  ;;  %v3038_v13 = vsel %vm397_vm13, %v3022_v57, %v3023_v5 }
 0x3f7   : > { %v3001_v44 = vpop.permute.xlu0 %3000  ;;  %4195 = vmatpush2.bf16.msra.mxu0 %v4487_v14  ;;  %v2767_v47 = vpop.permute.xlu1 %2766  ;;  %v3039_v0 = vsel %vm378_vm4, %v2995_v20, %v3038_v13  ;;  %v4774_v14 = vld.sshfl [vmem:[%s6772_s2 + $0x8] sm:$0x3 pattern:$0x76325410] }
 0x3f8   : > { %v3025_v4 = vrot.slane %v3001_v44, 4  ;;  %v4041_v27 = vpop.f32.mrf.mxu1  ;;  %v2796_v61 = vrot.slane %v2767_v47, 4 }
 0x3fa   : > { %v3040_v52 = vsel %vm397_vm13, %v3024_v37, %v3025_v4 }
 0x3fb   : > { %v3041_v26 = vsel %vm378_vm4, %v2999_v9, %v3040_v52  ;;  %v2765_v54 = vpop.permute.xlu0 %2764  ;;  %v2987_v62 = vpop.permute.xlu1 %2986 }
 0x3fc   : > { %v4519_v15 = vcombine.low %v3039_v0, %v3041_v26  ;;  %v4520_v42 = vcombine.high %v3039_v0, %v3041_v26  ;;  %v2795_v36 = vrot.slane %v2765_v54, 4  ;;  %v3018_v33 = vrot.slane %v2987_v62, 4 }
 0x3fe   : > { %4219 = vmatprep.subr.bf16.mxu1 %v4520_v42  ;;  %v2810_v34 = vsel %vm397_vm13, %v2794_v25, %v2795_v36 }
 0x3ff   : > { %v2769_v17 = vpop.permute.xlu0 %2768  ;;  %4220 = vmatpush1.bf16.msra.mxu1 %v4519_v15  ;;  %v2811_v56 = vsel %vm344_vm0, %v2763_v16, %v2810_v34  ;;  %v2991_v49 = vpop.permute.xlu1 %2990 }
 0x400   : > { %v2797_v38 = vrot.slane %v2769_v17, 4  ;;  %v3020_v8 = vrot.slane %v2991_v49, 4 }
 0x402   : > { %v2812_v22 = vsel %vm397_vm13, %v2796_v61, %v2797_v38  ;;  %v4077_v7 = vpop.f32.mrf.mxu0  ;;  %v4118_v3 = vpop.f32.mrf.mxu1 }
 0x403   : > { %v2813_v45 = vsel %vm344_vm0, %v2767_v47, %v2812_v22  ;;  %v2989_v50 = vpop.permute.xlu0 %2988 }
 0x404   : > { %v4483_v60 = vcombine.low %v2811_v56, %v2813_v45  ;;  %v4484_v32 = vcombine.high %v2811_v56, %v2813_v45  ;;  %v3019_v35 = vrot.slane %v2989_v50, 4  ;;  %v4079_v48 = vpop.f32.mrf.mxu0  ;;  %v4120_v53 = vpop.f32.mrf.mxu1 }
 0x406   : > { %4196 = vmatprep.subr.bf16.mxu0 %v4484_v32  ;;  %v4122_v58 = vpop.f32.mrf.mxu1  ;;  %v4081_v40 = vpop.f32.mrf.mxu0  ;;  %v3034_v51 = vsel %vm397_vm13, %v3018_v33, %v3019_v35 }
 0x407   : > { %v2993_v19 = vpop.permute.xlu0 %2992  ;;  %4197 = vmatpush2.bf16.msra.mxu0 %v4483_v60  ;;  %v3035_v20 = vsel %vm378_vm4, %v2987_v62, %v3034_v51 }
 0x408   : > { %v3021_v21 = vrot.slane %v2993_v19, 4  ;;  %v4123_v30 = vpop.f32.mrf.mxu1  ;;  %v4082_v11 = vpop.f32.mrf.mxu0 }
 0x40a   : > { %v3036_v18 = vsel %vm397_vm13, %v3020_v8, %v3021_v21  ;;  %4199 = vmatmul.mubr.bf16.vlgmr.msra.gmra.mxu0 %v7019_v59 }
 0x40b   : > { %v3037_v10 = vsel %vm378_vm4, %v2991_v49, %v3036_v18  ;;  %v3220_v43 = vpop.permute.xlu0 %3219 }
 0x40c   : > { %v4515_v1 = vcombine.low %v3035_v20, %v3037_v10  ;;  %v4516_v2 = vcombine.high %v3035_v20, %v3037_v10  ;;  %v3246_v28 = vpop.permute.xlu1 %3245 }
 0x40d   : > { %v4039_v9 = vadd.f32 %v4038_v63, %v3246_v28  ;;  %v4037_v12 = vadd.f32 %v6732_v6, %v3246_v28 }
 0x40e   : > { %4221 = vmatprep.subr.bf16.mxu1 %v4516_v2 }
 0x40f   : > { %4222 = vmatpush1.bf16.msra.mxu1 %v4515_v1  ;;  %v4080_v29 = vadd.f32 %v4079_v48, %v4039_v9  ;;  %v4078_v41 = vadd.f32 %v4077_v7, %v4037_v12  ;;  %v3224_v46 = vpop.permute.xlu0 %3223 }
 0x410   : > { %v3222_v23 = vpop.permute.xlu1 %3221 }
 0x411   : > { %v4119_v59 = vadd.f32 %v4118_v3, %v4078_v41  ;;  %v4121_v55 = vadd.f32 %v4120_v53, %v4080_v29  ;;  %v3225_v39 = vsel %vm378_vm4, %v3220_v43, %v3222_v23  ;;  %v3226_v16 = vsel %vm378_vm4, %v3222_v23, %v3224_v46 }
 0x412   : > { %4530 = vmatmul.mubr.msk.bf16.vlgmr.msra.gmra.mxu1 %vm3998_vm15, %v4774_v14 }
 0x413   : > { %v4248_v6 = vadd.f32 %v4119_v59, %v3225_v39  ;;  %v4249_v31 = vadd.f32 %v4121_v55, %v3226_v16  ;;  %v3235_v25 = vpop.permute.xlu0 %3234 }
 0x414   : > { %v3233_v52 = vpop.permute.xlu1 %3232 }
 0x415   : > { %vm4252_vm0 = vcmp.ge.f32.partialorder %v4248_v6, 0.0  ;;  %vm4253_vm1 = vcmp.ge.f32.partialorder %v4249_v31, 0.0  ;;  %v4256_v5 = vmul.f32 0.05, %v4248_v6  ;;  %v4257_v63 = vmul.f32 0.05, %v4249_v31 }
 0x416   : > { %v3238_v61 = vsel %vm378_vm4, %v3233_v52, %v3235_v25 }
 0x417   : > { %v4260_v57 = vsel %vm4252_vm0, %v4248_v6, %v4256_v5  ;;  %v4261_v24 = vsel %vm4253_vm1, %v4249_v31, %v4257_v63 }
 0x418   : > { %v4268_v44 = vcombine.low %v4260_v57, %v4261_v24  ;;  %v3237_v17 = vpop.permute.xlu1 %3236 }
 0x419   : > { %v3239_v7 = vsel %vm378_vm4, %v3235_v25, %v3237_v17 }
 0x41a   : > { %4272 = vst [vmem:[%s6761_s22] sm:$0x77] %v4268_v44 }
 0x492   : > { %v4159_v13 = vpop.f32.mrf.mxu1 }
 0x493   : > { %v4160_v54 = vadd.f32 %v4159_v13, %v3246_v28 }
 0x494   : > { %v4161_v4 = vpop.f32.mrf.mxu1 }
 0x495   : > { %v4162_v42 = vadd.f32 %v4161_v4, %v3246_v28 }
 0x496   : > { %v4163_v37 = vpop.f32.mrf.mxu1 }
 0x498   : > { %v4164_v27 = vpop.f32.mrf.mxu1 }
 0x4ca   : > { %v4200_v47 = vpop.f32.mrf.mxu0 }
 0x4cb   : > { %v4201_v36 = vadd.f32 %v4200_v47, %v4160_v54 }
 0x4cc   : > { %v4202_v0 = vpop.f32.mrf.mxu0 }
 0x4cd   : > { %v4203_v34 = vadd.f32 %v4202_v0, %v4162_v42 }
 0x4ce   : > { %v4204_v26 = vpop.f32.mrf.mxu0 }
 0x4d0   : > { %v4205_v15 = vpop.f32.mrf.mxu0 }
 0x4d2   : > { %v4241_v62 = vpop.f32.mrf.mxu1 }
 0x4d3   : > { %v4242_v38 = vadd.f32 %v4241_v62, %v4201_v36 }
 0x4d4   : > { %v4243_v22 = vpop.f32.mrf.mxu1 }
 0x4d5   : > { %v4250_v3 = vadd.f32 %v4242_v38, %v3238_v61  ;;  %v4244_v56 = vadd.f32 %v4243_v22, %v4203_v34 }
 0x4d6   : > { %v4245_v45 = vpop.f32.mrf.mxu1 }
 0x4d7   : > { %v4258_v50 = vmul.f32 0.05, %v4250_v3  ;;  %v4251_v60 = vadd.f32 %v4244_v56, %v3239_v7  ;;  %vm4254_vm3 = vcmp.ge.f32.partialorder %v4250_v3, 0.0 }
 0x4d8   : > { %v4246_v32 = vpop.f32.mrf.mxu1 }
 0x4d9   : > { %vm4255_vm7 = vcmp.ge.f32.partialorder %v4251_v60, 0.0  ;;  %v4259_v35 = vmul.f32 0.05, %v4251_v60  ;;  %v4262_v48 = vsel %vm4254_vm3, %v4250_v3, %v4258_v50 }
 0x4db   : > { %v4263_v53 = vsel %vm4255_vm7, %v4251_v60, %v4259_v35 }
 0x4dc   : > { %v4269_v49 = vcombine.low %v4262_v48, %v4263_v53 }
 0x4de   : > { %4273 = vst [vmem:[%s6761_s22 + $0x8] sm:$0x77] %v4269_v49 }
 0x4df PF: > { %s15_s18 = sadd.s32 1, %s4781_s18  }
 0x4e0   : > { %p12_p5 = scmp.ge.s32.totalorder %s15_s18, 4  }
 0x4e2   :  { %14 = sbr.rel (!%p12_p5) target bundleno = 1 (0x1), region = 71 }

</bundles_post_ra>
